<compile_context>
chip_gen: v7x
topology: tpu7x:2x2x1
jax: 0.10.0
libtpu: 0.0.40
codegen_flags: <defaults>
</compile_context>

<pallas_src>
import numpy as np

import jax
import jax.numpy as jnp
from jax import lax
from jax.experimental import pallas as pl
from jax.experimental.pallas import tpu as pltpu

CS = 16            # channel slots per pixel (real channels <= 16, zero padded)
D = 8              # pixels packed per grouped row  ->  D * CS = 128 lanes
LANES = D * CS     # 128
TM_TARGET = 512    # target grouped rows (= 8*TM pixels) per spatial band


def _round_up(x, m):
    return (x + m - 1) // m * m


def _cdiv(a, b):
    return -(-a // b)


# ---------------------------------------------------------------------------
# Pallas kernel: one fused Conv2d + affine(BN eval) + ReLU/exp on grouped data.
#   out[r, j*CS+co] = act( sum_delta  X[r+delta] @ C_delta  * scale + bias )
# ---------------------------------------------------------------------------
def _make_conv_kernel(deltas, tm, halo, relu, exp):
    use_halo = halo > 0
    nd = len(deltas)

    def kernel(*refs):
        if use_halo:
            x0_ref, x1_ref, w_ref, s_ref, b_ref, o_ref, xb_ref, acc_ref = refs
            # Stage band + halo contiguously (aligned, lane-dense copies only).
            xb_ref[pl.ds(0, tm), :] = x0_ref[...]
            xb_ref[pl.ds(tm, halo), :] = x1_ref[pl.ds(0, halo), :]
            src = xb_ref
        else:
            x0_ref, w_ref, s_ref, b_ref, o_ref, acc_ref = refs
            src = x0_ref

        # Every shifted slab is a CONTIGUOUS slice of `src` (no strided W
        # gather, no reshape copy).  f32 accumulation in VMEM keeps vreg
        # pressure flat; nd <= ~45, so a static loop is fine (no 121-tap
        # unroll any more).
        acc_ref[...] = jnp.dot(src[pl.ds(deltas[0], tm), :], w_ref[0],
                               preferred_element_type=jnp.float32)
        for i in range(1, nd):
            acc_ref[...] += jnp.dot(src[pl.ds(deltas[i], tm), :], w_ref[i],
                                    preferred_element_type=jnp.float32)

        # Epilogue exactly once per block, lane-dense.
        y = acc_ref[...] * s_ref[...] + b_ref[...]
        if relu:
            y = jnp.maximum(y, 0.0)
        if exp:
            y = jnp.exp(y)
        o_ref[...] = y.astype(o_ref.dtype)

    return kernel


def conv_grouped(x_g, w_packed, deltas, scale_g, bias_g, *, m_out,
                 relu=False, exp=False, tm_target=TM_TARGET):
    """One fused Conv+BN(+ReLU/exp) layer on grouped activations.

    x_g      : (NB, M_in, 128) bf16 grouped, zero-haloed activation
    w_packed : (n_delta, 128, 128) bf16 packed weight bank
    scale_g / bias_g : (1, 128) f32 per-lane affine
    Returns (NB, n_bands*TM, 128) bf16 grouped output (valid rows: m_out).
    """
    nb_, m_in, lanes = x_g.shape
    assert lanes == LANES
    nd = w_packed.shape[0]
    dmax = int(deltas[-1])
    halo = _round_up(dmax, 16) if dmax > 0 else 0

    tm = min(_round_up(m_out, 16), tm_target)
    tm = max(tm, halo, 16)                 # halo must fit in the next band
    n_bands = _cdiv(m_out, tm)
    use_halo = halo > 0

    rows_needed = (n_bands + (1 if use_halo else 0)) * tm
    rows_padded = _round_up(max(rows_needed, m_in), tm)
    if rows_padded > m_in:
        x_g = jnp.pad(x_g, ((0, 0), (0, rows_padded - m_in), (0, 0)))

    kernel = _make_conv_kernel(tuple(int(d) for d in deltas), tm, halo,
                               relu, exp)

    in_specs = [pl.BlockSpec((None, tm, LANES), lambda n, b: (n, b, 0))]
    operands = [x_g]
    if use_halo:
        # Same array again, one band ahead -> overlapping halo without any
        # manual DMA / semaphores.
        in_specs.append(pl.BlockSpec((None, tm, LANES),
                                     lambda n, b: (n, b + 1, 0)))
        operands.append(x_g)
    in_specs += [
        # Packed weight bank, resident (constant index_map).  ~<=1.2 MB bf16,
        # so default double-buffering is harmless; pipeline_mode=pl.Buffered(1)
        # could reclaim half of it if VMEM ever gets tight.
        pl.BlockSpec((nd, LANES, LANES), lambda n, b: (0, 0, 0)),
        pl.BlockSpec((1, LANES), lambda n, b: (0, 0)),
        pl.BlockSpec((1, LANES), lambda n, b: (0, 0)),
    ]
    operands += [w_packed, scale_g, bias_g]

    scratch = []
    if use_halo:
        scratch.append(pltpu.VMEM((tm + halo, LANES), jnp.bfloat16))
    scratch.append(pltpu.VMEM((tm, LANES), jnp.float32))

    return pl.pallas_call(
        kernel,
        out_shape=jax.ShapeDtypeStruct((nb_, n_bands * tm, LANES),
                                       jnp.bfloat16),
        grid_spec=pltpu.PrefetchScalarGridSpec(
            num_scalar_prefetch=0,
            grid=(nb_, n_bands),
            in_specs=in_specs,
            out_specs=pl.BlockSpec((None, tm, LANES), lambda n, b: (n, b, 0)),
            scratch_shapes=scratch,
        ),
        compiler_params=pltpu.CompilerParams(
            dimension_semantics=("parallel", "parallel")),
    )(*operands)


# ---------------------------------------------------------------------------
# Host-side packing helpers (pure layout math, done once per layer).
# ---------------------------------------------------------------------------
def _delta_table(KH, KW, Wp):
    """0/1 tensor A[d, m, j, t]=1 iff tap t hits grouped offset deltas[d],
    sub-slot m, for output slot j."""
    offs = (np.arange(KH)[:, None] * Wp + np.arange(KW)[None, :]).reshape(-1)
    j = np.arange(D)
    s = j[:, None] + offs[None, :]           # (D, T) flattened source offsets
    dlt = s // D
    m = s % D
    deltas = np.unique(dlt)
    A = np.zeros((len(deltas), D, D, offs.size), np.float32)
    for di, dv in enumerate(deltas):
        jj, tt = np.nonzero(dlt == dv)
        A[di, m[jj, tt], jj, tt] = 1.0
    return A, [int(v) for v in deltas]


def pack_conv_weights(w_hwio, Wp):
    """(KH,KW,Cin,Cout) f32 -> ((n_delta,128,128) bf16 bank, delta list)."""
    KH, KW, Cin, Cout = w_hwio.shape
    assert Cin <= CS and Cout <= CS
    A, deltas = _delta_table(KH, KW, Wp)
    w_flat = w_hwio.reshape(KH * KW, Cin, Cout).astype(jnp.float32)
    blocks = jnp.einsum('dmjt,tio->dmijo', jnp.asarray(A), w_flat)
    full = jnp.zeros((len(deltas), D, CS, D, CS), jnp.float32)
    full = full.at[:, :, :Cin, :, :Cout].set(blocks)
    return full.reshape(len(deltas), LANES, LANES).astype(jnp.bfloat16), deltas


def pack_affine(scale, bias, c_real):
    """Per-channel BN affine -> per-lane (1,128) f32 vectors (identity on the
    zero-padded channel slots, which stay inert)."""
    s = jnp.concatenate([scale.astype(jnp.float32),
                         jnp.ones((CS - c_real,), jnp.float32)])
    b = jnp.concatenate([bias.astype(jnp.float32),
                         jnp.zeros((CS - c_real,), jnp.float32)])
    return (jnp.tile(s, D).reshape(1, LANES),
            jnp.tile(b, D).reshape(1, LANES))


def pad_and_group(x_nhwc, pad):
    """(NB,H,W,C) -> zero-haloed, grouped (NB, ceil(Hp*Wp/8), 128) bf16."""
    nb_, H, W, C = x_nhwc.shape
    assert C <= CS
    Hp, Wp = H + 2 * pad, W + 2 * pad
    x = jnp.pad(x_nhwc, ((0, 0), (pad, pad), (pad, pad), (0, CS - C)))
    x = x.reshape(nb_, Hp * Wp, CS)
    m_in = _cdiv(Hp * Wp, D)
    if m_in * D > Hp * Wp:
        x = jnp.pad(x, ((0, 0), (0, m_in * D - Hp * Wp), (0, 0)))
    return x.reshape(nb_, m_in, LANES).astype(jnp.bfloat16), Wp


def ungroup(y_g, H, W, Wp, c_real):
    """grouped (NB, >=ceil(H*Wp/8), 128) -> (NB, H, W, c_real) (drops junk)."""
    nb_ = y_g.shape[0]
    y = y_g.reshape(nb_, -1, CS)[:, :H * Wp, :]
    return y.reshape(nb_, H, Wp, CS)[:, :, :W, :c_real]


# ---------------------------------------------------------------------------
# Parameter construction (deterministic, synthetic)
# ---------------------------------------------------------------------------
def _bn_affine(key, c, eps=1e-5):
    """Eval-mode BatchNorm2d folded into per-channel scale & bias."""
    k1, k2, k3, k4 = jax.random.split(key, 4)
    gamma = 1.0 + 0.1 * jax.random.normal(k1, (c,), jnp.float32)
    beta = 0.1 * jax.random.normal(k2, (c,), jnp.float32)
    rmean = 0.1 * jax.random.normal(k3, (c,), jnp.float32)
    rvar = 1.0 + 0.1 * jax.random.uniform(k4, (c,), jnp.float32)
    scale = gamma / jnp.sqrt(rvar + eps)
    bias = beta - rmean * scale
    return scale, bias


def init_params(key, num_classes, num_frames):
    C = num_frames * num_classes            # in_channels of multiframe_net
    ks = jax.random.split(key, 8)
    params = {
        # stand-in base model (see TODO(synk)): 3x3 conv, 3 -> num_classes
        "w_base": 0.1 * jax.random.normal(ks[0], (3, 3, 3, num_classes), jnp.float32),
        # MultiFrameNetLarge
        "w1": 0.02 * jax.random.normal(ks[1], (11, 11, C, C), jnp.float32),
        "w2": 0.05 * jax.random.normal(ks[2], (3, 3, C, C), jnp.float32),
        "w3": 0.05 * jax.random.normal(ks[3], (3, 3, C, C), jnp.float32),
        "w4": 0.10 * jax.random.normal(ks[4], (1, 1, C, num_classes), jnp.float32),
    }
    params["s1"], params["b1"] = _bn_affine(ks[5], C)
    params["s2"], params["b2"] = _bn_affine(ks[6], C)
    params["s3"], params["b3"] = _bn_affine(ks[7], C)
    return params


# ---------------------------------------------------------------------------
# TernausNetMultiLarge forward (Pallas)
# ---------------------------------------------------------------------------
def pallas_forward(params, x_fnchw):
    """x: (F, N, 3, H, W) NCHW frames -> (N, num_classes, H, W) NCHW output."""
    F_, N, _, H, W = x_fnchw.shape
    nc = params["w_base"].shape[3]
    C = F_ * nc
    # The grouped layout packs CS=16 channel slots per pixel; enough for
    # num_frames*num_classes = 12 here.  (Larger counts would use CS=32, D=4.)
    assert C <= CS and nc <= CS

    one_nc = jnp.ones((nc,), jnp.float32)
    zero_nc = jnp.zeros((nc,), jnp.float32)

    # ---- per-frame base model (+ .exp()), frames folded into the batch ----
    xf = jnp.transpose(x_fnchw, (0, 1, 3, 4, 2)).reshape(F_ * N, H, W, 3)
    xg, Wp0 = pad_and_group(xf, pad=1)
    w0, d0 = pack_conv_weights(params["w_base"], Wp0)
    s0, b0 = pack_affine(one_nc, zero_nc, nc)
    yg = conv_grouped(xg, w0, d0, s0, b0, m_out=_cdiv(H * Wp0, D), exp=True)
    y = ungroup(yg, H, W, Wp0, nc)                       # (F*N, H, W, nc)
    # channel concat over frames (== torch.cat(dim=1))
    y = jnp.moveaxis(y.reshape(F_, N, H, W, nc), 0, 3).reshape(N, H, W, C)

    # ---- multiframe_net: 11x11 -> 3x3 -> 3x3 (BN+ReLU) -> 1x1 ----
    xg, Wp1 = pad_and_group(y, pad=5)
    w1, d1 = pack_conv_weights(params["w1"], Wp1)
    s1, b1 = pack_affine(params["s1"], params["b1"], C)
    yg = conv_grouped(xg, w1, d1, s1, b1, m_out=_cdiv(H * Wp1, D), relu=True)
    y = ungroup(yg, H, W, Wp1, C)

    xg, Wp2 = pad_and_group(y, pad=1)
    w2, d2 = pack_conv_weights(params["w2"], Wp2)
    s2, b2 = pack_affine(params["s2"], params["b2"], C)
    yg = conv_grouped(xg, w2, d2, s2, b2, m_out=_cdiv(H * Wp2, D), relu=True)
    y = ungroup(yg, H, W, Wp2, C)

    xg, Wp3 = pad_and_group(y, pad=1)
    w3, d3 = pack_conv_weights(params["w3"], Wp3)
    s3, b3 = pack_affine(params["s3"], params["b3"], C)
    yg = conv_grouped(xg, w3, d3, s3, b3, m_out=_cdiv(H * Wp3, D), relu=True)
    y = ungroup(yg, H, W, Wp3, C)

    xg, Wp4 = pad_and_group(y, pad=0)
    w4, d4 = pack_conv_weights(params["w4"], Wp4)
    s4, b4 = pack_affine(one_nc, zero_nc, nc)
    yg = conv_grouped(xg, w4, d4, s4, b4, m_out=_cdiv(H * Wp4, D))
    y = ungroup(yg, H, W, Wp4, nc).astype(jnp.float32)   # (N, H, W, nc)

    return jnp.transpose(y, (0, 3, 1, 2))                # NHWC -> NCHW


# ---------------------------------------------------------------------------
# Plain-JAX reference (for correctness check only)
# ---------------------------------------------------------------------------
def _conv_ref_nchw(x, w_hwio, pad):
    w_oihw = jnp.transpose(w_hwio, (3, 2, 0, 1))
    return lax.conv_general_dilated(
        x, w_oihw, window_strides=(1, 1), padding=((pad, pad), (pad, pad)),
        dimension_numbers=("NCHW", "OIHW", "NCHW"),
        precision=lax.Precision.HIGHEST)


def reference_forward(params, x_fnchw):
    def bn(y, s, b):
        return y * s[None, :, None, None] + b[None, :, None, None]

    frame_outs = []
    for f in range(x_fnchw.shape[0]):
        frame_outs.append(jnp.exp(_conv_ref_nchw(x_fnchw[f], params["w_base"], 1)))
    y = jnp.concatenate(frame_outs, axis=1)
    y = jnp.maximum(bn(_conv_ref_nchw(y, params["w1"], 5), params["s1"], params["b1"]), 0.0)
    y = jnp.maximum(bn(_conv_ref_nchw(y, params["w2"], 1), params["s2"], params["b2"]), 0.0)
    y = jnp.maximum(bn(_conv_ref_nchw(y, params["w3"], 1), params["s3"], params["b3"]), 0.0)
    y = _conv_ref_nchw(y, params["w4"], 0)
    return y


# ---------------------------------------------------------------------------
if __name__ == "__main__":
    num_classes, num_frames = 4, 3
    N, H, W = 2, 16, 16

    key = jax.random.PRNGKey(0)
    k_params, k_x = jax.random.split(key)
    params = init_params(k_params, num_classes, num_frames)

    # x plays the role of the iterable of per-frame NCHW images in the
    # PyTorch forward: shape (num_frames, N, 3, H, W).
    x = jax.random.normal(k_x, (num_frames, N, 3, H, W), jnp.float32)

    out = jax.block_until_ready(jax.jit(pallas_forward)(params, x))
    ref = jax.block_until_ready(reference_forward(params, x))

    assert out.shape == (N, num_classes, H, W), out.shape
    # bf16 operands with f32 accumulation -> looser tolerance than f32.
    np.testing.assert_allclose(np.asarray(out), np.asarray(ref),
                               rtol=5e-2, atol=5e-2)
    print("KERNEL_OK")
</pallas_src>

<mosaic_0001>
module attributes {stable_mosaic.version = 11 : i64} {
  func.func @kernel(%arg0: i32, %arg1: i32, %arg2: memref<1x48x128xbf16, #tpu.memory_space<vmem>>, %arg3: memref<1x48x128xbf16, #tpu.memory_space<vmem>>, %arg4: memref<6x128x128xbf16, #tpu.memory_space<vmem>>, %arg5: memref<1x128xf32, #tpu.memory_space<vmem>>, %arg6: memref<1x128xf32, #tpu.memory_space<vmem>>, %arg7: memref<1x48x128xbf16, #tpu.memory_space<vmem>>, %arg8: memref<64x128xbf16, #tpu.memory_space<vmem>>, %arg9: memref<48x128xf32, #tpu.memory_space<vmem>>) attributes {dimension_semantics = [#tpu.dimension_semantics<parallel>, #tpu.dimension_semantics<parallel>], iteration_bounds = array<i64: 6, 1>, scalar_prefetch = 0 : i64, scratch_operands = 2 : i64, tpu.core_type = #tpu.core_type<tc>, window_params = [{transform_indices = @transform_0, window_bounds = array<i64: 1, 48, 128>}, {transform_indices = @transform_1, window_bounds = array<i64: 1, 48, 128>}, {pipeline_mode = #tpu.pipeline_mode<synchronous>, transform_indices = @transform_2, window_bounds = array<i64: 6, 128, 128>}, {pipeline_mode = #tpu.pipeline_mode<synchronous>, transform_indices = @transform_3, window_bounds = array<i64: 1, 128>}, {pipeline_mode = #tpu.pipeline_mode<synchronous>, transform_indices = @transform_4, window_bounds = array<i64: 1, 128>}, {transform_indices = @transform_5, window_bounds = array<i64: 1, 48, 128>}]} {
    %c0 = arith.constant 0 : index
    %c0_0 = arith.constant 0 : index
    %c0_1 = arith.constant 0 : index
    %0 = vector.load %arg2[%c0, %c0_0, %c0_1] : memref<1x48x128xbf16, #tpu.memory_space<vmem>>, vector<1x48x128xbf16>
    %1 = vector.shape_cast %0 : vector<1x48x128xbf16> to vector<48x128xbf16>
    %c0_2 = arith.constant 0 : index
    %c0_3 = arith.constant 0 : index
    %2 = vector.load %arg8[%c0_2, %c0_3] : memref<64x128xbf16, #tpu.memory_space<vmem>>, vector<48x128xbf16>
    tpu.vector_store %arg8[%c0_2, %c0_3], %1 {strides = array<i32>} : memref<64x128xbf16, #tpu.memory_space<vmem>>, vector<48x128xbf16>,
    %c0_4 = arith.constant 0 : index
    %c0_5 = arith.constant 0 : index
    %c0_6 = arith.constant 0 : index
    %3 = vector.load %arg3[%c0_4, %c0_5, %c0_6] : memref<1x48x128xbf16, #tpu.memory_space<vmem>>, vector<1x16x128xbf16>
    %4 = vector.shape_cast %3 : vector<1x16x128xbf16> to vector<16x128xbf16>
    %c48 = arith.constant 48 : index
    %c0_7 = arith.constant 0 : index
    %5 = vector.load %arg8[%c48, %c0_7] : memref<64x128xbf16, #tpu.memory_space<vmem>>, vector<16x128xbf16>
    tpu.vector_store %arg8[%c48, %c0_7], %4 {strides = array<i32>} : memref<64x128xbf16, #tpu.memory_space<vmem>>, vector<16x128xbf16>,
    %c0_8 = arith.constant 0 : index
    %c0_9 = arith.constant 0 : index
    %6 = vector.load %arg8[%c0_8, %c0_9] : memref<64x128xbf16, #tpu.memory_space<vmem>>, vector<48x128xbf16>
    %c0_10 = arith.constant 0 : index
    %c0_11 = arith.constant 0 : index
    %c0_12 = arith.constant 0 : index
    %7 = vector.load %arg4[%c0_10, %c0_11, %c0_12] : memref<6x128x128xbf16, #tpu.memory_space<vmem>>, vector<1x128x128xbf16>
    %8 = vector.shape_cast %7 : vector<1x128x128xbf16> to vector<128x128xbf16>
    %cst = arith.constant dense<0.000000e+00> : vector<48x128xf32>
    %9 = tpu.matmul %6, %8, %cst {dimension_numbers = #tpu.dot_dimension_numbers<[1], [0], [0], [1], [0, 0, 1, 1], [], []>} : vector<48x128xbf16>, vector<128x128xbf16>, vector<48x128xf32> -> vector<48x128xf32>
    %c0_13 = arith.constant 0 : index
    %c0_14 = arith.constant 0 : index
    %10 = vector.load %arg9[%c0_13, %c0_14] : memref<48x128xf32, #tpu.memory_space<vmem>>, vector<48x128xf32>
    tpu.vector_store %arg9[%c0_13, %c0_14], %9 {strides = array<i32>} : memref<48x128xf32, #tpu.memory_space<vmem>>, vector<48x128xf32>,
    %c0_15 = arith.constant 0 : index
    %c0_16 = arith.constant 0 : index
    %11 = vector.load %arg9[%c0_15, %c0_16] : memref<48x128xf32, #tpu.memory_space<vmem>>, vector<48x128xf32>
    %c1 = arith.constant 1 : index
    %c0_17 = arith.constant 0 : index
    %12 = vector.load %arg8[%c1, %c0_17] : memref<64x128xbf16, #tpu.memory_space<vmem>>, vector<48x128xbf16>
    %c1_18 = arith.constant 1 : index
    %c0_19 = arith.constant 0 : index
    %c0_20 = arith.constant 0 : index
    %13 = vector.load %arg4[%c1_18, %c0_19, %c0_20] : memref<6x128x128xbf16, #tpu.memory_space<vmem>>, vector<1x128x128xbf16>
    %14 = vector.shape_cast %13 : vector<1x128x128xbf16> to vector<128x128xbf16>
    %cst_21 = arith.constant dense<0.000000e+00> : vector<48x128xf32>
    %15 = tpu.matmul %12, %14, %cst_21 {dimension_numbers = #tpu.dot_dimension_numbers<[1], [0], [0], [1], [0, 0, 1, 1], [], []>} : vector<48x128xbf16>, vector<128x128xbf16>, vector<48x128xf32> -> vector<48x128xf32>
    %16 = arith.addf %11, %15 : vector<48x128xf32>
    %c0_22 = arith.constant 0 : index
    %c0_23 = arith.constant 0 : index
    %17 = vector.load %arg9[%c0_22, %c0_23] : memref<48x128xf32, #tpu.memory_space<vmem>>, vector<48x128xf32>
    tpu.vector_store %arg9[%c0_22, %c0_23], %16 {strides = array<i32>} : memref<48x128xf32, #tpu.memory_space<vmem>>, vector<48x128xf32>,
    %c0_24 = arith.constant 0 : index
    %c0_25 = arith.constant 0 : index
    %18 = vector.load %arg9[%c0_24, %c0_25] : memref<48x128xf32, #tpu.memory_space<vmem>>, vector<48x128xf32>
    %c2 = arith.constant 2 : index
    %c0_26 = arith.constant 0 : index
    %19 = vector.load %arg8[%c2, %c0_26] : memref<64x128xbf16, #tpu.memory_space<vmem>>, vector<48x128xbf16>
    %c2_27 = arith.constant 2 : index
    %c0_28 = arith.constant 0 : index
    %c0_29 = arith.constant 0 : index
    %20 = vector.load %arg4[%c2_27, %c0_28, %c0_29] : memref<6x128x128xbf16, #tpu.memory_space<vmem>>, vector<1x128x128xbf16>
    %21 = vector.shape_cast %20 : vector<1x128x128xbf16> to vector<128x128xbf16>
    %cst_30 = arith.constant dense<0.000000e+00> : vector<48x128xf32>
    %22 = tpu.matmul %19, %21, %cst_30 {dimension_numbers = #tpu.dot_dimension_numbers<[1], [0], [0], [1], [0, 0, 1, 1], [], []>} : vector<48x128xbf16>, vector<128x128xbf16>, vector<48x128xf32> -> vector<48x128xf32>
    %23 = arith.addf %18, %22 : vector<48x128xf32>
    %c0_31 = arith.constant 0 : index
    %c0_32 = arith.constant 0 : index
    %24 = vector.load %arg9[%c0_31, %c0_32] : memref<48x128xf32, #tpu.memory_space<vmem>>, vector<48x128xf32>
    tpu.vector_store %arg9[%c0_31, %c0_32], %23 {strides = array<i32>} : memref<48x128xf32, #tpu.memory_space<vmem>>, vector<48x128xf32>,
    %c0_33 = arith.constant 0 : index
    %c0_34 = arith.constant 0 : index
    %25 = vector.load %arg9[%c0_33, %c0_34] : memref<48x128xf32, #tpu.memory_space<vmem>>, vector<48x128xf32>
    %c3 = arith.constant 3 : index
    %c0_35 = arith.constant 0 : index
    %26 = vector.load %arg8[%c3, %c0_35] : memref<64x128xbf16, #tpu.memory_space<vmem>>, vector<48x128xbf16>
    %c3_36 = arith.constant 3 : index
    %c0_37 = arith.constant 0 : index
    %c0_38 = arith.constant 0 : index
    %27 = vector.load %arg4[%c3_36, %c0_37, %c0_38] : memref<6x128x128xbf16, #tpu.memory_space<vmem>>, vector<1x128x128xbf16>
    %28 = vector.shape_cast %27 : vector<1x128x128xbf16> to vector<128x128xbf16>
    %cst_39 = arith.constant dense<0.000000e+00> : vector<48x128xf32>
    %29 = tpu.matmul %26, %28, %cst_39 {dimension_numbers = #tpu.dot_dimension_numbers<[1], [0], [0], [1], [0, 0, 1, 1], [], []>} : vector<48x128xbf16>, vector<128x128xbf16>, vector<48x128xf32> -> vector<48x128xf32>
    %30 = arith.addf %25, %29 : vector<48x128xf32>
    %c0_40 = arith.constant 0 : index
    %c0_41 = arith.constant 0 : index
    %31 = vector.load %arg9[%c0_40, %c0_41] : memref<48x128xf32, #tpu.memory_space<vmem>>, vector<48x128xf32>
    tpu.vector_store %arg9[%c0_40, %c0_41], %30 {strides = array<i32>} : memref<48x128xf32, #tpu.memory_space<vmem>>, vector<48x128xf32>,
    %c0_42 = arith.constant 0 : index
    %c0_43 = arith.constant 0 : index
    %32 = vector.load %arg9[%c0_42, %c0_43] : memref<48x128xf32, #tpu.memory_space<vmem>>, vector<48x128xf32>
    %c4 = arith.constant 4 : index
    %c0_44 = arith.constant 0 : index
    %33 = vector.load %arg8[%c4, %c0_44] : memref<64x128xbf16, #tpu.memory_space<vmem>>, vector<48x128xbf16>
    %c4_45 = arith.constant 4 : index
    %c0_46 = arith.constant 0 : index
    %c0_47 = arith.constant 0 : index
    %34 = vector.load %arg4[%c4_45, %c0_46, %c0_47] : memref<6x128x128xbf16, #tpu.memory_space<vmem>>, vector<1x128x128xbf16>
    %35 = vector.shape_cast %34 : vector<1x128x128xbf16> to vector<128x128xbf16>
    %cst_48 = arith.constant dense<0.000000e+00> : vector<48x128xf32>
    %36 = tpu.matmul %33, %35, %cst_48 {dimension_numbers = #tpu.dot_dimension_numbers<[1], [0], [0], [1], [0, 0, 1, 1], [], []>} : vector<48x128xbf16>, vector<128x128xbf16>, vector<48x128xf32> -> vector<48x128xf32>
    %37 = arith.addf %32, %36 : vector<48x128xf32>
    %c0_49 = arith.constant 0 : index
    %c0_50 = arith.constant 0 : index
    %38 = vector.load %arg9[%c0_49, %c0_50] : memref<48x128xf32, #tpu.memory_space<vmem>>, vector<48x128xf32>
    tpu.vector_store %arg9[%c0_49, %c0_50], %37 {strides = array<i32>} : memref<48x128xf32, #tpu.memory_space<vmem>>, vector<48x128xf32>,
    %c0_51 = arith.constant 0 : index
    %c0_52 = arith.constant 0 : index
    %39 = vector.load %arg9[%c0_51, %c0_52] : memref<48x128xf32, #tpu.memory_space<vmem>>, vector<48x128xf32>
    %c5 = arith.constant 5 : index
    %c0_53 = arith.constant 0 : index
    %40 = vector.load %arg8[%c5, %c0_53] : memref<64x128xbf16, #tpu.memory_space<vmem>>, vector<48x128xbf16>
    %c5_54 = arith.constant 5 : index
    %c0_55 = arith.constant 0 : index
    %c0_56 = arith.constant 0 : index
    %41 = vector.load %arg4[%c5_54, %c0_55, %c0_56] : memref<6x128x128xbf16, #tpu.memory_space<vmem>>, vector<1x128x128xbf16>
    %42 = vector.shape_cast %41 : vector<1x128x128xbf16> to vector<128x128xbf16>
    %cst_57 = arith.constant dense<0.000000e+00> : vector<48x128xf32>
    %43 = tpu.matmul %40, %42, %cst_57 {dimension_numbers = #tpu.dot_dimension_numbers<[1], [0], [0], [1], [0, 0, 1, 1], [], []>} : vector<48x128xbf16>, vector<128x128xbf16>, vector<48x128xf32> -> vector<48x128xf32>
    %44 = arith.addf %39, %43 : vector<48x128xf32>
    %c0_58 = arith.constant 0 : index
    %c0_59 = arith.constant 0 : index
    %45 = vector.load %arg9[%c0_58, %c0_59] : memref<48x128xf32, #tpu.memory_space<vmem>>, vector<48x128xf32>
    tpu.vector_store %arg9[%c0_58, %c0_59], %44 {strides = array<i32>} : memref<48x128xf32, #tpu.memory_space<vmem>>, vector<48x128xf32>,
    %c0_60 = arith.constant 0 : index
    %c0_61 = arith.constant 0 : index
    %46 = vector.load %arg9[%c0_60, %c0_61] : memref<48x128xf32, #tpu.memory_space<vmem>>, vector<48x128xf32>
    %c0_62 = arith.constant 0 : index
    %c0_63 = arith.constant 0 : index
    %47 = vector.load %arg5[%c0_62, %c0_63] : memref<1x128xf32, #tpu.memory_space<vmem>>, vector<1x128xf32>
    %48 = vector.broadcast %47 : vector<1x128xf32> to vector<48x128xf32>
    %49 = arith.mulf %46, %48 : vector<48x128xf32>
    %c0_64 = arith.constant 0 : index
    %c0_65 = arith.constant 0 : index
    %50 = vector.load %arg6[%c0_64, %c0_65] : memref<1x128xf32, #tpu.memory_space<vmem>>, vector<1x128xf32>
    %51 = vector.broadcast %50 : vector<1x128xf32> to vector<48x128xf32>
    %52 = arith.addf %49, %51 : vector<48x128xf32>
    %53 = math.exp %52 : vector<48x128xf32>
    %54 = arith.truncf %53 : vector<48x128xf32> to vector<48x128xbf16>
    %c0_66 = arith.constant 0 : index
    %c0_67 = arith.constant 0 : index
    %c0_68 = arith.constant 0 : index
    %55 = vector.load %arg7[%c0_66, %c0_67, %c0_68] : memref<1x48x128xbf16, #tpu.memory_space<vmem>>, vector<1x48x128xbf16>
    %56 = vector.shape_cast %55 : vector<1x48x128xbf16> to vector<48x128xbf16>
    %57 = vector.shape_cast %54 : vector<48x128xbf16> to vector<1x48x128xbf16>
    tpu.vector_store %arg7[%c0_66, %c0_67, %c0_68], %57 {strides = array<i32>} : memref<1x48x128xbf16, #tpu.memory_space<vmem>>, vector<1x48x128xbf16>,
    return
  }
  func.func @transform_0(%arg0: i32, %arg1: i32) -> (i32, i32, i32) {
    %c0_i32 = arith.constant 0 : i32
    %c0_i32_0 = arith.constant 0 : i32
    return %arg0, %arg1, %c0_i32 : i32, i32, i32
  }
  func.func @transform_1(%arg0: i32, %arg1: i32) -> (i32, i32, i32) {
    %c1_i32 = arith.constant 1 : i32
    %0 = arith.addi %arg1, %c1_i32 : i32
    %c0_i32 = arith.constant 0 : i32
    %c0_i32_0 = arith.constant 0 : i32
    return %arg0, %0, %c0_i32 : i32, i32, i32
  }
  func.func @transform_2(%arg0: i32, %arg1: i32) -> (i32, i32, i32) {
    %c0_i32 = arith.constant 0 : i32
    %c0_i32_0 = arith.constant 0 : i32
    %c0_i32_1 = arith.constant 0 : i32
    %c0_i32_2 = arith.constant 0 : i32
    return %c0_i32, %c0_i32_0, %c0_i32_1 : i32, i32, i32
  }
  func.func @transform_3(%arg0: i32, %arg1: i32) -> (i32, i32) {
    %c0_i32 = arith.constant 0 : i32
    %c0_i32_0 = arith.constant 0 : i32
    %c0_i32_1 = arith.constant 0 : i32
    return %c0_i32, %c0_i32_0 : i32, i32
  }
  func.func @transform_4(%arg0: i32, %arg1: i32) -> (i32, i32) {
    %c0_i32 = arith.constant 0 : i32
    %c0_i32_0 = arith.constant 0 : i32
    %c0_i32_1 = arith.constant 0 : i32
    return %c0_i32, %c0_i32_0 : i32, i32
  }
  func.func @transform_5(%arg0: i32, %arg1: i32) -> (i32, i32, i32) {
    %c0_i32 = arith.constant 0 : i32
    %c0_i32_0 = arith.constant 0 : i32
    return %arg0, %arg1, %c0_i32 : i32, i32, i32
  }
}

module attributes {stable_mosaic.version = 11 : i64} {
  func.func @kernel(%arg0: i32, %arg1: i32, %arg2: memref<1x64x128xbf16, #tpu.memory_space<vmem>>, %arg3: memref<1x64x128xbf16, #tpu.memory_space<vmem>>, %arg4: memref<33x128x128xbf16, #tpu.memory_space<vmem>>, %arg5: memref<1x128xf32, #tpu.memory_space<vmem>>, %arg6: memref<1x128xf32, #tpu.memory_space<vmem>>, %arg7: memref<1x64x128xbf16, #tpu.memory_space<vmem>>, %arg8: memref<112x128xbf16, #tpu.memory_space<vmem>>, %arg9: memref<64x128xf32, #tpu.memory_space<vmem>>) attributes {dimension_semantics = [#tpu.dimension_semantics<parallel>, #tpu.dimension_semantics<parallel>], iteration_bounds = array<i64: 2, 1>, scalar_prefetch = 0 : i64, scratch_operands = 2 : i64, tpu.core_type = #tpu.core_type<tc>, window_params = [{transform_indices = @transform_0, window_bounds = array<i64: 1, 64, 128>}, {transform_indices = @transform_1, window_bounds = array<i64: 1, 64, 128>}, {pipeline_mode = #tpu.pipeline_mode<synchronous>, transform_indices = @transform_2, window_bounds = array<i64: 33, 128, 128>}, {pipeline_mode = #tpu.pipeline_mode<synchronous>, transform_indices = @transform_3, window_bounds = array<i64: 1, 128>}, {pipeline_mode = #tpu.pipeline_mode<synchronous>, transform_indices = @transform_4, window_bounds = array<i64: 1, 128>}, {transform_indices = @transform_5, window_bounds = array<i64: 1, 64, 128>}]} {
    %c0 = arith.constant 0 : index
    %c0_0 = arith.constant 0 : index
    %c0_1 = arith.constant 0 : index
    %0 = vector.load %arg2[%c0, %c0_0, %c0_1] : memref<1x64x128xbf16, #tpu.memory_space<vmem>>, vector<1x64x128xbf16>
    %1 = vector.shape_cast %0 : vector<1x64x128xbf16> to vector<64x128xbf16>
    %c0_2 = arith.constant 0 : index
    %c0_3 = arith.constant 0 : index
    %2 = vector.load %arg8[%c0_2, %c0_3] : memref<112x128xbf16, #tpu.memory_space<vmem>>, vector<64x128xbf16>
    tpu.vector_store %arg8[%c0_2, %c0_3], %1 {strides = array<i32>} : memref<112x128xbf16, #tpu.memory_space<vmem>>, vector<64x128xbf16>,
    %c0_4 = arith.constant 0 : index
    %c0_5 = arith.constant 0 : index
    %c0_6 = arith.constant 0 : index
    %3 = vector.load %arg3[%c0_4, %c0_5, %c0_6] : memref<1x64x128xbf16, #tpu.memory_space<vmem>>, vector<1x48x128xbf16>
    %4 = vector.shape_cast %3 : vector<1x48x128xbf16> to vector<48x128xbf16>
    %c64 = arith.constant 64 : index
    %c0_7 = arith.constant 0 : index
    %5 = vector.load %arg8[%c64, %c0_7] : memref<112x128xbf16, #tpu.memory_space<vmem>>, vector<48x128xbf16>
    tpu.vector_store %arg8[%c64, %c0_7], %4 {strides = array<i32>} : memref<112x128xbf16, #tpu.memory_space<vmem>>, vector<48x128xbf16>,
    %c0_8 = arith.constant 0 : index
    %c0_9 = arith.constant 0 : index
    %6 = vector.load %arg8[%c0_8, %c0_9] : memref<112x128xbf16, #tpu.memory_space<vmem>>, vector<64x128xbf16>
    %c0_10 = arith.constant 0 : index
    %c0_11 = arith.constant 0 : index
    %c0_12 = arith.constant 0 : index
    %7 = vector.load %arg4[%c0_10, %c0_11, %c0_12] : memref<33x128x128xbf16, #tpu.memory_space<vmem>>, vector<1x128x128xbf16>
    %8 = vector.shape_cast %7 : vector<1x128x128xbf16> to vector<128x128xbf16>
    %cst = arith.constant dense<0.000000e+00> : vector<64x128xf32>
    %9 = tpu.matmul %6, %8, %cst {dimension_numbers = #tpu.dot_dimension_numbers<[1], [0], [0], [1], [0, 0, 1, 1], [], []>} : vector<64x128xbf16>, vector<128x128xbf16>, vector<64x128xf32> -> vector<64x128xf32>
    %c0_13 = arith.constant 0 : index
    %c0_14 = arith.constant 0 : index
    %10 = vector.load %arg9[%c0_13, %c0_14] : memref<64x128xf32, #tpu.memory_space<vmem>>, vector<64x128xf32>
    tpu.vector_store %arg9[%c0_13, %c0_14], %9 {strides = array<i32>} : memref<64x128xf32, #tpu.memory_space<vmem>>, vector<64x128xf32>,
    %c0_15 = arith.constant 0 : index
    %c0_16 = arith.constant 0 : index
    %11 = vector.load %arg9[%c0_15, %c0_16] : memref<64x128xf32, #tpu.memory_space<vmem>>, vector<64x128xf32>
    %c1 = arith.constant 1 : index
    %c0_17 = arith.constant 0 : index
    %12 = vector.load %arg8[%c1, %c0_17] : memref<112x128xbf16, #tpu.memory_space<vmem>>, vector<64x128xbf16>
    %c1_18 = arith.constant 1 : index
    %c0_19 = arith.constant 0 : index
    %c0_20 = arith.constant 0 : index
    %13 = vector.load %arg4[%c1_18, %c0_19, %c0_20] : memref<33x128x128xbf16, #tpu.memory_space<vmem>>, vector<1x128x128xbf16>
    %14 = vector.shape_cast %13 : vector<1x128x128xbf16> to vector<128x128xbf16>
    %cst_21 = arith.constant dense<0.000000e+00> : vector<64x128xf32>
    %15 = tpu.matmul %12, %14, %cst_21 {dimension_numbers = #tpu.dot_dimension_numbers<[1], [0], [0], [1], [0, 0, 1, 1], [], []>} : vector<64x128xbf16>, vector<128x128xbf16>, vector<64x128xf32> -> vector<64x128xf32>
    %16 = arith.addf %11, %15 : vector<64x128xf32>
    %c0_22 = arith.constant 0 : index
    %c0_23 = arith.constant 0 : index
    %17 = vector.load %arg9[%c0_22, %c0_23] : memref<64x128xf32, #tpu.memory_space<vmem>>, vector<64x128xf32>
    tpu.vector_store %arg9[%c0_22, %c0_23], %16 {strides = array<i32>} : memref<64x128xf32, #tpu.memory_space<vmem>>, vector<64x128xf32>,
    %c0_24 = arith.constant 0 : index
    %c0_25 = arith.constant 0 : index
    %18 = vector.load %arg9[%c0_24, %c0_25] : memref<64x128xf32, #tpu.memory_space<vmem>>, vector<64x128xf32>
    %c2 = arith.constant 2 : index
    %c0_26 = arith.constant 0 : index
    %19 = vector.load %arg8[%c2, %c0_26] : memref<112x128xbf16, #tpu.memory_space<vmem>>, vector<64x128xbf16>
    %c2_27 = arith.constant 2 : index
    %c0_28 = arith.constant 0 : index
    %c0_29 = arith.constant 0 : index
    %20 = vector.load %arg4[%c2_27, %c0_28, %c0_29] : memref<33x128x128xbf16, #tpu.memory_space<vmem>>, vector<1x128x128xbf16>
    %21 = vector.shape_cast %20 : vector<1x128x128xbf16> to vector<128x128xbf16>
    %cst_30 = arith.constant dense<0.000000e+00> : vector<64x128xf32>
    %22 = tpu.matmul %19, %21, %cst_30 {dimension_numbers = #tpu.dot_dimension_numbers<[1], [0], [0], [1], [0, 0, 1, 1], [], []>} : vector<64x128xbf16>, vector<128x128xbf16>, vector<64x128xf32> -> vector<64x128xf32>
    %23 = arith.addf %18, %22 : vector<64x128xf32>
    %c0_31 = arith.constant 0 : index
    %c0_32 = arith.constant 0 : index
    %24 = vector.load %arg9[%c0_31, %c0_32] : memref<64x128xf32, #tpu.memory_space<vmem>>, vector<64x128xf32>
    tpu.vector_store %arg9[%c0_31, %c0_32], %23 {strides = array<i32>} : memref<64x128xf32, #tpu.memory_space<vmem>>, vector<64x128xf32>,
    %c0_33 = arith.constant 0 : index
    %c0_34 = arith.constant 0 : index
    %25 = vector.load %arg9[%c0_33, %c0_34] : memref<64x128xf32, #tpu.memory_space<vmem>>, vector<64x128xf32>
    %c3 = arith.constant 3 : index
    %c0_35 = arith.constant 0 : index
    %26 = vector.load %arg8[%c3, %c0_35] : memref<112x128xbf16, #tpu.memory_space<vmem>>, vector<64x128xbf16>
    %c3_36 = arith.constant 3 : index
    %c0_37 = arith.constant 0 : index
    %c0_38 = arith.constant 0 : index
    %27 = vector.load %arg4[%c3_36, %c0_37, %c0_38] : memref<33x128x128xbf16, #tpu.memory_space<vmem>>, vector<1x128x128xbf16>
    %28 = vector.shape_cast %27 : vector<1x128x128xbf16> to vector<128x128xbf16>
    %cst_39 = arith.constant dense<0.000000e+00> : vector<64x128xf32>
    %29 = tpu.matmul %26, %28, %cst_39 {dimension_numbers = #tpu.dot_dimension_numbers<[1], [0], [0], [1], [0, 0, 1, 1], [], []>} : vector<64x128xbf16>, vector<128x128xbf16>, vector<64x128xf32> -> vector<64x128xf32>
    %30 = arith.addf %25, %29 : vector<64x128xf32>
    %c0_40 = arith.constant 0 : index
    %c0_41 = arith.constant 0 : index
    %31 = vector.load %arg9[%c0_40, %c0_41] : memref<64x128xf32, #tpu.memory_space<vmem>>, vector<64x128xf32>
    tpu.vector_store %arg9[%c0_40, %c0_41], %30 {strides = array<i32>} : memref<64x128xf32, #tpu.memory_space<vmem>>, vector<64x128xf32>,
    %c0_42 = arith.constant 0 : index
    %c0_43 = arith.constant 0 : index
    %32 = vector.load %arg9[%c0_42, %c0_43] : memref<64x128xf32, #tpu.memory_space<vmem>>, vector<64x128xf32>
    %c4 = arith.constant 4 : index
    %c0_44 = arith.constant 0 : index
    %33 = vector.load %arg8[%c4, %c0_44] : memref<112x128xbf16, #tpu.memory_space<vmem>>, vector<64x128xbf16>
    %c4_45 = arith.constant 4 : index
    %c0_46 = arith.constant 0 : index
    %c0_47 = arith.constant 0 : index
    %34 = vector.load %arg4[%c4_45, %c0_46, %c0_47] : memref<33x128x128xbf16, #tpu.memory_space<vmem>>, vector<1x128x128xbf16>
    %35 = vector.shape_cast %34 : vector<1x128x128xbf16> to vector<128x128xbf16>
    %cst_48 = arith.constant dense<0.000000e+00> : vector<64x128xf32>
    %36 = tpu.matmul %33, %35, %cst_48 {dimension_numbers = #tpu.dot_dimension_numbers<[1], [0], [0], [1], [0, 0, 1, 1], [], []>} : vector<64x128xbf16>, vector<128x128xbf16>, vector<64x128xf32> -> vector<64x128xf32>
    %37 = arith.addf %32, %36 : vector<64x128xf32>
    %c0_49 = arith.constant 0 : index
    %c0_50 = arith.constant 0 : index
    %38 = vector.load %arg9[%c0_49, %c0_50] : memref<64x128xf32, #tpu.memory_space<vmem>>, vector<64x128xf32>
    tpu.vector_store %arg9[%c0_49, %c0_50], %37 {strides = array<i32>} : memref<64x128xf32, #tpu.memory_space<vmem>>, vector<64x128xf32>,
    %c0_51 = arith.constant 0 : index
    %c0_52 = arith.constant 0 : index
    %39 = vector.load %arg9[%c0_51, %c0_52] : memref<64x128xf32, #tpu.memory_space<vmem>>, vector<64x128xf32>
    %c5 = arith.constant 5 : index
    %c0_53 = arith.constant 0 : index
    %40 = vector.load %arg8[%c5, %c0_53] : memref<112x128xbf16, #tpu.memory_space<vmem>>, vector<64x128xbf16>
    %c5_54 = arith.constant 5 : index
    %c0_55 = arith.constant 0 : index
    %c0_56 = arith.constant 0 : index
    %41 = vector.load %arg4[%c5_54, %c0_55, %c0_56] : memref<33x128x128xbf16, #tpu.memory_space<vmem>>, vector<1x128x128xbf16>
    %42 = vector.shape_cast %41 : vector<1x128x128xbf16> to vector<128x128xbf16>
    %cst_57 = arith.constant dense<0.000000e+00> : vector<64x128xf32>
    %43 = tpu.matmul %40, %42, %cst_57 {dimension_numbers = #tpu.dot_dimension_numbers<[1], [0], [0], [1], [0, 0, 1, 1], [], []>} : vector<64x128xbf16>, vector<128x128xbf16>, vector<64x128xf32> -> vector<64x128xf32>
    %44 = arith.addf %39, %43 : vector<64x128xf32>
    %c0_58 = arith.constant 0 : index
    %c0_59 = arith.constant 0 : index
    %45 = vector.load %arg9[%c0_58, %c0_59] : memref<64x128xf32, #tpu.memory_space<vmem>>, vector<64x128xf32>
    tpu.vector_store %arg9[%c0_58, %c0_59], %44 {strides = array<i32>} : memref<64x128xf32, #tpu.memory_space<vmem>>, vector<64x128xf32>,
    %c0_60 = arith.constant 0 : index
    %c0_61 = arith.constant 0 : index
    %46 = vector.load %arg9[%c0_60, %c0_61] : memref<64x128xf32, #tpu.memory_space<vmem>>, vector<64x128xf32>
    %c6 = arith.constant 6 : index
    %c0_62 = arith.constant 0 : index
    %47 = vector.load %arg8[%c6, %c0_62] : memref<112x128xbf16, #tpu.memory_space<vmem>>, vector<64x128xbf16>
    %c6_63 = arith.constant 6 : index
    %c0_64 = arith.constant 0 : index
    %c0_65 = arith.constant 0 : index
    %48 = vector.load %arg4[%c6_63, %c0_64, %c0_65] : memref<33x128x128xbf16, #tpu.memory_space<vmem>>, vector<1x128x128xbf16>
    %49 = vector.shape_cast %48 : vector<1x128x128xbf16> to vector<128x128xbf16>
    %cst_66 = arith.constant dense<0.000000e+00> : vector<64x128xf32>
    %50 = tpu.matmul %47, %49, %cst_66 {dimension_numbers = #tpu.dot_dimension_numbers<[1], [0], [0], [1], [0, 0, 1, 1], [], []>} : vector<64x128xbf16>, vector<128x128xbf16>, vector<64x128xf32> -> vector<64x128xf32>
    %51 = arith.addf %46, %50 : vector<64x128xf32>
    %c0_67 = arith.constant 0 : index
    %c0_68 = arith.constant 0 : index
    %52 = vector.load %arg9[%c0_67, %c0_68] : memref<64x128xf32, #tpu.memory_space<vmem>>, vector<64x128xf32>
    tpu.vector_store %arg9[%c0_67, %c0_68], %51 {strides = array<i32>} : memref<64x128xf32, #tpu.memory_space<vmem>>, vector<64x128xf32>,
    %c0_69 = arith.constant 0 : index
    %c0_70 = arith.constant 0 : index
    %53 = vector.load %arg9[%c0_69, %c0_70] : memref<64x128xf32, #tpu.memory_space<vmem>>, vector<64x128xf32>
    %c7 = arith.constant 7 : index
    %c0_71 = arith.constant 0 : index
    %54 = vector.load %arg8[%c7, %c0_71] : memref<112x128xbf16, #tpu.memory_space<vmem>>, vector<64x128xbf16>
    %c7_72 = arith.constant 7 : index
    %c0_73 = arith.constant 0 : index
    %c0_74 = arith.constant 0 : index
    %55 = vector.load %arg4[%c7_72, %c0_73, %c0_74] : memref<33x128x128xbf16, #tpu.memory_space<vmem>>, vector<1x128x128xbf16>
    %56 = vector.shape_cast %55 : vector<1x128x128xbf16> to vector<128x128xbf16>
    %cst_75 = arith.constant dense<0.000000e+00> : vector<64x128xf32>
    %57 = tpu.matmul %54, %56, %cst_75 {dimension_numbers = #tpu.dot_dimension_numbers<[1], [0], [0], [1], [0, 0, 1, 1], [], []>} : vector<64x128xbf16>, vector<128x128xbf16>, vector<64x128xf32> -> vector<64x128xf32>
    %58 = arith.addf %53, %57 : vector<64x128xf32>
    %c0_76 = arith.constant 0 : index
    %c0_77 = arith.constant 0 : index
    %59 = vector.load %arg9[%c0_76, %c0_77] : memref<64x128xf32, #tpu.memory_space<vmem>>, vector<64x128xf32>
    tpu.vector_store %arg9[%c0_76, %c0_77], %58 {strides = array<i32>} : memref<64x128xf32, #tpu.memory_space<vmem>>, vector<64x128xf32>,
    %c0_78 = arith.constant 0 : index
    %c0_79 = arith.constant 0 : index
    %60 = vector.load %arg9[%c0_78, %c0_79] : memref<64x128xf32, #tpu.memory_space<vmem>>, vector<64x128xf32>
    %c8 = arith.constant 8 : index
    %c0_80 = arith.constant 0 : index
    %61 = vector.load %arg8[%c8, %c0_80] : memref<112x128xbf16, #tpu.memory_space<vmem>>, vector<64x128xbf16>
    %c8_81 = arith.constant 8 : index
    %c0_82 = arith.constant 0 : index
    %c0_83 = arith.constant 0 : index
    %62 = vector.load %arg4[%c8_81, %c0_82, %c0_83] : memref<33x128x128xbf16, #tpu.memory_space<vmem>>, vector<1x128x128xbf16>
    %63 = vector.shape_cast %62 : vector<1x128x128xbf16> to vector<128x128xbf16>
    %cst_84 = arith.constant dense<0.000000e+00> : vector<64x128xf32>
    %64 = tpu.matmul %61, %63, %cst_84 {dimension_numbers = #tpu.dot_dimension_numbers<[1], [0], [0], [1], [0, 0, 1, 1], [], []>} : vector<64x128xbf16>, vector<128x128xbf16>, vector<64x128xf32> -> vector<64x128xf32>
    %65 = arith.addf %60, %64 : vector<64x128xf32>
    %c0_85 = arith.constant 0 : index
    %c0_86 = arith.constant 0 : index
    %66 = vector.load %arg9[%c0_85, %c0_86] : memref<64x128xf32, #tpu.memory_space<vmem>>, vector<64x128xf32>
    tpu.vector_store %arg9[%c0_85, %c0_86], %65 {strides = array<i32>} : memref<64x128xf32, #tpu.memory_space<vmem>>, vector<64x128xf32>,
    %c0_87 = arith.constant 0 : index
    %c0_88 = arith.constant 0 : index
    %67 = vector.load %arg9[%c0_87, %c0_88] : memref<64x128xf32, #tpu.memory_space<vmem>>, vector<64x128xf32>
    %c9 = arith.constant 9 : index
    %c0_89 = arith.constant 0 : index
    %68 = vector.load %arg8[%c9, %c0_89] : memref<112x128xbf16, #tpu.memory_space<vmem>>, vector<64x128xbf16>
    %c9_90 = arith.constant 9 : index
    %c0_91 = arith.constant 0 : index
    %c0_92 = arith.constant 0 : index
    %69 = vector.load %arg4[%c9_90, %c0_91, %c0_92] : memref<33x128x128xbf16, #tpu.memory_space<vmem>>, vector<1x128x128xbf16>
    %70 = vector.shape_cast %69 : vector<1x128x128xbf16> to vector<128x128xbf16>
    %cst_93 = arith.constant dense<0.000000e+00> : vector<64x128xf32>
    %71 = tpu.matmul %68, %70, %cst_93 {dimension_numbers = #tpu.dot_dimension_numbers<[1], [0], [0], [1], [0, 0, 1, 1], [], []>} : vector<64x128xbf16>, vector<128x128xbf16>, vector<64x128xf32> -> vector<64x128xf32>
    %72 = arith.addf %67, %71 : vector<64x128xf32>
    %c0_94 = arith.constant 0 : index
    %c0_95 = arith.constant 0 : index
    %73 = vector.load %arg9[%c0_94, %c0_95] : memref<64x128xf32, #tpu.memory_space<vmem>>, vector<64x128xf32>
    tpu.vector_store %arg9[%c0_94, %c0_95], %72 {strides = array<i32>} : memref<64x128xf32, #tpu.memory_space<vmem>>, vector<64x128xf32>,
    %c0_96 = arith.constant 0 : index
    %c0_97 = arith.constant 0 : index
    %74 = vector.load %arg9[%c0_96, %c0_97] : memref<64x128xf32, #tpu.memory_space<vmem>>, vector<64x128xf32>
    %c10 = arith.constant 10 : index
    %c0_98 = arith.constant 0 : index
    %75 = vector.load %arg8[%c10, %c0_98] : memref<112x128xbf16, #tpu.memory_space<vmem>>, vector<64x128xbf16>
    %c10_99 = arith.constant 10 : index
    %c0_100 = arith.constant 0 : index
    %c0_101 = arith.constant 0 : index
    %76 = vector.load %arg4[%c10_99, %c0_100, %c0_101] : memref<33x128x128xbf16, #tpu.memory_space<vmem>>, vector<1x128x128xbf16>
    %77 = vector.shape_cast %76 : vector<1x128x128xbf16> to vector<128x128xbf16>
    %cst_102 = arith.constant dense<0.000000e+00> : vector<64x128xf32>
    %78 = tpu.matmul %75, %77, %cst_102 {dimension_numbers = #tpu.dot_dimension_numbers<[1], [0], [0], [1], [0, 0, 1, 1], [], []>} : vector<64x128xbf16>, vector<128x128xbf16>, vector<64x128xf32> -> vector<64x128xf32>
    %79 = arith.addf %74, %78 : vector<64x128xf32>
    %c0_103 = arith.constant 0 : index
    %c0_104 = arith.constant 0 : index
    %80 = vector.load %arg9[%c0_103, %c0_104] : memref<64x128xf32, #tpu.memory_space<vmem>>, vector<64x128xf32>
    tpu.vector_store %arg9[%c0_103, %c0_104], %79 {strides = array<i32>} : memref<64x128xf32, #tpu.memory_space<vmem>>, vector<64x128xf32>,
    %c0_105 = arith.constant 0 : index
    %c0_106 = arith.constant 0 : index
    %81 = vector.load %arg9[%c0_105, %c0_106] : memref<64x128xf32, #tpu.memory_space<vmem>>, vector<64x128xf32>
    %c11 = arith.constant 11 : index
    %c0_107 = arith.constant 0 : index
    %82 = vector.load %arg8[%c11, %c0_107] : memref<112x128xbf16, #tpu.memory_space<vmem>>, vector<64x128xbf16>
    %c11_108 = arith.constant 11 : index
    %c0_109 = arith.constant 0 : index
    %c0_110 = arith.constant 0 : index
    %83 = vector.load %arg4[%c11_108, %c0_109, %c0_110] : memref<33x128x128xbf16, #tpu.memory_space<vmem>>, vector<1x128x128xbf16>
    %84 = vector.shape_cast %83 : vector<1x128x128xbf16> to vector<128x128xbf16>
    %cst_111 = arith.constant dense<0.000000e+00> : vector<64x128xf32>
    %85 = tpu.matmul %82, %84, %cst_111 {dimension_numbers = #tpu.dot_dimension_numbers<[1], [0], [0], [1], [0, 0, 1, 1], [], []>} : vector<64x128xbf16>, vector<128x128xbf16>, vector<64x128xf32> -> vector<64x128xf32>
    %86 = arith.addf %81, %85 : vector<64x128xf32>
    %c0_112 = arith.constant 0 : index
    %c0_113 = arith.constant 0 : index
    %87 = vector.load %arg9[%c0_112, %c0_113] : memref<64x128xf32, #tpu.memory_space<vmem>>, vector<64x128xf32>
    tpu.vector_store %arg9[%c0_112, %c0_113], %86 {strides = array<i32>} : memref<64x128xf32, #tpu.memory_space<vmem>>, vector<64x128xf32>,
    %c0_114 = arith.constant 0 : index
    %c0_115 = arith.constant 0 : index
    %88 = vector.load %arg9[%c0_114, %c0_115] : memref<64x128xf32, #tpu.memory_space<vmem>>, vector<64x128xf32>
    %c13 = arith.constant 13 : index
    %c0_116 = arith.constant 0 : index
    %89 = vector.load %arg8[%c13, %c0_116] : memref<112x128xbf16, #tpu.memory_space<vmem>>, vector<64x128xbf16>
    %c12 = arith.constant 12 : index
    %c0_117 = arith.constant 0 : index
    %c0_118 = arith.constant 0 : index
    %90 = vector.load %arg4[%c12, %c0_117, %c0_118] : memref<33x128x128xbf16, #tpu.memory_space<vmem>>, vector<1x128x128xbf16>
    %91 = vector.shape_cast %90 : vector<1x128x128xbf16> to vector<128x128xbf16>
    %cst_119 = arith.constant dense<0.000000e+00> : vector<64x128xf32>
    %92 = tpu.matmul %89, %91, %cst_119 {dimension_numbers = #tpu.dot_dimension_numbers<[1], [0], [0], [1], [0, 0, 1, 1], [], []>} : vector<64x128xbf16>, vector<128x128xbf16>, vector<64x128xf32> -> vector<64x128xf32>
    %93 = arith.addf %88, %92 : vector<64x128xf32>
    %c0_120 = arith.constant 0 : index
    %c0_121 = arith.constant 0 : index
    %94 = vector.load %arg9[%c0_120, %c0_121] : memref<64x128xf32, #tpu.memory_space<vmem>>, vector<64x128xf32>
    tpu.vector_store %arg9[%c0_120, %c0_121], %93 {strides = array<i32>} : memref<64x128xf32, #tpu.memory_space<vmem>>, vector<64x128xf32>,
    %c0_122 = arith.constant 0 : index
    %c0_123 = arith.constant 0 : index
    %95 = vector.load %arg9[%c0_122, %c0_123] : memref<64x128xf32, #tpu.memory_space<vmem>>, vector<64x128xf32>
    %c14 = arith.constant 14 : index
    %c0_124 = arith.constant 0 : index
    %96 = vector.load %arg8[%c14, %c0_124] : memref<112x128xbf16, #tpu.memory_space<vmem>>, vector<64x128xbf16>
    %c13_125 = arith.constant 13 : index
    %c0_126 = arith.constant 0 : index
    %c0_127 = arith.constant 0 : index
    %97 = vector.load %arg4[%c13_125, %c0_126, %c0_127] : memref<33x128x128xbf16, #tpu.memory_space<vmem>>, vector<1x128x128xbf16>
    %98 = vector.shape_cast %97 : vector<1x128x128xbf16> to vector<128x128xbf16>
    %cst_128 = arith.constant dense<0.000000e+00> : vector<64x128xf32>
    %99 = tpu.matmul %96, %98, %cst_128 {dimension_numbers = #tpu.dot_dimension_numbers<[1], [0], [0], [1], [0, 0, 1, 1], [], []>} : vector<64x128xbf16>, vector<128x128xbf16>, vector<64x128xf32> -> vector<64x128xf32>
    %100 = arith.addf %95, %99 : vector<64x128xf32>
    %c0_129 = arith.constant 0 : index
    %c0_130 = arith.constant 0 : index
    %101 = vector.load %arg9[%c0_129, %c0_130] : memref<64x128xf32, #tpu.memory_space<vmem>>, vector<64x128xf32>
    tpu.vector_store %arg9[%c0_129, %c0_130], %100 {strides = array<i32>} : memref<64x128xf32, #tpu.memory_space<vmem>>, vector<64x128xf32>,
    %c0_131 = arith.constant 0 : index
    %c0_132 = arith.constant 0 : index
    %102 = vector.load %arg9[%c0_131, %c0_132] : memref<64x128xf32, #tpu.memory_space<vmem>>, vector<64x128xf32>
    %c15 = arith.constant 15 : index
    %c0_133 = arith.constant 0 : index
    %103 = vector.load %arg8[%c15, %c0_133] : memref<112x128xbf16, #tpu.memory_space<vmem>>, vector<64x128xbf16>
    %c14_134 = arith.constant 14 : index
    %c0_135 = arith.constant 0 : index
    %c0_136 = arith.constant 0 : index
    %104 = vector.load %arg4[%c14_134, %c0_135, %c0_136] : memref<33x128x128xbf16, #tpu.memory_space<vmem>>, vector<1x128x128xbf16>
    %105 = vector.shape_cast %104 : vector<1x128x128xbf16> to vector<128x128xbf16>
    %cst_137 = arith.constant dense<0.000000e+00> : vector<64x128xf32>
    %106 = tpu.matmul %103, %105, %cst_137 {dimension_numbers = #tpu.dot_dimension_numbers<[1], [0], [0], [1], [0, 0, 1, 1], [], []>} : vector<64x128xbf16>, vector<128x128xbf16>, vector<64x128xf32> -> vector<64x128xf32>
    %107 = arith.addf %102, %106 : vector<64x128xf32>
    %c0_138 = arith.constant 0 : index
    %c0_139 = arith.constant 0 : index
    %108 = vector.load %arg9[%c0_138, %c0_139] : memref<64x128xf32, #tpu.memory_space<vmem>>, vector<64x128xf32>
    tpu.vector_store %arg9[%c0_138, %c0_139], %107 {strides = array<i32>} : memref<64x128xf32, #tpu.memory_space<vmem>>, vector<64x128xf32>,
    %c0_140 = arith.constant 0 : index
    %c0_141 = arith.constant 0 : index
    %109 = vector.load %arg9[%c0_140, %c0_141] : memref<64x128xf32, #tpu.memory_space<vmem>>, vector<64x128xf32>
    %c16 = arith.constant 16 : index
    %c0_142 = arith.constant 0 : index
    %110 = vector.load %arg8[%c16, %c0_142] : memref<112x128xbf16, #tpu.memory_space<vmem>>, vector<64x128xbf16>
    %c15_143 = arith.constant 15 : index
    %c0_144 = arith.constant 0 : index
    %c0_145 = arith.constant 0 : index
    %111 = vector.load %arg4[%c15_143, %c0_144, %c0_145] : memref<33x128x128xbf16, #tpu.memory_space<vmem>>, vector<1x128x128xbf16>
    %112 = vector.shape_cast %111 : vector<1x128x128xbf16> to vector<128x128xbf16>
    %cst_146 = arith.constant dense<0.000000e+00> : vector<64x128xf32>
    %113 = tpu.matmul %110, %112, %cst_146 {dimension_numbers = #tpu.dot_dimension_numbers<[1], [0], [0], [1], [0, 0, 1, 1], [], []>} : vector<64x128xbf16>, vector<128x128xbf16>, vector<64x128xf32> -> vector<64x128xf32>
    %114 = arith.addf %109, %113 : vector<64x128xf32>
    %c0_147 = arith.constant 0 : index
    %c0_148 = arith.constant 0 : index
    %115 = vector.load %arg9[%c0_147, %c0_148] : memref<64x128xf32, #tpu.memory_space<vmem>>, vector<64x128xf32>
    tpu.vector_store %arg9[%c0_147, %c0_148], %114 {strides = array<i32>} : memref<64x128xf32, #tpu.memory_space<vmem>>, vector<64x128xf32>,
    %c0_149 = arith.constant 0 : index
    %c0_150 = arith.constant 0 : index
    %116 = vector.load %arg9[%c0_149, %c0_150] : memref<64x128xf32, #tpu.memory_space<vmem>>, vector<64x128xf32>
    %c17 = arith.constant 17 : index
    %c0_151 = arith.constant 0 : index
    %117 = vector.load %arg8[%c17, %c0_151] : memref<112x128xbf16, #tpu.memory_space<vmem>>, vector<64x128xbf16>
    %c16_152 = arith.constant 16 : index
    %c0_153 = arith.constant 0 : index
    %c0_154 = arith.constant 0 : index
    %118 = vector.load %arg4[%c16_152, %c0_153, %c0_154] : memref<33x128x128xbf16, #tpu.memory_space<vmem>>, vector<1x128x128xbf16>
    %119 = vector.shape_cast %118 : vector<1x128x128xbf16> to vector<128x128xbf16>
    %cst_155 = arith.constant dense<0.000000e+00> : vector<64x128xf32>
    %120 = tpu.matmul %117, %119, %cst_155 {dimension_numbers = #tpu.dot_dimension_numbers<[1], [0], [0], [1], [0, 0, 1, 1], [], []>} : vector<64x128xbf16>, vector<128x128xbf16>, vector<64x128xf32> -> vector<64x128xf32>
    %121 = arith.addf %116, %120 : vector<64x128xf32>
    %c0_156 = arith.constant 0 : index
    %c0_157 = arith.constant 0 : index
    %122 = vector.load %arg9[%c0_156, %c0_157] : memref<64x128xf32, #tpu.memory_space<vmem>>, vector<64x128xf32>
    tpu.vector_store %arg9[%c0_156, %c0_157], %121 {strides = array<i32>} : memref<64x128xf32, #tpu.memory_space<vmem>>, vector<64x128xf32>,
    %c0_158 = arith.constant 0 : index
    %c0_159 = arith.constant 0 : index
    %123 = vector.load %arg9[%c0_158, %c0_159] : memref<64x128xf32, #tpu.memory_space<vmem>>, vector<64x128xf32>
    %c18 = arith.constant 18 : index
    %c0_160 = arith.constant 0 : index
    %124 = vector.load %arg8[%c18, %c0_160] : memref<112x128xbf16, #tpu.memory_space<vmem>>, vector<64x128xbf16>
    %c17_161 = arith.constant 17 : index
    %c0_162 = arith.constant 0 : index
    %c0_163 = arith.constant 0 : index
    %125 = vector.load %arg4[%c17_161, %c0_162, %c0_163] : memref<33x128x128xbf16, #tpu.memory_space<vmem>>, vector<1x128x128xbf16>
    %126 = vector.shape_cast %125 : vector<1x128x128xbf16> to vector<128x128xbf16>
    %cst_164 = arith.constant dense<0.000000e+00> : vector<64x128xf32>
    %127 = tpu.matmul %124, %126, %cst_164 {dimension_numbers = #tpu.dot_dimension_numbers<[1], [0], [0], [1], [0, 0, 1, 1], [], []>} : vector<64x128xbf16>, vector<128x128xbf16>, vector<64x128xf32> -> vector<64x128xf32>
    %128 = arith.addf %123, %127 : vector<64x128xf32>
    %c0_165 = arith.constant 0 : index
    %c0_166 = arith.constant 0 : index
    %129 = vector.load %arg9[%c0_165, %c0_166] : memref<64x128xf32, #tpu.memory_space<vmem>>, vector<64x128xf32>
    tpu.vector_store %arg9[%c0_165, %c0_166], %128 {strides = array<i32>} : memref<64x128xf32, #tpu.memory_space<vmem>>, vector<64x128xf32>,
    %c0_167 = arith.constant 0 : index
    %c0_168 = arith.constant 0 : index
    %130 = vector.load %arg9[%c0_167, %c0_168] : memref<64x128xf32, #tpu.memory_space<vmem>>, vector<64x128xf32>
    %c19 = arith.constant 19 : index
    %c0_169 = arith.constant 0 : index
    %131 = vector.load %arg8[%c19, %c0_169] : memref<112x128xbf16, #tpu.memory_space<vmem>>, vector<64x128xbf16>
    %c18_170 = arith.constant 18 : index
    %c0_171 = arith.constant 0 : index
    %c0_172 = arith.constant 0 : index
    %132 = vector.load %arg4[%c18_170, %c0_171, %c0_172] : memref<33x128x128xbf16, #tpu.memory_space<vmem>>, vector<1x128x128xbf16>
    %133 = vector.shape_cast %132 : vector<1x128x128xbf16> to vector<128x128xbf16>
    %cst_173 = arith.constant dense<0.000000e+00> : vector<64x128xf32>
    %134 = tpu.matmul %131, %133, %cst_173 {dimension_numbers = #tpu.dot_dimension_numbers<[1], [0], [0], [1], [0, 0, 1, 1], [], []>} : vector<64x128xbf16>, vector<128x128xbf16>, vector<64x128xf32> -> vector<64x128xf32>
    %135 = arith.addf %130, %134 : vector<64x128xf32>
    %c0_174 = arith.constant 0 : index
    %c0_175 = arith.constant 0 : index
    %136 = vector.load %arg9[%c0_174, %c0_175] : memref<64x128xf32, #tpu.memory_space<vmem>>, vector<64x128xf32>
    tpu.vector_store %arg9[%c0_174, %c0_175], %135 {strides = array<i32>} : memref<64x128xf32, #tpu.memory_space<vmem>>, vector<64x128xf32>,
    %c0_176 = arith.constant 0 : index
    %c0_177 = arith.constant 0 : index
    %137 = vector.load %arg9[%c0_176, %c0_177] : memref<64x128xf32, #tpu.memory_space<vmem>>, vector<64x128xf32>
    %c20 = arith.constant 20 : index
    %c0_178 = arith.constant 0 : index
    %138 = vector.load %arg8[%c20, %c0_178] : memref<112x128xbf16, #tpu.memory_space<vmem>>, vector<64x128xbf16>
    %c19_179 = arith.constant 19 : index
    %c0_180 = arith.constant 0 : index
    %c0_181 = arith.constant 0 : index
    %139 = vector.load %arg4[%c19_179, %c0_180, %c0_181] : memref<33x128x128xbf16, #tpu.memory_space<vmem>>, vector<1x128x128xbf16>
    %140 = vector.shape_cast %139 : vector<1x128x128xbf16> to vector<128x128xbf16>
    %cst_182 = arith.constant dense<0.000000e+00> : vector<64x128xf32>
    %141 = tpu.matmul %138, %140, %cst_182 {dimension_numbers = #tpu.dot_dimension_numbers<[1], [0], [0], [1], [0, 0, 1, 1], [], []>} : vector<64x128xbf16>, vector<128x128xbf16>, vector<64x128xf32> -> vector<64x128xf32>
    %142 = arith.addf %137, %141 : vector<64x128xf32>
    %c0_183 = arith.constant 0 : index
    %c0_184 = arith.constant 0 : index
    %143 = vector.load %arg9[%c0_183, %c0_184] : memref<64x128xf32, #tpu.memory_space<vmem>>, vector<64x128xf32>
    tpu.vector_store %arg9[%c0_183, %c0_184], %142 {strides = array<i32>} : memref<64x128xf32, #tpu.memory_space<vmem>>, vector<64x128xf32>,
    %c0_185 = arith.constant 0 : index
    %c0_186 = arith.constant 0 : index
    %144 = vector.load %arg9[%c0_185, %c0_186] : memref<64x128xf32, #tpu.memory_space<vmem>>, vector<64x128xf32>
    %c21 = arith.constant 21 : index
    %c0_187 = arith.constant 0 : index
    %145 = vector.load %arg8[%c21, %c0_187] : memref<112x128xbf16, #tpu.memory_space<vmem>>, vector<64x128xbf16>
    %c20_188 = arith.constant 20 : index
    %c0_189 = arith.constant 0 : index
    %c0_190 = arith.constant 0 : index
    %146 = vector.load %arg4[%c20_188, %c0_189, %c0_190] : memref<33x128x128xbf16, #tpu.memory_space<vmem>>, vector<1x128x128xbf16>
    %147 = vector.shape_cast %146 : vector<1x128x128xbf16> to vector<128x128xbf16>
    %cst_191 = arith.constant dense<0.000000e+00> : vector<64x128xf32>
    %148 = tpu.matmul %145, %147, %cst_191 {dimension_numbers = #tpu.dot_dimension_numbers<[1], [0], [0], [1], [0, 0, 1, 1], [], []>} : vector<64x128xbf16>, vector<128x128xbf16>, vector<64x128xf32> -> vector<64x128xf32>
    %149 = arith.addf %144, %148 : vector<64x128xf32>
    %c0_192 = arith.constant 0 : index
    %c0_193 = arith.constant 0 : index
    %150 = vector.load %arg9[%c0_192, %c0_193] : memref<64x128xf32, #tpu.memory_space<vmem>>, vector<64x128xf32>
    tpu.vector_store %arg9[%c0_192, %c0_193], %149 {strides = array<i32>} : memref<64x128xf32, #tpu.memory_space<vmem>>, vector<64x128xf32>,
    %c0_194 = arith.constant 0 : index
    %c0_195 = arith.constant 0 : index
    %151 = vector.load %arg9[%c0_194, %c0_195] : memref<64x128xf32, #tpu.memory_space<vmem>>, vector<64x128xf32>
    %c22 = arith.constant 22 : index
    %c0_196 = arith.constant 0 : index
    %152 = vector.load %arg8[%c22, %c0_196] : memref<112x128xbf16, #tpu.memory_space<vmem>>, vector<64x128xbf16>
    %c21_197 = arith.constant 21 : index
    %c0_198 = arith.constant 0 : index
    %c0_199 = arith.constant 0 : index
    %153 = vector.load %arg4[%c21_197, %c0_198, %c0_199] : memref<33x128x128xbf16, #tpu.memory_space<vmem>>, vector<1x128x128xbf16>
    %154 = vector.shape_cast %153 : vector<1x128x128xbf16> to vector<128x128xbf16>
    %cst_200 = arith.constant dense<0.000000e+00> : vector<64x128xf32>
    %155 = tpu.matmul %152, %154, %cst_200 {dimension_numbers = #tpu.dot_dimension_numbers<[1], [0], [0], [1], [0, 0, 1, 1], [], []>} : vector<64x128xbf16>, vector<128x128xbf16>, vector<64x128xf32> -> vector<64x128xf32>
    %156 = arith.addf %151, %155 : vector<64x128xf32>
    %c0_201 = arith.constant 0 : index
    %c0_202 = arith.constant 0 : index
    %157 = vector.load %arg9[%c0_201, %c0_202] : memref<64x128xf32, #tpu.memory_space<vmem>>, vector<64x128xf32>
    tpu.vector_store %arg9[%c0_201, %c0_202], %156 {strides = array<i32>} : memref<64x128xf32, #tpu.memory_space<vmem>>, vector<64x128xf32>,
    %c0_203 = arith.constant 0 : index
    %c0_204 = arith.constant 0 : index
    %158 = vector.load %arg9[%c0_203, %c0_204] : memref<64x128xf32, #tpu.memory_space<vmem>>, vector<64x128xf32>
    %c23 = arith.constant 23 : index
    %c0_205 = arith.constant 0 : index
    %159 = vector.load %arg8[%c23, %c0_205] : memref<112x128xbf16, #tpu.memory_space<vmem>>, vector<64x128xbf16>
    %c22_206 = arith.constant 22 : index
    %c0_207 = arith.constant 0 : index
    %c0_208 = arith.constant 0 : index
    %160 = vector.load %arg4[%c22_206, %c0_207, %c0_208] : memref<33x128x128xbf16, #tpu.memory_space<vmem>>, vector<1x128x128xbf16>
    %161 = vector.shape_cast %160 : vector<1x128x128xbf16> to vector<128x128xbf16>
    %cst_209 = arith.constant dense<0.000000e+00> : vector<64x128xf32>
    %162 = tpu.matmul %159, %161, %cst_209 {dimension_numbers = #tpu.dot_dimension_numbers<[1], [0], [0], [1], [0, 0, 1, 1], [], []>} : vector<64x128xbf16>, vector<128x128xbf16>, vector<64x128xf32> -> vector<64x128xf32>
    %163 = arith.addf %158, %162 : vector<64x128xf32>
    %c0_210 = arith.constant 0 : index
    %c0_211 = arith.constant 0 : index
    %164 = vector.load %arg9[%c0_210, %c0_211] : memref<64x128xf32, #tpu.memory_space<vmem>>, vector<64x128xf32>
    tpu.vector_store %arg9[%c0_210, %c0_211], %163 {strides = array<i32>} : memref<64x128xf32, #tpu.memory_space<vmem>>, vector<64x128xf32>,
    %c0_212 = arith.constant 0 : index
    %c0_213 = arith.constant 0 : index
    %165 = vector.load %arg9[%c0_212, %c0_213] : memref<64x128xf32, #tpu.memory_space<vmem>>, vector<64x128xf32>
    %c24 = arith.constant 24 : index
    %c0_214 = arith.constant 0 : index
    %166 = vector.load %arg8[%c24, %c0_214] : memref<112x128xbf16, #tpu.memory_space<vmem>>, vector<64x128xbf16>
    %c23_215 = arith.constant 23 : index
    %c0_216 = arith.constant 0 : index
    %c0_217 = arith.constant 0 : index
    %167 = vector.load %arg4[%c23_215, %c0_216, %c0_217] : memref<33x128x128xbf16, #tpu.memory_space<vmem>>, vector<1x128x128xbf16>
    %168 = vector.shape_cast %167 : vector<1x128x128xbf16> to vector<128x128xbf16>
    %cst_218 = arith.constant dense<0.000000e+00> : vector<64x128xf32>
    %169 = tpu.matmul %166, %168, %cst_218 {dimension_numbers = #tpu.dot_dimension_numbers<[1], [0], [0], [1], [0, 0, 1, 1], [], []>} : vector<64x128xbf16>, vector<128x128xbf16>, vector<64x128xf32> -> vector<64x128xf32>
    %170 = arith.addf %165, %169 : vector<64x128xf32>
    %c0_219 = arith.constant 0 : index
    %c0_220 = arith.constant 0 : index
    %171 = vector.load %arg9[%c0_219, %c0_220] : memref<64x128xf32, #tpu.memory_space<vmem>>, vector<64x128xf32>
    tpu.vector_store %arg9[%c0_219, %c0_220], %170 {strides = array<i32>} : memref<64x128xf32, #tpu.memory_space<vmem>>, vector<64x128xf32>,
    %c0_221 = arith.constant 0 : index
    %c0_222 = arith.constant 0 : index
    %172 = vector.load %arg9[%c0_221, %c0_222] : memref<64x128xf32, #tpu.memory_space<vmem>>, vector<64x128xf32>
    %c26 = arith.constant 26 : index
    %c0_223 = arith.constant 0 : index
    %173 = vector.load %arg8[%c26, %c0_223] : memref<112x128xbf16, #tpu.memory_space<vmem>>, vector<64x128xbf16>
    %c24_224 = arith.constant 24 : index
    %c0_225 = arith.constant 0 : index
    %c0_226 = arith.constant 0 : index
    %174 = vector.load %arg4[%c24_224, %c0_225, %c0_226] : memref<33x128x128xbf16, #tpu.memory_space<vmem>>, vector<1x128x128xbf16>
    %175 = vector.shape_cast %174 : vector<1x128x128xbf16> to vector<128x128xbf16>
    %cst_227 = arith.constant dense<0.000000e+00> : vector<64x128xf32>
    %176 = tpu.matmul %173, %175, %cst_227 {dimension_numbers = #tpu.dot_dimension_numbers<[1], [0], [0], [1], [0, 0, 1, 1], [], []>} : vector<64x128xbf16>, vector<128x128xbf16>, vector<64x128xf32> -> vector<64x128xf32>
    %177 = arith.addf %172, %176 : vector<64x128xf32>
    %c0_228 = arith.constant 0 : index
    %c0_229 = arith.constant 0 : index
    %178 = vector.load %arg9[%c0_228, %c0_229] : memref<64x128xf32, #tpu.memory_space<vmem>>, vector<64x128xf32>
    tpu.vector_store %arg9[%c0_228, %c0_229], %177 {strides = array<i32>} : memref<64x128xf32, #tpu.memory_space<vmem>>, vector<64x128xf32>,
    %c0_230 = arith.constant 0 : index
    %c0_231 = arith.constant 0 : index
    %179 = vector.load %arg9[%c0_230, %c0_231] : memref<64x128xf32, #tpu.memory_space<vmem>>, vector<64x128xf32>
    %c27 = arith.constant 27 : index
    %c0_232 = arith.constant 0 : index
    %180 = vector.load %arg8[%c27, %c0_232] : memref<112x128xbf16, #tpu.memory_space<vmem>>, vector<64x128xbf16>
    %c25 = arith.constant 25 : index
    %c0_233 = arith.constant 0 : index
    %c0_234 = arith.constant 0 : index
    %181 = vector.load %arg4[%c25, %c0_233, %c0_234] : memref<33x128x128xbf16, #tpu.memory_space<vmem>>, vector<1x128x128xbf16>
    %182 = vector.shape_cast %181 : vector<1x128x128xbf16> to vector<128x128xbf16>
    %cst_235 = arith.constant dense<0.000000e+00> : vector<64x128xf32>
    %183 = tpu.matmul %180, %182, %cst_235 {dimension_numbers = #tpu.dot_dimension_numbers<[1], [0], [0], [1], [0, 0, 1, 1], [], []>} : vector<64x128xbf16>, vector<128x128xbf16>, vector<64x128xf32> -> vector<64x128xf32>
    %184 = arith.addf %179, %183 : vector<64x128xf32>
    %c0_236 = arith.constant 0 : index
    %c0_237 = arith.constant 0 : index
    %185 = vector.load %arg9[%c0_236, %c0_237] : memref<64x128xf32, #tpu.memory_space<vmem>>, vector<64x128xf32>
    tpu.vector_store %arg9[%c0_236, %c0_237], %184 {strides = array<i32>} : memref<64x128xf32, #tpu.memory_space<vmem>>, vector<64x128xf32>,
    %c0_238 = arith.constant 0 : index
    %c0_239 = arith.constant 0 : index
    %186 = vector.load %arg9[%c0_238, %c0_239] : memref<64x128xf32, #tpu.memory_space<vmem>>, vector<64x128xf32>
    %c28 = arith.constant 28 : index
    %c0_240 = arith.constant 0 : index
    %187 = vector.load %arg8[%c28, %c0_240] : memref<112x128xbf16, #tpu.memory_space<vmem>>, vector<64x128xbf16>
    %c26_241 = arith.constant 26 : index
    %c0_242 = arith.constant 0 : index
    %c0_243 = arith.constant 0 : index
    %188 = vector.load %arg4[%c26_241, %c0_242, %c0_243] : memref<33x128x128xbf16, #tpu.memory_space<vmem>>, vector<1x128x128xbf16>
    %189 = vector.shape_cast %188 : vector<1x128x128xbf16> to vector<128x128xbf16>
    %cst_244 = arith.constant dense<0.000000e+00> : vector<64x128xf32>
    %190 = tpu.matmul %187, %189, %cst_244 {dimension_numbers = #tpu.dot_dimension_numbers<[1], [0], [0], [1], [0, 0, 1, 1], [], []>} : vector<64x128xbf16>, vector<128x128xbf16>, vector<64x128xf32> -> vector<64x128xf32>
    %191 = arith.addf %186, %190 : vector<64x128xf32>
    %c0_245 = arith.constant 0 : index
    %c0_246 = arith.constant 0 : index
    %192 = vector.load %arg9[%c0_245, %c0_246] : memref<64x128xf32, #tpu.memory_space<vmem>>, vector<64x128xf32>
    tpu.vector_store %arg9[%c0_245, %c0_246], %191 {strides = array<i32>} : memref<64x128xf32, #tpu.memory_space<vmem>>, vector<64x128xf32>,
    %c0_247 = arith.constant 0 : index
    %c0_248 = arith.constant 0 : index
    %193 = vector.load %arg9[%c0_247, %c0_248] : memref<64x128xf32, #tpu.memory_space<vmem>>, vector<64x128xf32>
    %c29 = arith.constant 29 : index
    %c0_249 = arith.constant 0 : index
    %194 = vector.load %arg8[%c29, %c0_249] : memref<112x128xbf16, #tpu.memory_space<vmem>>, vector<64x128xbf16>
    %c27_250 = arith.constant 27 : index
    %c0_251 = arith.constant 0 : index
    %c0_252 = arith.constant 0 : index
    %195 = vector.load %arg4[%c27_250, %c0_251, %c0_252] : memref<33x128x128xbf16, #tpu.memory_space<vmem>>, vector<1x128x128xbf16>
    %196 = vector.shape_cast %195 : vector<1x128x128xbf16> to vector<128x128xbf16>
    %cst_253 = arith.constant dense<0.000000e+00> : vector<64x128xf32>
    %197 = tpu.matmul %194, %196, %cst_253 {dimension_numbers = #tpu.dot_dimension_numbers<[1], [0], [0], [1], [0, 0, 1, 1], [], []>} : vector<64x128xbf16>, vector<128x128xbf16>, vector<64x128xf32> -> vector<64x128xf32>
    %198 = arith.addf %193, %197 : vector<64x128xf32>
    %c0_254 = arith.constant 0 : index
    %c0_255 = arith.constant 0 : index
    %199 = vector.load %arg9[%c0_254, %c0_255] : memref<64x128xf32, #tpu.memory_space<vmem>>, vector<64x128xf32>
    tpu.vector_store %arg9[%c0_254, %c0_255], %198 {strides = array<i32>} : memref<64x128xf32, #tpu.memory_space<vmem>>, vector<64x128xf32>,
    %c0_256 = arith.constant 0 : index
    %c0_257 = arith.constant 0 : index
    %200 = vector.load %arg9[%c0_256, %c0_257] : memref<64x128xf32, #tpu.memory_space<vmem>>, vector<64x128xf32>
    %c30 = arith.constant 30 : index
    %c0_258 = arith.constant 0 : index
    %201 = vector.load %arg8[%c30, %c0_258] : memref<112x128xbf16, #tpu.memory_space<vmem>>, vector<64x128xbf16>
    %c28_259 = arith.constant 28 : index
    %c0_260 = arith.constant 0 : index
    %c0_261 = arith.constant 0 : index
    %202 = vector.load %arg4[%c28_259, %c0_260, %c0_261] : memref<33x128x128xbf16, #tpu.memory_space<vmem>>, vector<1x128x128xbf16>
    %203 = vector.shape_cast %202 : vector<1x128x128xbf16> to vector<128x128xbf16>
    %cst_262 = arith.constant dense<0.000000e+00> : vector<64x128xf32>
    %204 = tpu.matmul %201, %203, %cst_262 {dimension_numbers = #tpu.dot_dimension_numbers<[1], [0], [0], [1], [0, 0, 1, 1], [], []>} : vector<64x128xbf16>, vector<128x128xbf16>, vector<64x128xf32> -> vector<64x128xf32>
    %205 = arith.addf %200, %204 : vector<64x128xf32>
    %c0_263 = arith.constant 0 : index
    %c0_264 = arith.constant 0 : index
    %206 = vector.load %arg9[%c0_263, %c0_264] : memref<64x128xf32, #tpu.memory_space<vmem>>, vector<64x128xf32>
    tpu.vector_store %arg9[%c0_263, %c0_264], %205 {strides = array<i32>} : memref<64x128xf32, #tpu.memory_space<vmem>>, vector<64x128xf32>,
    %c0_265 = arith.constant 0 : index
    %c0_266 = arith.constant 0 : index
    %207 = vector.load %arg9[%c0_265, %c0_266] : memref<64x128xf32, #tpu.memory_space<vmem>>, vector<64x128xf32>
    %c31 = arith.constant 31 : index
    %c0_267 = arith.constant 0 : index
    %208 = vector.load %arg8[%c31, %c0_267] : memref<112x128xbf16, #tpu.memory_space<vmem>>, vector<64x128xbf16>
    %c29_268 = arith.constant 29 : index
    %c0_269 = arith.constant 0 : index
    %c0_270 = arith.constant 0 : index
    %209 = vector.load %arg4[%c29_268, %c0_269, %c0_270] : memref<33x128x128xbf16, #tpu.memory_space<vmem>>, vector<1x128x128xbf16>
    %210 = vector.shape_cast %209 : vector<1x128x128xbf16> to vector<128x128xbf16>
    %cst_271 = arith.constant dense<0.000000e+00> : vector<64x128xf32>
    %211 = tpu.matmul %208, %210, %cst_271 {dimension_numbers = #tpu.dot_dimension_numbers<[1], [0], [0], [1], [0, 0, 1, 1], [], []>} : vector<64x128xbf16>, vector<128x128xbf16>, vector<64x128xf32> -> vector<64x128xf32>
    %212 = arith.addf %207, %211 : vector<64x128xf32>
    %c0_272 = arith.constant 0 : index
    %c0_273 = arith.constant 0 : index
    %213 = vector.load %arg9[%c0_272, %c0_273] : memref<64x128xf32, #tpu.memory_space<vmem>>, vector<64x128xf32>
    tpu.vector_store %arg9[%c0_272, %c0_273], %212 {strides = array<i32>} : memref<64x128xf32, #tpu.memory_space<vmem>>, vector<64x128xf32>,
    %c0_274 = arith.constant 0 : index
    %c0_275 = arith.constant 0 : index
    %214 = vector.load %arg9[%c0_274, %c0_275] : memref<64x128xf32, #tpu.memory_space<vmem>>, vector<64x128xf32>
    %c32 = arith.constant 32 : index
    %c0_276 = arith.constant 0 : index
    %215 = vector.load %arg8[%c32, %c0_276] : memref<112x128xbf16, #tpu.memory_space<vmem>>, vector<64x128xbf16>
    %c30_277 = arith.constant 30 : index
    %c0_278 = arith.constant 0 : index
    %c0_279 = arith.constant 0 : index
    %216 = vector.load %arg4[%c30_277, %c0_278, %c0_279] : memref<33x128x128xbf16, #tpu.memory_space<vmem>>, vector<1x128x128xbf16>
    %217 = vector.shape_cast %216 : vector<1x128x128xbf16> to vector<128x128xbf16>
    %cst_280 = arith.constant dense<0.000000e+00> : vector<64x128xf32>
    %218 = tpu.matmul %215, %217, %cst_280 {dimension_numbers = #tpu.dot_dimension_numbers<[1], [0], [0], [1], [0, 0, 1, 1], [], []>} : vector<64x128xbf16>, vector<128x128xbf16>, vector<64x128xf32> -> vector<64x128xf32>
    %219 = arith.addf %214, %218 : vector<64x128xf32>
    %c0_281 = arith.constant 0 : index
    %c0_282 = arith.constant 0 : index
    %220 = vector.load %arg9[%c0_281, %c0_282] : memref<64x128xf32, #tpu.memory_space<vmem>>, vector<64x128xf32>
    tpu.vector_store %arg9[%c0_281, %c0_282], %219 {strides = array<i32>} : memref<64x128xf32, #tpu.memory_space<vmem>>, vector<64x128xf32>,
    %c0_283 = arith.constant 0 : index
    %c0_284 = arith.constant 0 : index
    %221 = vector.load %arg9[%c0_283, %c0_284] : memref<64x128xf32, #tpu.memory_space<vmem>>, vector<64x128xf32>
    %c33 = arith.constant 33 : index
    %c0_285 = arith.constant 0 : index
    %222 = vector.load %arg8[%c33, %c0_285] : memref<112x128xbf16, #tpu.memory_space<vmem>>, vector<64x128xbf16>
    %c31_286 = arith.constant 31 : index
    %c0_287 = arith.constant 0 : index
    %c0_288 = arith.constant 0 : index
    %223 = vector.load %arg4[%c31_286, %c0_287, %c0_288] : memref<33x128x128xbf16, #tpu.memory_space<vmem>>, vector<1x128x128xbf16>
    %224 = vector.shape_cast %223 : vector<1x128x128xbf16> to vector<128x128xbf16>
    %cst_289 = arith.constant dense<0.000000e+00> : vector<64x128xf32>
    %225 = tpu.matmul %222, %224, %cst_289 {dimension_numbers = #tpu.dot_dimension_numbers<[1], [0], [0], [1], [0, 0, 1, 1], [], []>} : vector<64x128xbf16>, vector<128x128xbf16>, vector<64x128xf32> -> vector<64x128xf32>
    %226 = arith.addf %221, %225 : vector<64x128xf32>
    %c0_290 = arith.constant 0 : index
    %c0_291 = arith.constant 0 : index
    %227 = vector.load %arg9[%c0_290, %c0_291] : memref<64x128xf32, #tpu.memory_space<vmem>>, vector<64x128xf32>
    tpu.vector_store %arg9[%c0_290, %c0_291], %226 {strides = array<i32>} : memref<64x128xf32, #tpu.memory_space<vmem>>, vector<64x128xf32>,
    %c0_292 = arith.constant 0 : index
    %c0_293 = arith.constant 0 : index
    %228 = vector.load %arg9[%c0_292, %c0_293] : memref<64x128xf32, #tpu.memory_space<vmem>>, vector<64x128xf32>
    %c34 = arith.constant 34 : index
    %c0_294 = arith.constant 0 : index
    %229 = vector.load %arg8[%c34, %c0_294] : memref<112x128xbf16, #tpu.memory_space<vmem>>, vector<64x128xbf16>
    %c32_295 = arith.constant 32 : index
    %c0_296 = arith.constant 0 : index
    %c0_297 = arith.constant 0 : index
    %230 = vector.load %arg4[%c32_295, %c0_296, %c0_297] : memref<33x128x128xbf16, #tpu.memory_space<vmem>>, vector<1x128x128xbf16>
    %231 = vector.shape_cast %230 : vector<1x128x128xbf16> to vector<128x128xbf16>
    %cst_298 = arith.constant dense<0.000000e+00> : vector<64x128xf32>
    %232 = tpu.matmul %229, %231, %cst_298 {dimension_numbers = #tpu.dot_dimension_numbers<[1], [0], [0], [1], [0, 0, 1, 1], [], []>} : vector<64x128xbf16>, vector<128x128xbf16>, vector<64x128xf32> -> vector<64x128xf32>
    %233 = arith.addf %228, %232 : vector<64x128xf32>
    %c0_299 = arith.constant 0 : index
    %c0_300 = arith.constant 0 : index
    %234 = vector.load %arg9[%c0_299, %c0_300] : memref<64x128xf32, #tpu.memory_space<vmem>>, vector<64x128xf32>
    tpu.vector_store %arg9[%c0_299, %c0_300], %233 {strides = array<i32>} : memref<64x128xf32, #tpu.memory_space<vmem>>, vector<64x128xf32>,
    %c0_301 = arith.constant 0 : index
    %c0_302 = arith.constant 0 : index
    %235 = vector.load %arg9[%c0_301, %c0_302] : memref<64x128xf32, #tpu.memory_space<vmem>>, vector<64x128xf32>
    %c0_303 = arith.constant 0 : index
    %c0_304 = arith.constant 0 : index
    %236 = vector.load %arg5[%c0_303, %c0_304] : memref<1x128xf32, #tpu.memory_space<vmem>>, vector<1x128xf32>
    %237 = vector.broadcast %236 : vector<1x128xf32> to vector<64x128xf32>
    %238 = arith.mulf %235, %237 : vector<64x128xf32>
    %c0_305 = arith.constant 0 : index
    %c0_306 = arith.constant 0 : index
    %239 = vector.load %arg6[%c0_305, %c0_306] : memref<1x128xf32, #tpu.memory_space<vmem>>, vector<1x128xf32>
    %240 = vector.broadcast %239 : vector<1x128xf32> to vector<64x128xf32>
    %241 = arith.addf %238, %240 : vector<64x128xf32>
    %cst_307 = arith.constant 0.000000e+00 : f32
    %242 = vector.broadcast %cst_307 : f32 to vector<64x128xf32>
    %243 = arith.maximumf %241, %242 : vector<64x128xf32>
    %244 = arith.truncf %243 : vector<64x128xf32> to vector<64x128xbf16>
    %c0_308 = arith.constant 0 : index
    %c0_309 = arith.constant 0 : index
    %c0_310 = arith.constant 0 : index
    %245 = vector.load %arg7[%c0_308, %c0_309, %c0_310] : memref<1x64x128xbf16, #tpu.memory_space<vmem>>, vector<1x64x128xbf16>
    %246 = vector.shape_cast %245 : vector<1x64x128xbf16> to vector<64x128xbf16>
    %247 = vector.shape_cast %244 : vector<64x128xbf16> to vector<1x64x128xbf16>
    tpu.vector_store %arg7[%c0_308, %c0_309, %c0_310], %247 {strides = array<i32>} : memref<1x64x128xbf16, #tpu.memory_space<vmem>>, vector<1x64x128xbf16>,
    return
  }
  func.func @transform_0(%arg0: i32, %arg1: i32) -> (i32, i32, i32) {
    %c0_i32 = arith.constant 0 : i32
    %c0_i32_0 = arith.constant 0 : i32
    return %arg0, %arg1, %c0_i32 : i32, i32, i32
  }
  func.func @transform_1(%arg0: i32, %arg1: i32) -> (i32, i32, i32) {
    %c1_i32 = arith.constant 1 : i32
    %0 = arith.addi %arg1, %c1_i32 : i32
    %c0_i32 = arith.constant 0 : i32
    %c0_i32_0 = arith.constant 0 : i32
    return %arg0, %0, %c0_i32 : i32, i32, i32
  }
  func.func @transform_2(%arg0: i32, %arg1: i32) -> (i32, i32, i32) {
    %c0_i32 = arith.constant 0 : i32
    %c0_i32_0 = arith.constant 0 : i32
    %c0_i32_1 = arith.constant 0 : i32
    %c0_i32_2 = arith.constant 0 : i32
    return %c0_i32, %c0_i32_0, %c0_i32_1 : i32, i32, i32
  }
  func.func @transform_3(%arg0: i32, %arg1: i32) -> (i32, i32) {
    %c0_i32 = arith.constant 0 : i32
    %c0_i32_0 = arith.constant 0 : i32
    %c0_i32_1 = arith.constant 0 : i32
    return %c0_i32, %c0_i32_0 : i32, i32
  }
  func.func @transform_4(%arg0: i32, %arg1: i32) -> (i32, i32) {
    %c0_i32 = arith.constant 0 : i32
    %c0_i32_0 = arith.constant 0 : i32
    %c0_i32_1 = arith.constant 0 : i32
    return %c0_i32, %c0_i32_0 : i32, i32
  }
  func.func @transform_5(%arg0: i32, %arg1: i32) -> (i32, i32, i32) {
    %c0_i32 = arith.constant 0 : i32
    %c0_i32_0 = arith.constant 0 : i32
    return %arg0, %arg1, %c0_i32 : i32, i32, i32
  }
}

module attributes {stable_mosaic.version = 11 : i64} {
  func.func @kernel(%arg0: i32, %arg1: i32, %arg2: memref<1x48x128xbf16, #tpu.memory_space<vmem>>, %arg3: memref<1x48x128xbf16, #tpu.memory_space<vmem>>, %arg4: memref<6x128x128xbf16, #tpu.memory_space<vmem>>, %arg5: memref<1x128xf32, #tpu.memory_space<vmem>>, %arg6: memref<1x128xf32, #tpu.memory_space<vmem>>, %arg7: memref<1x48x128xbf16, #tpu.memory_space<vmem>>, %arg8: memref<64x128xbf16, #tpu.memory_space<vmem>>, %arg9: memref<48x128xf32, #tpu.memory_space<vmem>>) attributes {dimension_semantics = [#tpu.dimension_semantics<parallel>, #tpu.dimension_semantics<parallel>], iteration_bounds = array<i64: 2, 1>, scalar_prefetch = 0 : i64, scratch_operands = 2 : i64, tpu.core_type = #tpu.core_type<tc>, window_params = [{transform_indices = @transform_0, window_bounds = array<i64: 1, 48, 128>}, {transform_indices = @transform_1, window_bounds = array<i64: 1, 48, 128>}, {pipeline_mode = #tpu.pipeline_mode<synchronous>, transform_indices = @transform_2, window_bounds = array<i64: 6, 128, 128>}, {pipeline_mode = #tpu.pipeline_mode<synchronous>, transform_indices = @transform_3, window_bounds = array<i64: 1, 128>}, {pipeline_mode = #tpu.pipeline_mode<synchronous>, transform_indices = @transform_4, window_bounds = array<i64: 1, 128>}, {transform_indices = @transform_5, window_bounds = array<i64: 1, 48, 128>}]} {
    %c0 = arith.constant 0 : index
    %c0_0 = arith.constant 0 : index
    %c0_1 = arith.constant 0 : index
    %0 = vector.load %arg2[%c0, %c0_0, %c0_1] : memref<1x48x128xbf16, #tpu.memory_space<vmem>>, vector<1x48x128xbf16>
    %1 = vector.shape_cast %0 : vector<1x48x128xbf16> to vector<48x128xbf16>
    %c0_2 = arith.constant 0 : index
    %c0_3 = arith.constant 0 : index
    %2 = vector.load %arg8[%c0_2, %c0_3] : memref<64x128xbf16, #tpu.memory_space<vmem>>, vector<48x128xbf16>
    tpu.vector_store %arg8[%c0_2, %c0_3], %1 {strides = array<i32>} : memref<64x128xbf16, #tpu.memory_space<vmem>>, vector<48x128xbf16>,
    %c0_4 = arith.constant 0 : index
    %c0_5 = arith.constant 0 : index
    %c0_6 = arith.constant 0 : index
    %3 = vector.load %arg3[%c0_4, %c0_5, %c0_6] : memref<1x48x128xbf16, #tpu.memory_space<vmem>>, vector<1x16x128xbf16>
    %4 = vector.shape_cast %3 : vector<1x16x128xbf16> to vector<16x128xbf16>
    %c48 = arith.constant 48 : index
    %c0_7 = arith.constant 0 : index
    %5 = vector.load %arg8[%c48, %c0_7] : memref<64x128xbf16, #tpu.memory_space<vmem>>, vector<16x128xbf16>
    tpu.vector_store %arg8[%c48, %c0_7], %4 {strides = array<i32>} : memref<64x128xbf16, #tpu.memory_space<vmem>>, vector<16x128xbf16>,
    %c0_8 = arith.constant 0 : index
    %c0_9 = arith.constant 0 : index
    %6 = vector.load %arg8[%c0_8, %c0_9] : memref<64x128xbf16, #tpu.memory_space<vmem>>, vector<48x128xbf16>
    %c0_10 = arith.constant 0 : index
    %c0_11 = arith.constant 0 : index
    %c0_12 = arith.constant 0 : index
    %7 = vector.load %arg4[%c0_10, %c0_11, %c0_12] : memref<6x128x128xbf16, #tpu.memory_space<vmem>>, vector<1x128x128xbf16>
    %8 = vector.shape_cast %7 : vector<1x128x128xbf16> to vector<128x128xbf16>
    %cst = arith.constant dense<0.000000e+00> : vector<48x128xf32>
    %9 = tpu.matmul %6, %8, %cst {dimension_numbers = #tpu.dot_dimension_numbers<[1], [0], [0], [1], [0, 0, 1, 1], [], []>} : vector<48x128xbf16>, vector<128x128xbf16>, vector<48x128xf32> -> vector<48x128xf32>
    %c0_13 = arith.constant 0 : index
    %c0_14 = arith.constant 0 : index
    %10 = vector.load %arg9[%c0_13, %c0_14] : memref<48x128xf32, #tpu.memory_space<vmem>>, vector<48x128xf32>
    tpu.vector_store %arg9[%c0_13, %c0_14], %9 {strides = array<i32>} : memref<48x128xf32, #tpu.memory_space<vmem>>, vector<48x128xf32>,
    %c0_15 = arith.constant 0 : index
    %c0_16 = arith.constant 0 : index
    %11 = vector.load %arg9[%c0_15, %c0_16] : memref<48x128xf32, #tpu.memory_space<vmem>>, vector<48x128xf32>
    %c1 = arith.constant 1 : index
    %c0_17 = arith.constant 0 : index
    %12 = vector.load %arg8[%c1, %c0_17] : memref<64x128xbf16, #tpu.memory_space<vmem>>, vector<48x128xbf16>
    %c1_18 = arith.constant 1 : index
    %c0_19 = arith.constant 0 : index
    %c0_20 = arith.constant 0 : index
    %13 = vector.load %arg4[%c1_18, %c0_19, %c0_20] : memref<6x128x128xbf16, #tpu.memory_space<vmem>>, vector<1x128x128xbf16>
    %14 = vector.shape_cast %13 : vector<1x128x128xbf16> to vector<128x128xbf16>
    %cst_21 = arith.constant dense<0.000000e+00> : vector<48x128xf32>
    %15 = tpu.matmul %12, %14, %cst_21 {dimension_numbers = #tpu.dot_dimension_numbers<[1], [0], [0], [1], [0, 0, 1, 1], [], []>} : vector<48x128xbf16>, vector<128x128xbf16>, vector<48x128xf32> -> vector<48x128xf32>
    %16 = arith.addf %11, %15 : vector<48x128xf32>
    %c0_22 = arith.constant 0 : index
    %c0_23 = arith.constant 0 : index
    %17 = vector.load %arg9[%c0_22, %c0_23] : memref<48x128xf32, #tpu.memory_space<vmem>>, vector<48x128xf32>
    tpu.vector_store %arg9[%c0_22, %c0_23], %16 {strides = array<i32>} : memref<48x128xf32, #tpu.memory_space<vmem>>, vector<48x128xf32>,
    %c0_24 = arith.constant 0 : index
    %c0_25 = arith.constant 0 : index
    %18 = vector.load %arg9[%c0_24, %c0_25] : memref<48x128xf32, #tpu.memory_space<vmem>>, vector<48x128xf32>
    %c2 = arith.constant 2 : index
    %c0_26 = arith.constant 0 : index
    %19 = vector.load %arg8[%c2, %c0_26] : memref<64x128xbf16, #tpu.memory_space<vmem>>, vector<48x128xbf16>
    %c2_27 = arith.constant 2 : index
    %c0_28 = arith.constant 0 : index
    %c0_29 = arith.constant 0 : index
    %20 = vector.load %arg4[%c2_27, %c0_28, %c0_29] : memref<6x128x128xbf16, #tpu.memory_space<vmem>>, vector<1x128x128xbf16>
    %21 = vector.shape_cast %20 : vector<1x128x128xbf16> to vector<128x128xbf16>
    %cst_30 = arith.constant dense<0.000000e+00> : vector<48x128xf32>
    %22 = tpu.matmul %19, %21, %cst_30 {dimension_numbers = #tpu.dot_dimension_numbers<[1], [0], [0], [1], [0, 0, 1, 1], [], []>} : vector<48x128xbf16>, vector<128x128xbf16>, vector<48x128xf32> -> vector<48x128xf32>
    %23 = arith.addf %18, %22 : vector<48x128xf32>
    %c0_31 = arith.constant 0 : index
    %c0_32 = arith.constant 0 : index
    %24 = vector.load %arg9[%c0_31, %c0_32] : memref<48x128xf32, #tpu.memory_space<vmem>>, vector<48x128xf32>
    tpu.vector_store %arg9[%c0_31, %c0_32], %23 {strides = array<i32>} : memref<48x128xf32, #tpu.memory_space<vmem>>, vector<48x128xf32>,
    %c0_33 = arith.constant 0 : index
    %c0_34 = arith.constant 0 : index
    %25 = vector.load %arg9[%c0_33, %c0_34] : memref<48x128xf32, #tpu.memory_space<vmem>>, vector<48x128xf32>
    %c3 = arith.constant 3 : index
    %c0_35 = arith.constant 0 : index
    %26 = vector.load %arg8[%c3, %c0_35] : memref<64x128xbf16, #tpu.memory_space<vmem>>, vector<48x128xbf16>
    %c3_36 = arith.constant 3 : index
    %c0_37 = arith.constant 0 : index
    %c0_38 = arith.constant 0 : index
    %27 = vector.load %arg4[%c3_36, %c0_37, %c0_38] : memref<6x128x128xbf16, #tpu.memory_space<vmem>>, vector<1x128x128xbf16>
    %28 = vector.shape_cast %27 : vector<1x128x128xbf16> to vector<128x128xbf16>
    %cst_39 = arith.constant dense<0.000000e+00> : vector<48x128xf32>
    %29 = tpu.matmul %26, %28, %cst_39 {dimension_numbers = #tpu.dot_dimension_numbers<[1], [0], [0], [1], [0, 0, 1, 1], [], []>} : vector<48x128xbf16>, vector<128x128xbf16>, vector<48x128xf32> -> vector<48x128xf32>
    %30 = arith.addf %25, %29 : vector<48x128xf32>
    %c0_40 = arith.constant 0 : index
    %c0_41 = arith.constant 0 : index
    %31 = vector.load %arg9[%c0_40, %c0_41] : memref<48x128xf32, #tpu.memory_space<vmem>>, vector<48x128xf32>
    tpu.vector_store %arg9[%c0_40, %c0_41], %30 {strides = array<i32>} : memref<48x128xf32, #tpu.memory_space<vmem>>, vector<48x128xf32>,
    %c0_42 = arith.constant 0 : index
    %c0_43 = arith.constant 0 : index
    %32 = vector.load %arg9[%c0_42, %c0_43] : memref<48x128xf32, #tpu.memory_space<vmem>>, vector<48x128xf32>
    %c4 = arith.constant 4 : index
    %c0_44 = arith.constant 0 : index
    %33 = vector.load %arg8[%c4, %c0_44] : memref<64x128xbf16, #tpu.memory_space<vmem>>, vector<48x128xbf16>
    %c4_45 = arith.constant 4 : index
    %c0_46 = arith.constant 0 : index
    %c0_47 = arith.constant 0 : index
    %34 = vector.load %arg4[%c4_45, %c0_46, %c0_47] : memref<6x128x128xbf16, #tpu.memory_space<vmem>>, vector<1x128x128xbf16>
    %35 = vector.shape_cast %34 : vector<1x128x128xbf16> to vector<128x128xbf16>
    %cst_48 = arith.constant dense<0.000000e+00> : vector<48x128xf32>
    %36 = tpu.matmul %33, %35, %cst_48 {dimension_numbers = #tpu.dot_dimension_numbers<[1], [0], [0], [1], [0, 0, 1, 1], [], []>} : vector<48x128xbf16>, vector<128x128xbf16>, vector<48x128xf32> -> vector<48x128xf32>
    %37 = arith.addf %32, %36 : vector<48x128xf32>
    %c0_49 = arith.constant 0 : index
    %c0_50 = arith.constant 0 : index
    %38 = vector.load %arg9[%c0_49, %c0_50] : memref<48x128xf32, #tpu.memory_space<vmem>>, vector<48x128xf32>
    tpu.vector_store %arg9[%c0_49, %c0_50], %37 {strides = array<i32>} : memref<48x128xf32, #tpu.memory_space<vmem>>, vector<48x128xf32>,
    %c0_51 = arith.constant 0 : index
    %c0_52 = arith.constant 0 : index
    %39 = vector.load %arg9[%c0_51, %c0_52] : memref<48x128xf32, #tpu.memory_space<vmem>>, vector<48x128xf32>
    %c5 = arith.constant 5 : index
    %c0_53 = arith.constant 0 : index
    %40 = vector.load %arg8[%c5, %c0_53] : memref<64x128xbf16, #tpu.memory_space<vmem>>, vector<48x128xbf16>
    %c5_54 = arith.constant 5 : index
    %c0_55 = arith.constant 0 : index
    %c0_56 = arith.constant 0 : index
    %41 = vector.load %arg4[%c5_54, %c0_55, %c0_56] : memref<6x128x128xbf16, #tpu.memory_space<vmem>>, vector<1x128x128xbf16>
    %42 = vector.shape_cast %41 : vector<1x128x128xbf16> to vector<128x128xbf16>
    %cst_57 = arith.constant dense<0.000000e+00> : vector<48x128xf32>
    %43 = tpu.matmul %40, %42, %cst_57 {dimension_numbers = #tpu.dot_dimension_numbers<[1], [0], [0], [1], [0, 0, 1, 1], [], []>} : vector<48x128xbf16>, vector<128x128xbf16>, vector<48x128xf32> -> vector<48x128xf32>
    %44 = arith.addf %39, %43 : vector<48x128xf32>
    %c0_58 = arith.constant 0 : index
    %c0_59 = arith.constant 0 : index
    %45 = vector.load %arg9[%c0_58, %c0_59] : memref<48x128xf32, #tpu.memory_space<vmem>>, vector<48x128xf32>
    tpu.vector_store %arg9[%c0_58, %c0_59], %44 {strides = array<i32>} : memref<48x128xf32, #tpu.memory_space<vmem>>, vector<48x128xf32>,
    %c0_60 = arith.constant 0 : index
    %c0_61 = arith.constant 0 : index
    %46 = vector.load %arg9[%c0_60, %c0_61] : memref<48x128xf32, #tpu.memory_space<vmem>>, vector<48x128xf32>
    %c0_62 = arith.constant 0 : index
    %c0_63 = arith.constant 0 : index
    %47 = vector.load %arg5[%c0_62, %c0_63] : memref<1x128xf32, #tpu.memory_space<vmem>>, vector<1x128xf32>
    %48 = vector.broadcast %47 : vector<1x128xf32> to vector<48x128xf32>
    %49 = arith.mulf %46, %48 : vector<48x128xf32>
    %c0_64 = arith.constant 0 : index
    %c0_65 = arith.constant 0 : index
    %50 = vector.load %arg6[%c0_64, %c0_65] : memref<1x128xf32, #tpu.memory_space<vmem>>, vector<1x128xf32>
    %51 = vector.broadcast %50 : vector<1x128xf32> to vector<48x128xf32>
    %52 = arith.addf %49, %51 : vector<48x128xf32>
    %cst_66 = arith.constant 0.000000e+00 : f32
    %53 = vector.broadcast %cst_66 : f32 to vector<48x128xf32>
    %54 = arith.maximumf %52, %53 : vector<48x128xf32>
    %55 = arith.truncf %54 : vector<48x128xf32> to vector<48x128xbf16>
    %c0_67 = arith.constant 0 : index
    %c0_68 = arith.constant 0 : index
    %c0_69 = arith.constant 0 : index
    %56 = vector.load %arg7[%c0_67, %c0_68, %c0_69] : memref<1x48x128xbf16, #tpu.memory_space<vmem>>, vector<1x48x128xbf16>
    %57 = vector.shape_cast %56 : vector<1x48x128xbf16> to vector<48x128xbf16>
    %58 = vector.shape_cast %55 : vector<48x128xbf16> to vector<1x48x128xbf16>
    tpu.vector_store %arg7[%c0_67, %c0_68, %c0_69], %58 {strides = array<i32>} : memref<1x48x128xbf16, #tpu.memory_space<vmem>>, vector<1x48x128xbf16>,
    return
  }
  func.func @transform_0(%arg0: i32, %arg1: i32) -> (i32, i32, i32) {
    %c0_i32 = arith.constant 0 : i32
    %c0_i32_0 = arith.constant 0 : i32
    return %arg0, %arg1, %c0_i32 : i32, i32, i32
  }
  func.func @transform_1(%arg0: i32, %arg1: i32) -> (i32, i32, i32) {
    %c1_i32 = arith.constant 1 : i32
    %0 = arith.addi %arg1, %c1_i32 : i32
    %c0_i32 = arith.constant 0 : i32
    %c0_i32_0 = arith.constant 0 : i32
    return %arg0, %0, %c0_i32 : i32, i32, i32
  }
  func.func @transform_2(%arg0: i32, %arg1: i32) -> (i32, i32, i32) {
    %c0_i32 = arith.constant 0 : i32
    %c0_i32_0 = arith.constant 0 : i32
    %c0_i32_1 = arith.constant 0 : i32
    %c0_i32_2 = arith.constant 0 : i32
    return %c0_i32, %c0_i32_0, %c0_i32_1 : i32, i32, i32
  }
  func.func @transform_3(%arg0: i32, %arg1: i32) -> (i32, i32) {
    %c0_i32 = arith.constant 0 : i32
    %c0_i32_0 = arith.constant 0 : i32
    %c0_i32_1 = arith.constant 0 : i32
    return %c0_i32, %c0_i32_0 : i32, i32
  }
  func.func @transform_4(%arg0: i32, %arg1: i32) -> (i32, i32) {
    %c0_i32 = arith.constant 0 : i32
    %c0_i32_0 = arith.constant 0 : i32
    %c0_i32_1 = arith.constant 0 : i32
    return %c0_i32, %c0_i32_0 : i32, i32
  }
  func.func @transform_5(%arg0: i32, %arg1: i32) -> (i32, i32, i32) {
    %c0_i32 = arith.constant 0 : i32
    %c0_i32_0 = arith.constant 0 : i32
    return %arg0, %arg1, %c0_i32 : i32, i32, i32
  }
}

module attributes {stable_mosaic.version = 11 : i64} {
  func.func @kernel(%arg0: i32, %arg1: i32, %arg2: memref<1x32x128xbf16, #tpu.memory_space<vmem>>, %arg3: memref<1x128x128xbf16, #tpu.memory_space<vmem>>, %arg4: memref<1x128xf32, #tpu.memory_space<vmem>>, %arg5: memref<1x128xf32, #tpu.memory_space<vmem>>, %arg6: memref<1x32x128xbf16, #tpu.memory_space<vmem>>, %arg7: memref<32x128xf32, #tpu.memory_space<vmem>>) attributes {dimension_semantics = [#tpu.dimension_semantics<parallel>, #tpu.dimension_semantics<parallel>], iteration_bounds = array<i64: 2, 1>, scalar_prefetch = 0 : i64, scratch_operands = 1 : i64, tpu.core_type = #tpu.core_type<tc>, window_params = [{transform_indices = @transform_0, window_bounds = array<i64: 1, 32, 128>}, {pipeline_mode = #tpu.pipeline_mode<synchronous>, transform_indices = @transform_1, window_bounds = array<i64: 1, 128, 128>}, {pipeline_mode = #tpu.pipeline_mode<synchronous>, transform_indices = @transform_2, window_bounds = array<i64: 1, 128>}, {pipeline_mode = #tpu.pipeline_mode<synchronous>, transform_indices = @transform_3, window_bounds = array<i64: 1, 128>}, {transform_indices = @transform_4, window_bounds = array<i64: 1, 32, 128>}]} {
    %c0 = arith.constant 0 : index
    %c0_0 = arith.constant 0 : index
    %c0_1 = arith.constant 0 : index
    %0 = vector.load %arg2[%c0, %c0_0, %c0_1] : memref<1x32x128xbf16, #tpu.memory_space<vmem>>, vector<1x32x128xbf16>
    %1 = vector.shape_cast %0 : vector<1x32x128xbf16> to vector<32x128xbf16>
    %c0_2 = arith.constant 0 : index
    %c0_3 = arith.constant 0 : index
    %c0_4 = arith.constant 0 : index
    %2 = vector.load %arg3[%c0_2, %c0_3, %c0_4] : memref<1x128x128xbf16, #tpu.memory_space<vmem>>, vector<1x128x128xbf16>
    %3 = vector.shape_cast %2 : vector<1x128x128xbf16> to vector<128x128xbf16>
    %cst = arith.constant dense<0.000000e+00> : vector<32x128xf32>
    %4 = tpu.matmul %1, %3, %cst {dimension_numbers = #tpu.dot_dimension_numbers<[1], [0], [0], [1], [0, 0, 1, 1], [], []>} : vector<32x128xbf16>, vector<128x128xbf16>, vector<32x128xf32> -> vector<32x128xf32>
    %c0_5 = arith.constant 0 : index
    %c0_6 = arith.constant 0 : index
    %5 = vector.load %arg7[%c0_5, %c0_6] : memref<32x128xf32, #tpu.memory_space<vmem>>, vector<32x128xf32>
    tpu.vector_store %arg7[%c0_5, %c0_6], %4 {strides = array<i32>} : memref<32x128xf32, #tpu.memory_space<vmem>>, vector<32x128xf32>,
    %c0_7 = arith.constant 0 : index
    %c0_8 = arith.constant 0 : index
    %6 = vector.load %arg7[%c0_7, %c0_8] : memref<32x128xf32, #tpu.memory_space<vmem>>, vector<32x128xf32>
    %c0_9 = arith.constant 0 : index
    %c0_10 = arith.constant 0 : index
    %7 = vector.load %arg4[%c0_9, %c0_10] : memref<1x128xf32, #tpu.memory_space<vmem>>, vector<1x128xf32>
    %8 = vector.broadcast %7 : vector<1x128xf32> to vector<32x128xf32>
    %9 = arith.mulf %6, %8 : vector<32x128xf32>
    %c0_11 = arith.constant 0 : index
    %c0_12 = arith.constant 0 : index
    %10 = vector.load %arg5[%c0_11, %c0_12] : memref<1x128xf32, #tpu.memory_space<vmem>>, vector<1x128xf32>
    %11 = vector.broadcast %10 : vector<1x128xf32> to vector<32x128xf32>
    %12 = arith.addf %9, %11 : vector<32x128xf32>
    %13 = arith.truncf %12 : vector<32x128xf32> to vector<32x128xbf16>
    %c0_13 = arith.constant 0 : index
    %c0_14 = arith.constant 0 : index
    %c0_15 = arith.constant 0 : index
    %14 = vector.load %arg6[%c0_13, %c0_14, %c0_15] : memref<1x32x128xbf16, #tpu.memory_space<vmem>>, vector<1x32x128xbf16>
    %15 = vector.shape_cast %14 : vector<1x32x128xbf16> to vector<32x128xbf16>
    %16 = vector.shape_cast %13 : vector<32x128xbf16> to vector<1x32x128xbf16>
    tpu.vector_store %arg6[%c0_13, %c0_14, %c0_15], %16 {strides = array<i32>} : memref<1x32x128xbf16, #tpu.memory_space<vmem>>, vector<1x32x128xbf16>,
    return
  }
  func.func @transform_0(%arg0: i32, %arg1: i32) -> (i32, i32, i32) {
    %c0_i32 = arith.constant 0 : i32
    %c0_i32_0 = arith.constant 0 : i32
    return %arg0, %arg1, %c0_i32 : i32, i32, i32
  }
  func.func @transform_1(%arg0: i32, %arg1: i32) -> (i32, i32, i32) {
    %c0_i32 = arith.constant 0 : i32
    %c0_i32_0 = arith.constant 0 : i32
    %c0_i32_1 = arith.constant 0 : i32
    %c0_i32_2 = arith.constant 0 : i32
    return %c0_i32, %c0_i32_0, %c0_i32_1 : i32, i32, i32
  }
  func.func @transform_2(%arg0: i32, %arg1: i32) -> (i32, i32) {
    %c0_i32 = arith.constant 0 : i32
    %c0_i32_0 = arith.constant 0 : i32
    %c0_i32_1 = arith.constant 0 : i32
    return %c0_i32, %c0_i32_0 : i32, i32
  }
  func.func @transform_3(%arg0: i32, %arg1: i32) -> (i32, i32) {
    %c0_i32 = arith.constant 0 : i32
    %c0_i32_0 = arith.constant 0 : i32
    %c0_i32_1 = arith.constant 0 : i32
    return %c0_i32, %c0_i32_0 : i32, i32
  }
  func.func @transform_4(%arg0: i32, %arg1: i32) -> (i32, i32, i32) {
    %c0_i32 = arith.constant 0 : i32
    %c0_i32_0 = arith.constant 0 : i32
    return %arg0, %arg1, %c0_i32 : i32, i32, i32
  }
}

</mosaic_0001>

<bundles_post_ra>
// kernel: pallas_forward.5
= control target key start
LH: loop header
LB: loop body
LE: loop exit
PB: predicated region body
PF: predicated region fallthrough
CT: control target
= control target key end

     0   :  { %s2126_s18 = smov 0   ;;  %s2128_s19 = smov 0   ;;  %s2486_s0 = inlined_call_operand.vmem [shape: bf16[6,96,128], index: 0, kind: input, shape index: {}, may-alias: {0,1}]   ;;  %s2487_s1 = inlined_call_operand.vmem [shape: bf16[6,96,128], index: 1, kind: input, shape index: {}, may-alias: {0,1}]   ;;  %s2488_s2 = inlined_call_operand.vmem [shape: bf16[6,128,128], index: 2, kind: input, shape index: {}]   ;;  %s2489_s3 = inlined_call_operand.vmem [shape: f32[1,128], index: 3, kind: input, shape index: {}]   ;;  %s2490_s4 = inlined_call_operand.vmem [shape: f32[1,128], index: 4, kind: input, shape index: {}]   ;;  %s2491_s5 = inlined_call_operand.vmem [shape: bf16[6,48,128], index: 5, kind: output, shape index: {}]  }
   0x1   :  { %s2130_s20 = smov 0  }
   0x2 LB: > { %s27_s21 = sadd.s32 1, %s2088_s19  ;;  %p1517_p0 = scmp.ge.s32.totalorder %s2092_s20, 1  ;;  %s2092_s20 = sphi %s2130_s20, %s15_s20   ;;  %s2088_s19 = sphi %s2128_s19, %s2493_s19   ;;  %s2084_s18 = sphi %s2126_s18, %s2492_s18  }
   0x3   : > { %p29_p1 = scmp.ge.s32.totalorder %s27_s21, 6  ;;  %p229_p2 = scmp.lt.s32.totalorder %s2092_s20, 7 }
   0x5   : > { %s2495_s21 = smov (%p29_p1, %s27_s21), 0  ;;  %p230_p3 = pnand %p1517_p0, %p229_p2 }
   0x6   : > { %v2006_v0 = vld [vmem:[%s2488_s2] sm:$0xff] (!%p230_p3)   ;;  %v2094_v1 = vmov (!%p230_p3), 0.0   ;;  %v2008_v3 = vld [vmem:[%s2488_s2 + $0x8] sm:$0xff] (!%p230_p3)   ;;  %vm2095_vm0 = vmmov (!%p230_p3), 0   ;;  %p276_p4 = scmp.lt.s32.totalorder (!%p230_p3), %s2084_s18, 5  ;;  %v2010_v5 = vld [vmem:[%s2488_s2 + $0x10] sm:$0xff] (!%p230_p3)  }
   0x7   : > { %233 = sbr.rel (%p230_p3) target bundleno = 356 (0x164), region = 40  ;;  %1754 = vmatprep.subr.bf16.mxu1 (!%p230_p3), %v2094_v1  ;;  %1838 = vmatprep.subr.bf16.mxu0 (!%p230_p3), %v2094_v1  ;;  %v2007_v2 = vld [vmem:[%s2488_s2 + $0xc0] sm:$0xff] (!%p230_p3)   ;;  %v2009_v4 = vld [vmem:[%s2488_s2 + $0xc8] sm:$0xff] (!%p230_p3)   ;;  %v2011_v6 = vld [vmem:[%s2488_s2 + $0xd0] sm:$0xff] (!%p230_p3)   ;;  %vm836_vm1 = vsmask.f32 (!%p230_p3), 6400 }
   0x8   : > { %1755 = vmatpush3.bf16.msra.mxu1 (!%p230_p3), %v2006_v0  ;;  %1770 = vmatprep.mubr.msk.bf16.mxu1 (!%p230_p3), %vm2095_vm0, %v2094_v1  ;;  %v2012_v7 = vld [vmem:[%s2488_s2 + $0x18] sm:$0xff] (!%p230_p3)   ;;  %v2014_v9 = vld [vmem:[%s2488_s2 + $0x20] sm:$0xff] (!%p230_p3)   ;;  %v2016_v12 = vld [vmem:[%s2488_s2 + $0x28] sm:$0xff] (!%p230_p3)   ;;  %vm681_vm2 = vcmask (!%p230_p3), 1046528   ;;  %vm1178_vm3 = vsmask.f32 (!%p230_p3), 5376 }
   0x9   : > { %1839 = vmatpush3.bf16.msra.mxu0 (!%p230_p3), %v2007_v2  ;;  %1756 = vmatprep.subr.bf16.mxu1 (!%p230_p3), %v2094_v1  ;;  %v2013_v8 = vld [vmem:[%s2488_s2 + $0xd8] sm:$0xff] (!%p230_p3)   ;;  %v2015_v10 = vld [vmem:[%s2488_s2 + $0xe0] sm:$0xff] (!%p230_p3)   ;;  %v2017_v14 = vld [vmem:[%s2488_s2 + $0xe8] sm:$0xff] (!%p230_p3)   ;;  %vm501_vm4 = vsmask.f32 (!%p230_p3), 7424  ;;  %vm1023_vm5 = vcmask (!%p230_p3), 1045504  }
   0xa   : > { %1840 = vmatprep.subr.bf16.mxu0 (!%p230_p3), %v2094_v1  ;;  %1854 = vmatprep.mubr.msk.bf16.mxu0 (!%p230_p3), %vm2095_vm0, %v2094_v1  ;;  %v2018_v17 = vld [vmem:[%s2488_s2 + $0x30] sm:$0xff] (!%p230_p3)   ;;  %v2020_v19 = vld [vmem:[%s2488_s2 + $0x38] sm:$0xff] (!%p230_p3)   ;;  %v2023_v30 = vld [vmem:[%s2488_s2 + $0x40] sm:$0xff] (!%p230_p3)  }
   0xb   : > { %v2019_v18 = vld [vmem:[%s2488_s2 + $0xf0] sm:$0xff] (!%p230_p3)   ;;  %v2021_v22 = vld [vmem:[%s2488_s2 + $0xf8] sm:$0xff] (!%p230_p3)   ;;  %v2025_v32 = vld [vmem:[%s2488_s2 + $0x100] sm:$0xff] (!%p230_p3)  }
   0xc   : > { %1757 = vmatpush3.bf16.msra.mxu1 (!%p230_p3), %v2008_v3  ;;  %v2026_v39 = vld [vmem:[%s2488_s2 + $0x48] sm:$0xff] (!%p230_p3)   ;;  %v2028_v42 = vld [vmem:[%s2488_s2 + $0x50] sm:$0xff] (!%p230_p3)   ;;  %v2030_v46 = vld [vmem:[%s2488_s2 + $0x58] sm:$0xff] (!%p230_p3)  }
   0xd   : > { %1841 = vmatpush3.bf16.msra.mxu0 (!%p230_p3), %v2009_v4  ;;  %1758 = vmatprep.subr.bf16.mxu1 (!%p230_p3), %v2094_v1  ;;  %v2027_v40 = vld [vmem:[%s2488_s2 + $0x108] sm:$0xff] (!%p230_p3)   ;;  %v2029_v43 = vld [vmem:[%s2488_s2 + $0x110] sm:$0xff] (!%p230_p3)   ;;  %v2031_v47 = vld [vmem:[%s2488_s2 + $0x118] sm:$0xff] (!%p230_p3)  }
   0xe   : > { %s2497_s18 = smov (!%p276_p4, %s2084_s18), 5  ;;  %1842 = vmatprep.subr.bf16.mxu0 %v2094_v1  ;;  %v2032_v52 = vld [vmem:[%s2488_s2 + $0x60] sm:$0xff]   ;;  %v2035_v60 = vld [vmem:[%s2488_s2 + $0x68] sm:$0xff]   ;;  %v2037_v4 = vld [vmem:[%s2488_s2 + $0x70] sm:$0xff]  }
   0xf   : > { %s1976_s9 = smul.u32 48, %s2497_s18  ;;  %v2034_v54 = vld [vmem:[%s2488_s2 + $0x120] sm:$0xff]   ;;  %v2036_v63 = vld [vmem:[%s2488_s2 + $0x128] sm:$0xff]  }
  0x10   : > { %1759 = vmatpush3.bf16.msra.mxu1 %v2010_v5  ;;  %s1978_s25 = smul.u32 24, %s2497_s18 }
  0x11   : > { %1843 = vmatpush3.bf16.msra.mxu0 %v2011_v6  ;;  %1760 = vmatprep.subr.bf16.mxu1 %v2094_v1  ;;  %s2188_s16 = scalar_lea.vmem %s2486_s0, %s1976_s9  ;;  %s1664_s13 = sadd.s32 24, %s1976_s9 }
  0x12   : > { %1844 = vmatprep.subr.bf16.mxu0 %v2094_v1  ;;  %v2199_v11 = vld [vmem:[%s2188_s16] sm:$0xff]   ;;  %v2206_v13 = vld [vmem:[%s2188_s16 + $0x8] sm:$0xff]   ;;  %v2240_v29 = vld [vmem:[%s2188_s16 + $0x10] sm:$0xff]   ;;  %s294_s17 = scalar_lea.vmem %s2487_s1, %s1664_s13  ;;  %s305_s28 = scalar_lea.vmem %s2491_s5, %s1978_s25 }
  0x13   : > { %332 = vst [vmem:[#allocation2] sm:$0xff] %v2199_v11  ;;  %v2214_v15 = vshrl.u32 %v2206_v13, 16  ;;  %v2217_v16 = vshll.u32 %v2206_v13, 16  ;;  %v2252_v33 = vshrl.u32 %v2240_v29, 16  ;;  %v2255_v34 = vshll.u32 %v2240_v29, 16  ;;  %v2038_v38 = vld [vmem:[%s294_s17] sm:$0xff]  }
  0x14   : > { %1761 = vmatpush3.bf16.msra.mxu1 %v2012_v7  ;;  %343 = vst [vmem:[#allocation2 + $0x18] sm:$0xff] %v2038_v38  ;;  %v683_v58 = vrot.slane %v2206_v13, 1  ;;  %v685_v59 = vrot.slane %v2240_v29, 1  ;;  %v505_v61 = vshll.u32 %v2199_v11, 16  ;;  %v503_v5 = vshrl.u32 %v2199_v11, 16  ;;  %v2039_v7 = vld [vmem:[%s2488_s2 + $0x130] sm:$0xff]  }
  0x15   : > { %1845 = vmatpush3.bf16.msra.mxu0 %v2013_v8  ;;  %1762 = vmatprep.subr.bf16.mxu1 %v2094_v1  ;;  %v848_v20 = vrot.slane %v2214_v15, 1  ;;  %v851_v21 = vrot.slane %v2217_v16, 2  ;;  %v857_v36 = vrot.slane %v2252_v33, 1  ;;  %v860_v37 = vrot.slane %v2255_v34, 2 }
  0x16   : > { %1846 = vmatprep.subr.bf16.mxu0 %v2094_v1  ;;  %v1190_v55 = vrot.slane %v2214_v15, 2  ;;  %v1193_v57 = vrot.slane %v2217_v16, 3  ;;  %v2326_v0 = vsel %vm681_vm2, %v683_v58, %v685_v59  ;;  %v1199_v2 = vrot.slane %v2252_v33, 2 }
  0x17   : > { %v852_v28 = vor.u32 %v851_v21, %v848_v20  ;;  %v861_v41 = vor.u32 %v860_v37, %v857_v36  ;;  %v1202_v3 = vrot.slane %v2255_v34, 3  ;;  %v507_v6 = vrot.slane %v505_v61, 1  ;;  %v2042_v20 = vld [vmem:[%s2488_s2 + $0x80] sm:$0xff]   ;;  %v2048_v36 = vld [vmem:[%s2488_s2 + $0x98] sm:$0xff]  }
  0x18   : > { %1763 = vmatpush3.bf16.msra.mxu1 %v2014_v9  ;;  %v2315_v62 = vor.u32 %v1193_v57, %v1190_v55 }
  0x19   : > { %1847 = vmatpush3.bf16.msra.mxu0 %v2015_v10  ;;  %1764 = vmatprep.subr.bf16.mxu1 %v2094_v1  ;;  %v862_v44 = vsel %vm836_vm1, %v852_v28, %v861_v41  ;;  %v2344_v9 = vor.u32 %v1202_v3, %v1199_v2  ;;  %v2040_v10 = vld [vmem:[%s2488_s2 + $0x78] sm:$0xff]  }
  0x1a   : > { %1848 = vmatprep.subr.bf16.mxu0 %v2094_v1  ;;  %v815_v23 = vld [vmem:[#allocation2] sm:$0xfe] }
  0x1b   : > { %v838_v24 = vshrl.u32 %v815_v23, 16  ;;  %v841_v25 = vshll.u32 %v815_v23, 16  ;;  %v818_v45 = vld [vmem:[#allocation2 + $0x18] sm:$0x3]  ;;  %v998_v8 = vld [vmem:[#allocation2] sm:$0xfc] }
  0x1c   : > { %1765 = vmatpush3.bf16.msra.mxu1 %v2016_v12  ;;  %v864_v48 = vshrl.u32 %v818_v45, 16  ;;  %v867_v49 = vshll.u32 %v818_v45, 16  ;;  %v512_v12 = vrot.slane %v2217_v16, 1  ;;  %v2044_v23 = vld [vmem:[%s2488_s2 + $0x88] sm:$0xff]  }
  0x1d   : > { %1849 = vmatpush3.bf16.msra.mxu0 %v2017_v14  ;;  %1766 = vmatprep.subr.bf16.mxu1 %v2094_v1  ;;  %v840_v26 = vrot.slane %v838_v24, 1  ;;  %v843_v27 = vrot.slane %v841_v25, 2  ;;  %v2353_v14 = vsel %vm1178_vm3, %v2315_v62, %v2344_v9  ;;  %v520_v25 = vrot.slane %v2255_v34, 1  ;;  %v2052_v45 = vld [vmem:[%s2488_s2 + $0xa8] sm:$0xff]  }
  0x1e   : > { %1850 = vmatprep.subr.bf16.mxu0 %v2094_v1  ;;  %v866_v50 = vrot.slane %v864_v48, 1  ;;  %v869_v51 = vrot.slane %v867_v49, 2  ;;  %v516_v24 = vor.u32 %v2214_v15, %v512_v12  ;;  %v2046_v15 = vld [vmem:[%s2488_s2 + $0x90] sm:$0xff]  }
  0x1f   : > { %v844_v31 = vor.u32 %v843_v27, %v840_v26  ;;  %v2045_v26 = vld [vmem:[%s2488_s2 + $0x148] sm:$0xff]   ;;  %v1027_v27 = vrot.slane %v2240_v29, 2  ;;  %v524_v37 = vor.u32 %v2252_v33, %v520_v25  ;;  %v2050_v33 = vld [vmem:[%s2488_s2 + $0xa0] sm:$0xff]   ;;  %v2054_v49 = vld [vmem:[%s2488_s2 + $0xb0] sm:$0xff]  }
  0x20   : > { %1767 = vmatpush3.bf16.msra.mxu1 %v2018_v17  ;;  %v870_v53 = vor.u32 %v869_v51, %v866_v50  ;;  %v2041_v17 = vld [vmem:[%s2488_s2 + $0x138] sm:$0xff]   ;;  %v2055_v50 = vld [vmem:[%s2488_s2 + $0x170] sm:$0xff]   ;;  %v656_v51 = vld [vmem:[#allocation2] sm:$0xfe] }
  0x21   : > { %1851 = vmatpush3.bf16.msra.mxu0 %v2019_v18  ;;  %1768 = vmatprep.subr.bf16.mxu1 %v2094_v1  ;;  %v853_v35 = vsel %vm836_vm1, %v844_v31, %v852_v28  ;;  %v1024_v18 = vrot.slane %v998_v8, 2  ;;  %v483_v28 = vld [vmem:[#allocation2 + $0x18] sm:$0x1]  ;;  %v682_v55 = vrot.slane %v656_v51, 1 }
  0x22   : > { %1852 = vmatprep.subr.bf16.mxu0 %v2094_v1  ;;  %v871_v56 = vsel %vm836_vm1, %v861_v41, %v870_v53  ;;  %v526_v31 = vshll.u32 %v483_v28, 16 }
  0x24   : > { %1769 = vmatpush3.bf16.msra.mxu1 %v2020_v19  ;;  %v1025_v19 = vrot.slane %v2206_v13, 2  ;;  %v528_v38 = vrot.slane %v526_v31, 1 }
  0x25   : > { %1853 = vmatpush3.bf16.msra.mxu0 %v2021_v22  ;;  %1782 = vmatprep.subr.bf16.mxu1 %v2094_v1  ;;  %v2043_v22 = vld [vmem:[%s2488_s2 + $0x140] sm:$0xff]  }
  0x26   : > { %1866 = vmatprep.subr.bf16.mxu0 %v2094_v1  ;;  %v1026_v21 = vsel %vm1023_vm5, %v1024_v18, %v1025_v19  ;;  %v1028_v34 = vsel %vm1023_vm5, %v1025_v19, %v1027_v27  ;;  %v529_v41 = vsel %vm501_vm4, %v524_v37, %v528_v38 }
  0x27   : > { %1771 = vmatmul.mubr.bf16.vlgmr.msra.gmra.mrb[0].mxu1 %v2199_v11  ;;  %v508_v11 = vor.u32 %v507_v6, %v503_v5 }
  0x28   : > { %1783 = vmatpush3.bf16.msra.mxu1 %v2023_v30  ;;  %1855 = vmatmul.mubr.bf16.vlgmr.msra.gmra.mrb[0].mxu0 %v853_v35  ;;  %v521_v30 = vsel %vm501_vm4, %v516_v24, %v520_v25  ;;  %v1001_v35 = vld [vmem:[#allocation2 + $0x18] sm:$0x3] }
  0x29   : > { %1867 = vmatpush3.bf16.msra.mxu0 %v2025_v32  ;;  %1784 = vmatprep.subr.bf16.mxu1 %v2094_v1  ;;  %v513_v16 = vsel %vm501_vm4, %v508_v11, %v512_v12  ;;  %v2047_v32 = vld [vmem:[%s2488_s2 + $0x150] sm:$0xff]  }
  0x2a   : > { %1868 = vmatprep.subr.bf16.mxu0 %v2094_v1  ;;  %1774 = vmatprep.mubr.msk.bf16.mxu1 %vm2095_vm0, %v2094_v1 }
  0x2b   : > { %1858 = vmatprep.mubr.msk.bf16.mxu0 %vm2095_vm0, %v2094_v1 }
  0x2c   : > { %1785 = vmatpush3.bf16.msra.mxu1 %v2026_v39  ;;  %v2049_v39 = vld [vmem:[%s2488_s2 + $0x158] sm:$0xff]  }
  0x2d   : > { %1869 = vmatpush3.bf16.msra.mxu0 %v2027_v40  ;;  %1786 = vmatprep.subr.bf16.mxu1 %v2094_v1  ;;  %v1029_v40 = vrot.slane %v1001_v35, 2 }
  0x2e   : > { %1870 = vmatprep.subr.bf16.mxu0 %v2094_v1 }
  0x2f   : > { %1775 = vmatmul.mubr.bf16.gmra.mrb[4].mxu1 %v2206_v13 }
  0x30   : > { %1787 = vmatpush3.bf16.msra.mxu1 %v2028_v42  ;;  %1859 = vmatmul.mubr.bf16.gmra.mrb[4].mxu0 %v862_v44  ;;  %v2051_v42 = vld [vmem:[%s2488_s2 + $0x160] sm:$0xff]  }
  0x31   : > { %1871 = vmatpush3.bf16.msra.mxu0 %v2029_v43  ;;  %1788 = vmatprep.subr.bf16.mxu1 %v2094_v1  ;;  %v1030_v43 = vsel %vm1023_vm5, %v1027_v27, %v1029_v40  ;;  %v1157_v44 = vld [vmem:[#allocation2] sm:$0xfc] }
  0x32   : > { %1872 = vmatprep.subr.bf16.mxu0 %v2094_v1  ;;  %1778 = vmatprep.mubr.msk.bf16.mxu1 %vm2095_vm0, %v2094_v1  ;;  %v1183_v48 = vshll.u32 %v1157_v44, 16 }
  0x33   : > { %1862 = vmatprep.mubr.msk.bf16.mxu0 %vm2095_vm0, %v2094_v1 }
  0x34   : > { %1789 = vmatpush3.bf16.msra.mxu1 %v2030_v46  ;;  %v2053_v46 = vld [vmem:[%s2488_s2 + $0x168] sm:$0xff]   ;;  %v1185_v53 = vrot.slane %v1183_v48, 3 }
  0x35   : > { %1873 = vmatpush3.bf16.msra.mxu0 %v2031_v47  ;;  %1790 = vmatprep.subr.bf16.mxu1 %v2094_v1  ;;  %v1180_v47 = vshrl.u32 %v1157_v44, 16 }
  0x36   : > { %1874 = vmatprep.subr.bf16.mxu0 %v2094_v1 }
  0x37   : > { %1779 = vmatmul.mubr.bf16.gmra.mrb[8].mxu1 %v2240_v29  ;;  %v1654_v29 = vld [vmem:[%s2490_s4] ss:$0 sm:$0xff] }
  0x38   : > { %1791 = vmatpush3.bf16.msra.mxu1 %v2032_v52  ;;  %1863 = vmatmul.mubr.bf16.gmra.mrb[8].mxu0 %v871_v56  ;;  %v1182_v52 = vrot.slane %v1180_v47, 2  ;;  %v2057_v56 = vld [vmem:[%s2488_s2 + $0x178] sm:$0xff]  }
  0x39   : > { %1875 = vmatpush3.bf16.msra.mxu0 %v2034_v54  ;;  %1792 = vmatprep.subr.bf16.mxu1 %v2094_v1  ;;  %v2056_v54 = vld [vmem:[%s2488_s2 + $0xb8] sm:$0xff]  }
  0x3a   : > { %1876 = vmatprep.subr.bf16.mxu0 %v2094_v1  ;;  %1798 = vmatprep.mubr.msk.bf16.mxu1 %vm2095_vm0, %v2094_v1  ;;  %v1186_v57 = vor.u32 %v1185_v53, %v1182_v52 }
  0x3b   : > { %1882 = vmatprep.mubr.msk.bf16.mxu0 %vm2095_vm0, %v2094_v1 }
  0x3c   : > { %1793 = vmatpush3.bf16.msra.mxu1 %v2035_v60  ;;  %v684_v60 = vsel %vm681_vm2, %v682_v55, %v683_v58  ;;  %v1195_v61 = vsel %vm1178_vm3, %v1186_v57, %v2315_v62 }
  0x3d   : > { %1877 = vmatpush3.bf16.msra.mxu0 %v2036_v63  ;;  %1794 = vmatprep.subr.bf16.mxu1 %v2094_v1  ;;  %v1160_v63 = vld [vmem:[#allocation2 + $0x18] sm:$0x7] }
  0x3e   : > { %1878 = vmatprep.subr.bf16.mxu0 %v2094_v1  ;;  %v1206_v2 = vshrl.u32 %v1160_v63, 16  ;;  %v1209_v3 = vshll.u32 %v1160_v63, 16 }
  0x40   : > { %1795 = vmatpush3.bf16.msra.mxu1 %v2037_v4  ;;  %v659_v4 = vld [vmem:[#allocation2 + $0x18] sm:$0x1]  ;;  %v1208_v5 = vrot.slane %v1206_v2, 2  ;;  %v1211_v13 = vrot.slane %v1209_v3, 3 }
  0x41   : > { %1879 = vmatpush3.bf16.msra.mxu0 %v2039_v7  ;;  %1796 = vmatprep.subr.bf16.mxu1 %v2094_v1  ;;  %v687_v58 = vrot.slane %v659_v4, 1 }
  0x42   : > { %1880 = vmatprep.subr.bf16.mxu0 %v2094_v1  ;;  %v1212_v62 = vor.u32 %v1211_v13, %v1208_v5 }
  0x43   : > { %v688_v6 = vsel %vm681_vm2, %v685_v59, %v687_v58 }
  0x44   : > { %1797 = vmatpush3.bf16.msra.mxu1 %v2040_v10  ;;  %v1213_v7 = vsel %vm1178_vm3, %v2344_v9, %v1212_v62  ;;  %v1653_v10 = vld [vmem:[%s2489_s3] ss:$0 sm:$0xff] }
  0x45   : > { %1881 = vmatpush3.bf16.msra.mxu0 %v2041_v17  ;;  %1810 = vmatprep.subr.bf16.mxu1 %v2094_v1 }
  0x46   : > { %1894 = vmatprep.subr.bf16.mxu0 %v2094_v1 }
  0x47   : > { %1799 = vmatmul.mubr.bf16.vlgmr.msra.gmra.mrb[0].mxu1 %v513_v16 }
  0x48   : > { %1811 = vmatpush3.bf16.msra.mxu1 %v2042_v20  ;;  %1883 = vmatmul.mubr.bf16.vlgmr.msra.gmra.mrb[0].mxu0 %v1026_v21 }
  0x49   : > { %1895 = vmatpush3.bf16.msra.mxu0 %v2043_v22  ;;  %1812 = vmatprep.subr.bf16.mxu1 %v2094_v1 }
  0x4a   : > { %1896 = vmatprep.subr.bf16.mxu0 %v2094_v1  ;;  %1802 = vmatprep.mubr.msk.bf16.mxu1 %vm2095_vm0, %v2094_v1 }
  0x4b   : > { %1886 = vmatprep.mubr.msk.bf16.mxu0 %vm2095_vm0, %v2094_v1 }
  0x4c   : > { %1813 = vmatpush3.bf16.msra.mxu1 %v2044_v23 }
  0x4d   : > { %1897 = vmatpush3.bf16.msra.mxu0 %v2045_v26  ;;  %1814 = vmatprep.subr.bf16.mxu1 %v2094_v1 }
  0x4e   : > { %1898 = vmatprep.subr.bf16.mxu0 %v2094_v1 }
  0x4f   : > { %1803 = vmatmul.mubr.bf16.gmra.mrb[4].mxu1 %v521_v30 }
  0x50   : > { %1815 = vmatpush3.bf16.msra.mxu1 %v2046_v15  ;;  %1887 = vmatmul.mubr.bf16.gmra.mrb[4].mxu0 %v1028_v34 }
  0x51   : > { %1899 = vmatpush3.bf16.msra.mxu0 %v2047_v32  ;;  %1816 = vmatprep.subr.bf16.mxu1 %v2094_v1 }
  0x52   : > { %1900 = vmatprep.subr.bf16.mxu0 %v2094_v1  ;;  %1806 = vmatprep.mubr.msk.bf16.mxu1 %vm2095_vm0, %v2094_v1 }
  0x53   : > { %1890 = vmatprep.mubr.msk.bf16.mxu0 %vm2095_vm0, %v2094_v1 }
  0x54   : > { %1817 = vmatpush3.bf16.msra.mxu1 %v2048_v36 }
  0x55   : > { %1901 = vmatpush3.bf16.msra.mxu0 %v2049_v39  ;;  %1818 = vmatprep.subr.bf16.mxu1 %v2094_v1 }
  0x56   : > { %1902 = vmatprep.subr.bf16.mxu0 %v2094_v1 }
  0x57   : > { %1807 = vmatmul.mubr.bf16.gmra.mrb[8].mxu1 %v529_v41 }
  0x58   : > { %1819 = vmatpush3.bf16.msra.mxu1 %v2050_v33  ;;  %1891 = vmatmul.mubr.bf16.gmra.mrb[8].mxu0 %v1030_v43 }
  0x59   : > { %1903 = vmatpush3.bf16.msra.mxu0 %v2051_v42  ;;  %1820 = vmatprep.subr.bf16.mxu1 %v2094_v1 }
  0x5a   : > { %1904 = vmatprep.subr.bf16.mxu0 %v2094_v1  ;;  %1826 = vmatprep.mubr.msk.bf16.mxu1 %vm2095_vm0, %v2094_v1 }
  0x5b   : > { %1910 = vmatprep.mubr.msk.bf16.mxu0 %vm2095_vm0, %v2094_v1 }
  0x5c   : > { %1821 = vmatpush3.bf16.msra.mxu1 %v2052_v45 }
  0x5d   : > { %1905 = vmatpush3.bf16.msra.mxu0 %v2053_v46  ;;  %1822 = vmatprep.subr.bf16.mxu1 %v2094_v1 }
  0x5e   : > { %1906 = vmatprep.subr.bf16.mxu0 %v2094_v1 }
  0x60   : > { %1823 = vmatpush3.bf16.msra.mxu1 %v2054_v49 }
  0x61   : > { %1907 = vmatpush3.bf16.msra.mxu0 %v2055_v50  ;;  %1824 = vmatprep.subr.bf16.mxu1 %v2094_v1 }
  0x62   : > { %1908 = vmatprep.subr.bf16.mxu0 %v2094_v1 }
  0x64   : > { %1825 = vmatpush3.bf16.msra.mxu1 %v2056_v54 }
  0x65   : > { %1909 = vmatpush3.bf16.msra.mxu0 %v2057_v56 }
  0x67   : > { %1827 = vmatmul.mubr.bf16.vlgmr.msra.gmra.mrb[0].mxu1 %v684_v60 }
  0x68   : > { %1911 = vmatmul.mubr.bf16.vlgmr.msra.gmra.mrb[0].mxu0 %v1195_v61  ;;  %1830 = vmatprep.mubr.msk.bf16.mxu1 %vm2095_vm0, %v2094_v1 }
  0x69   : > { %1914 = vmatprep.mubr.msk.bf16.mxu0 %vm2095_vm0, %v2094_v1 }
  0x6f   : > { %1831 = vmatmul.mubr.bf16.gmra.mrb[4].mxu1 %v2326_v0 }
  0x70   : > { %1915 = vmatmul.mubr.bf16.gmra.mrb[4].mxu0 %v2353_v14  ;;  %1834 = vmatprep.mubr.msk.bf16.mxu1 %vm2095_vm0, %v2094_v1 }
  0x71   : > { %1918 = vmatprep.mubr.msk.bf16.mxu0 %vm2095_vm0, %v2094_v1 }
  0x77   : > { %1835 = vmatmul.mubr.bf16.gmra.mrb[8].mxu1 %v688_v6 }
  0x78   : > { %1919 = vmatmul.mubr.bf16.gmra.mrb[8].mxu0 %v1213_v7 }
 0x13a   : > { %v774_v0 = vpop.f32.mrb[0].mxu1 }
 0x13b   : > { %v1299_v8 = vpop.f32.mrb[0].mxu0  ;;  %v1828_v11 = vpop.f32.mrb[1].mxu1 }
 0x13c   : > { %v1922_v12 = vadd.f32 %v1299_v8, %v774_v0  ;;  %v1912_v14 = vpop.f32.mrb[1].mxu0  ;;  %v777_v1 = vpop.f32.mrb[2].mxu1 }
 0x13d   : > { %v1302_v59 = vpop.f32.mrb[2].mxu0  ;;  %v1829_v17 = vpop.f32.mrb[3].mxu1 }
 0x13e   : > { %v1347_v18 = vmul.f32 %v1922_v12, %v1653_v10  ;;  %v1923_v9 = vadd.f32 %v1302_v59, %v777_v1  ;;  %v1913_v19 = vpop.f32.mrb[3].mxu0 }
 0x140   : > { %v1360_v16 = vadd.f32 %v1654_v29, %v1347_v18  ;;  %v1348_v20 = vmul.f32 %v1923_v9, %v1653_v10 }
 0x142   : > { %v1366_v21 = vmul.f32 1.442695, %v1360_v16  ;;  %v1361_v22 = vadd.f32 %v1654_v29, %v1348_v20  ;;  %v782_v23 = vpop.f32.mrb[4].mxu1 }
 0x143   : > { %v1307_v24 = vpop.f32.mrb[4].mxu0  ;;  %v1832_v25 = vpop.f32.mrb[5].mxu1 }
 0x144   : > { %v1368_v26 = vmul.f32 1.442695, %v1361_v22  ;;  %v1924_v27 = vadd.f32 %v1307_v24, %v782_v23  ;;  %v1916_v28 = vpop.f32.mrb[5].mxu0  ;;  %v785_v15 = vpop.f32.mrb[6].mxu1  ;;  %2058 = vpow2.f32 %v1366_v21 }
 0x145   : > { %v1310_v30 = vpop.f32.mrb[6].mxu0  ;;  %v1833_v31 = vpop.f32.mrb[7].mxu1 }
 0x146   : > { %2060 = vpow2.f32 %v1368_v26  ;;  %v1349_v32 = vmul.f32 %v1924_v27, %v1653_v10  ;;  %v1925_v34 = vadd.f32 %v1310_v30, %v785_v15  ;;  %v1917_v35 = vpop.f32.mrb[7].mxu0 }
 0x148   : > { %v1362_v36 = vadd.f32 %v1654_v29, %v1349_v32  ;;  %v1350_v37 = vmul.f32 %v1925_v34, %v1653_v10 }
 0x14a   : > { %v1370_v38 = vmul.f32 1.442695, %v1362_v36  ;;  %v1363_v39 = vadd.f32 %v1654_v29, %v1350_v37  ;;  %v790_v40 = vpop.f32.mrb[8].mxu1 }
 0x14b   : > { %v1315_v33 = vpop.f32.mrb[8].mxu0  ;;  %v1836_v41 = vpop.f32.mrb[9].mxu1 }
 0x14c   : > { %v1372_v42 = vmul.f32 1.442695, %v1363_v39  ;;  %v1926_v43 = vadd.f32 %v1315_v33, %v790_v40  ;;  %v1920_v44 = vpop.f32.mrb[9].mxu0  ;;  %v793_v45 = vpop.f32.mrb[10].mxu1  ;;  %2062 = vpow2.f32 %v1370_v38 }
 0x14d   : > { %v1318_v46 = vpop.f32.mrb[10].mxu0  ;;  %v1837_v47 = vpop.f32.mrb[11].mxu1 }
 0x14e   : > { %2064 = vpow2.f32 %v1372_v42  ;;  %v1351_v48 = vmul.f32 %v1926_v43, %v1653_v10  ;;  %v1927_v49 = vadd.f32 %v1318_v46, %v793_v45  ;;  %v1921_v50 = vpop.f32.mrb[11].mxu0  ;;  %v2059_v51 = vpop.eup %2058 }
 0x150   : > { %v2061_v52 = vpop.eup %2060  ;;  %v1364_v53 = vadd.f32 %v1654_v29, %v1351_v48  ;;  %v1352_v54 = vmul.f32 %v1927_v49, %v1653_v10 }
 0x151   : > { %v1674_v55 = vpack.c.bf16 %v2061_v52, %v2059_v51 }
 0x152   : > { %v1374_v56 = vmul.f32 1.442695, %v1364_v53  ;;  %v1365_v57 = vadd.f32 %v1654_v29, %v1352_v54 }
 0x153   : > { %1675 = vst [vmem:[%s305_s28] sm:$0xff] %v1674_v55  }
 0x154   : > { %v1376_v60 = vmul.f32 1.442695, %v1365_v57  ;;  %2066 = vpow2.f32 %v1374_v56 }
 0x156   : > { %2068 = vpow2.f32 %v1376_v60  ;;  %v2063_v61 = vpop.eup %2062 }
 0x158   : > { %v2065_v63 = vpop.eup %2064 }
 0x159   : > { %v1679_v2 = vpack.c.bf16 %v2065_v63, %v2063_v61 }
 0x15b   : > { %1686 = vst [vmem:[%s305_s28 + $0x8] sm:$0xff] %v1679_v2  }
 0x15e   : > { %v2067_v3 = vpop.eup %2066 }
 0x160   : > { %v2069_v4 = vpop.eup %2068 }
 0x161   : > { %v1684_v5 = vpack.c.bf16 %v2069_v4, %v2067_v3 }
 0x163   : > { %1687 = vst [vmem:[%s305_s28 + $0x10] sm:$0xff] %v1684_v5  }
 0x164 PF: > { %s15_s20 = sadd.s32 1, %s2092_s20   ;;  %s2492_s18 = smov %s2088_s19 }
 0x165   : > { %p12_p5 = scmp.ge.s32.totalorder %s15_s20, 8   ;;  %s2493_s19 = smov %s2495_s21 }
 0x167   :  { %14 = sbr.rel (!%p12_p5) target bundleno = 2 (0x2), region = 78 }

// kernel: tile.33
= control target key start
LH: loop header
LB: loop body
LE: loop exit
PB: predicated region body
PF: predicated region fallthrough
CT: control target
= control target key end

     0   :  { %s22_s0 = inlined_call_operand.vmem [shape: f32[16], index: 0, kind: input, shape index: {}]   ;;  %s23_s1 = inlined_call_operand.vmem [shape: f32[8,16], index: 1, kind: output, shape index: {}]  }
   0x1   :  { %v4_v0 = vld [vmem:[%s22_s0] ss:$0 sm:$0xff] }
   0x2   :  { %5 = vst [vmem:[%s23_s1] sm:$0xff] %v4_v0 }

// kernel: tile.34
= control target key start
LH: loop header
LB: loop body
LE: loop exit
PB: predicated region body
PF: predicated region fallthrough
CT: control target
= control target key end

     0   :  { %s67_s10 = smov 112   ;;  %s68_s11 = smov 80   ;;  %vm3_vm0 = vcmask 130048   ;;  %vm9_vm1 = vcmask 1048448   ;;  %vm15_vm2 = vcmask 917248   ;;  %vm21_vm3 = vcmask 786048   ;;  %s111_s0 = inlined_call_operand.vmem [shape: f32[8,16], index: 0, kind: input, shape index: {}]   ;;  %s112_s1 = inlined_call_operand.vmem [shape: f32[1,128], index: 1, kind: output, shape index: {}]  }
   0x1   :  { %v53_v0 = vld [vmem:[%s111_s0 + $0x7] sm:$0x1]   ;;  %v55_v1 = vld [vmem:[%s111_s0 + $0x5] sm:$0x1]   ;;  %v54_v2 = vld [vmem:[%s111_s0 + $0x6] sm:$0x1]  }
   0x2   :  { %7 = vrot.lane.b32.xlu0 %v53_v0, %s67_s10  ;;  %19 = vrot.lane.b32.xlu1 %v55_v1, %s68_s11  ;;  %v56_v3 = vld [vmem:[%s111_s0 + $0x4] sm:$0x1]   ;;  %v2_v4 = vld [vmem:[%s111_s0] sm:$0x1]   ;;  %s69_s18 = smov 96   ;;  %s70_s19 = smov 64  }
   0x3   :  { %4 = vst.msk [vmem:[#allocation0] sm:$0x1] %vm3_vm0, %v2_v4   ;;  %v57_v5 = vld [vmem:[%s111_s0 + $0x3] sm:$0x1]   ;;  %v58_v6 = vld [vmem:[%s111_s0 + $0x2] sm:$0x1]  }
   0x4   :  { %s71_s24 = smov 48   ;;  %s72_s25 = smov 32   ;;  %v59_v7 = vld [vmem:[%s111_s0 + $0x1] sm:$0x1]   ;;  %vm27_vm4 = vcmask 654848   ;;  %vm33_vm5 = vcmask 523648  }
   0x5   :  { %s73_s0 = smov 16   ;;  %vm39_vm6 = vcmask 392448   ;;  %vm45_vm7 = vcmask 261248  }
   0x6   :  { %13 = vrot.lane.b32.xlu0 %v54_v2, %s69_s18  ;;  %25 = vrot.lane.b32.xlu1 %v56_v3, %s70_s19 }
   0xa   :  { %31 = vrot.lane.b32.xlu0 %v57_v5, %s71_s24  ;;  %37 = vrot.lane.b32.xlu1 %v58_v6, %s72_s25 }
   0xe   :  { %43 = vrot.lane.b32.xlu0 %v59_v7, %s73_s0 }
  0x74   :  { %v8_v8 = vpop.permute.xlu0 %7   ;;  %v20_v9 = vpop.permute.xlu1 %19  }
  0x75   :  { %10 = vst.msk [vmem:[#allocation0] sm:$0x1] %vm9_vm1, %v8_v8  }
  0x78   :  { %v14_v10 = vpop.permute.xlu0 %13   ;;  %v26_v11 = vpop.permute.xlu1 %25  }
  0x79   :  { %16 = vst.msk [vmem:[#allocation0] sm:$0x1] %vm15_vm2, %v14_v10  }
  0x7a   :  { %22 = vst.msk [vmem:[#allocation0] sm:$0x1] %vm21_vm3, %v20_v9  }
  0x7b   :  { %28 = vst.msk [vmem:[#allocation0] sm:$0x1] %vm27_vm4, %v26_v11  }
  0x7c   :  { %v32_v12 = vpop.permute.xlu0 %31   ;;  %v38_v13 = vpop.permute.xlu1 %37  }
  0x7d   :  { %34 = vst.msk [vmem:[#allocation0] sm:$0x1] %vm33_vm5, %v32_v12  }
  0x7e   :  { %40 = vst.msk [vmem:[#allocation0] sm:$0x1] %vm39_vm6, %v38_v13  }
  0x80   :  { %v44_v14 = vpop.permute.xlu0 %43  }
  0x81   :  { %46 = vst.msk [vmem:[#allocation0] sm:$0x1] %vm45_vm7, %v44_v14  }
  0x88   :  { %v50_v15 = vld [vmem:[#allocation0] sm:$0x1] }
  0x89   :  { %52 = vst [vmem:[%s112_s1] sm:$0x1] %v50_v15 }

// kernel: pallas_forward.6
= control target key start
LH: loop header
LB: loop body
LE: loop exit
PB: predicated region body
PF: predicated region fallthrough
CT: control target
= control target key end

     0   :  { %s9435_s18 = smov 0   ;;  %s9437_s19 = smov 0   ;;  %s10900_s0 = inlined_call_operand.vmem [shape: bf16[2,128,128], index: 0, kind: input, shape index: {}, may-alias: {0,1}]   ;;  %s10901_s1 = inlined_call_operand.vmem [shape: bf16[2,128,128], index: 1, kind: input, shape index: {}, may-alias: {0,1}]   ;;  %s10902_s2 = inlined_call_operand.vmem [shape: bf16[33,128,128], index: 2, kind: input, shape index: {}]   ;;  %s10903_s3 = inlined_call_operand.vmem [shape: f32[1,128], index: 3, kind: input, shape index: {}]   ;;  %s10904_s4 = inlined_call_operand.vmem [shape: f32[1,128], index: 4, kind: input, shape index: {}]   ;;  %s10905_s5 = inlined_call_operand.vmem [shape: bf16[2,64,128], index: 5, kind: output, shape index: {}]  }
   0x1   :  { %s9439_s20 = smov 0  }
   0x2 LB: > { %s27_s21 = sadd.s32 1, %s9399_s19  ;;  %p6788_p0 = scmp.ge.s32.totalorder %s9403_s20, 1  ;;  %s9403_s20 = sphi %s9439_s20, %s15_s20   ;;  %s9399_s19 = sphi %s9437_s19, %s10907_s19   ;;  %s9395_s18 = sphi %s9435_s18, %s10906_s18  }
   0x3   : > { %p29_p1 = scmp.ge.s32.totalorder %s27_s21, 2  ;;  %p229_p2 = scmp.lt.s32.totalorder %s9403_s20, 3 }
   0x5   : > { %s10909_s21 = smov (%p29_p1, %s27_s21), 0  ;;  %p230_p3 = pnand %p6788_p0, %p229_p2 }
   0x6   : > { %v9110_v0 = vld [vmem:[%s10902_s2] sm:$0xff] (!%p230_p3)   ;;  %v9112_v2 = vld [vmem:[%s10902_s2 + $0x8] sm:$0xff] (!%p230_p3)   ;;  %v9114_v4 = vld [vmem:[%s10902_s2 + $0x10] sm:$0xff] (!%p230_p3)   ;;  %p276_p4 = scmp.lt.s32.totalorder (!%p230_p3), %s9395_s18, 1  ;;  %vm542_vm0 = vsmask.f32 (!%p230_p3), 7424 }
   0x7   : > { %233 = sbr.rel (%p230_p3) target bundleno = 778 (0x30a), region = 40  ;;  %v9111_v1 = vld [vmem:[%s10902_s2 + $0x400] sm:$0xff] (!%p230_p3)   ;;  %8022 = vmatprep.subr.bf16.mxu1 (!%p230_p3), %v9110_v0  ;;  %v9113_v3 = vld [vmem:[%s10902_s2 + $0x408] sm:$0xff] (!%p230_p3)   ;;  %v9115_v5 = vld [vmem:[%s10902_s2 + $0x410] sm:$0xff] (!%p230_p3)   ;;  %vm747_vm1 = vcmask (!%p230_p3), 1046528   ;;  %vm1133_vm2 = vcmask (!%p230_p3), 1045504  }
   0x8   : > { %8406 = vmatprep.subr.bf16.mxu0 (!%p230_p3), %v9111_v1  ;;  %8023 = vmatpush3.bf16.msra.mxu1 (!%p230_p3), %v9110_v0  ;;  %v9116_v6 = vld [vmem:[%s10902_s2 + $0x18] sm:$0xff] (!%p230_p3)   ;;  %v9118_v8 = vld [vmem:[%s10902_s2 + $0x20] sm:$0xff] (!%p230_p3)   ;;  %v9120_v10 = vld [vmem:[%s10902_s2 + $0x28] sm:$0xff] (!%p230_p3)   ;;  %vm920_vm3 = vsmask.f32 (!%p230_p3), 6400  ;;  %vm1905_vm6 = vcmask (!%p230_p3), 1043456  }
   0x9   : > { %8407 = vmatpush3.bf16.msra.mxu0 (!%p230_p3), %v9111_v1  ;;  %8024 = vmatprep.subr.bf16.mxu1 (!%p230_p3), %v9112_v2  ;;  %v9117_v7 = vld [vmem:[%s10902_s2 + $0x418] sm:$0xff] (!%p230_p3)   ;;  %v9119_v9 = vld [vmem:[%s10902_s2 + $0x420] sm:$0xff] (!%p230_p3)   ;;  %v9121_v12 = vld [vmem:[%s10902_s2 + $0x428] sm:$0xff] (!%p230_p3)   ;;  %vm1692_vm4 = vsmask.f32 (!%p230_p3), 4352  ;;  %vm1519_vm7 = vcmask (!%p230_p3), 1044480  }
   0xa   : > { %8408 = vmatprep.subr.bf16.mxu0 (!%p230_p3), %v9113_v3  ;;  %v9122_v15 = vld [vmem:[%s10902_s2 + $0x30] sm:$0xff] (!%p230_p3)   ;;  %v9124_v20 = vld [vmem:[%s10902_s2 + $0x38] sm:$0xff] (!%p230_p3)   ;;  %v9127_v28 = vld [vmem:[%s10902_s2 + $0x40] sm:$0xff] (!%p230_p3)   ;;  %vm1306_vm5 = vsmask.f32 (!%p230_p3), 5376  ;;  %vm2291_vm8 = vcmask (!%p230_p3), 1042432  }
   0xb   : > { %v9123_v16 = vld [vmem:[%s10902_s2 + $0x430] sm:$0xff] (!%p230_p3)   ;;  %v9125_v22 = vld [vmem:[%s10902_s2 + $0x438] sm:$0xff] (!%p230_p3)   ;;  %v9130_v33 = vld [vmem:[%s10902_s2 + $0x440] sm:$0xff] (!%p230_p3)   ;;  %vm5333_vm9 = vcmask (!%p230_p3), 1041408   ;;  %vm2464_vm10 = vsmask.f32 (!%p230_p3), 2304 }
   0xc   : > { %8025 = vmatpush3.bf16.msra.mxu1 (!%p230_p3), %v9112_v2  ;;  %v9132_v34 = vld [vmem:[%s10902_s2 + $0x48] sm:$0xff] (!%p230_p3)   ;;  %v9134_v41 = vld [vmem:[%s10902_s2 + $0x50] sm:$0xff] (!%p230_p3)   ;;  %v9136_v48 = vld [vmem:[%s10902_s2 + $0x58] sm:$0xff] (!%p230_p3)   ;;  %vm2672_vm11 = vsmask.f32 (!%p230_p3), 1280  ;;  %vm2885_vm13 = vcmask (!%p230_p3), 1040384  }
   0xd   : > { %8409 = vmatpush3.bf16.msra.mxu0 (!%p230_p3), %v9113_v3  ;;  %8026 = vmatprep.subr.bf16.mxu1 (!%p230_p3), %v9114_v4  ;;  %v9133_v39 = vld [vmem:[%s10902_s2 + $0x448] sm:$0xff] (!%p230_p3)   ;;  %v9135_v42 = vld [vmem:[%s10902_s2 + $0x450] sm:$0xff] (!%p230_p3)   ;;  %v9137_v51 = vld [vmem:[%s10902_s2 + $0x458] sm:$0xff] (!%p230_p3)   ;;  %vm2078_vm12 = vsmask.f32 (!%p230_p3), 3328 }
   0xe   : > { %s10911_s18 = smov (!%p276_p4, %s9395_s18), 1  ;;  %8410 = vmatprep.subr.bf16.mxu0 %v9115_v5  ;;  %v9138_v53 = vld [vmem:[%s10902_s2 + $0x60] sm:$0xff]   ;;  %v9140_v0 = vld [vmem:[%s10902_s2 + $0x68] sm:$0xff]   ;;  %vm3058_vm14 = vsmask.f32 256 }
   0xf   : > { %s7590_s15 = sshll.u32 %s10911_s18, 6  ;;  %v9139_v57 = vld [vmem:[%s10902_s2 + $0x460] sm:$0xff]   ;;  %v9141_v1 = vld [vmem:[%s10902_s2 + $0x468] sm:$0xff]   ;;  %s7593_s8 = sshll.u32 %s10911_s18, 5 }
  0x10   : > { %8027 = vmatpush3.bf16.msra.mxu1 %v9114_v4  ;;  %s283_s26 = scalar_lea.vmem %s10900_s0, %s7590_s15  ;;  %s7592_s17 = sadd.s32 32, %s7590_s15 }
  0x11   : > { %8411 = vmatpush3.bf16.msra.mxu0 %v9115_v5  ;;  %8028 = vmatprep.subr.bf16.mxu1 %v9116_v6  ;;  %v9494_v11 = vld [vmem:[%s283_s26] sm:$0xff]   ;;  %v9501_v13 = vld [vmem:[%s283_s26 + $0x8] sm:$0xff]   ;;  %v9503_v14 = vld [vmem:[%s283_s26 + $0x10] sm:$0xff]   ;;  %s305_s11 = scalar_lea.vmem %s10905_s5, %s7593_s8 }
  0x12   : > { %8412 = vmatprep.subr.bf16.mxu0 %v9117_v7  ;;  %340 = vst [vmem:[#allocation2] sm:$0xff] %v9494_v11  ;;  %8038 = vmatprep.mubr.bf16.mxu1 %v9494_v11  ;;  %341 = vst [vmem:[#allocation2 + $0x8] sm:$0xff] %v9501_v13  ;;  %v3417_v17 = vshrl.u32 %v9501_v13, 16  ;;  %v3419_v18 = vshll.u32 %v9501_v13, 16  ;;  %v3424_v19 = vshll.u32 %v9503_v14, 16  ;;  %v9519_v21 = vld [vmem:[%s283_s26 + $0x18] sm:$0xff]   ;;  %s9560_s26 = scalar_lea.vmem %s10901_s1, %s7592_s17 }
  0x13   : > { %342 = vst [vmem:[#allocation2 + $0x10] sm:$0xff] %v9503_v14  ;;  %v3428_v25 = vshrl.u32 %v9503_v14, 16  ;;  %343 = vst [vmem:[#allocation2 + $0x18] sm:$0xff] %v9519_v21  ;;  %v3432_v26 = vshll.u32 %v9519_v21, 16  ;;  %v546_v32 = vshll.u32 %v9494_v11, 16  ;;  %v544_v35 = vshrl.u32 %v9494_v11, 16 }
  0x14   : > { %8029 = vmatpush3.bf16.msra.mxu1 %v9116_v6  ;;  %v3421_v23 = vrot.slane %v3419_v18, 1  ;;  %v3426_v24 = vrot.slane %v3424_v19, 1  ;;  %v3436_v37 = vshrl.u32 %v9519_v21, 16  ;;  %v9568_v40 = vld [vmem:[%s9560_s26] sm:$0xff]   ;;  %v9145_v45 = vld [vmem:[%s9560_s26 + $0x8] sm:$0xff]   ;;  %v9602_v55 = vrot.slane %v9503_v14, 1 }
  0x15   : > { %8413 = vmatpush3.bf16.msra.mxu0 %v9117_v7  ;;  %8030 = vmatprep.subr.bf16.mxu1 %v9118_v8  ;;  %v3434_v31 = vrot.slane %v3432_v26, 1  ;;  %v548_v38 = vrot.slane %v546_v32, 1  ;;  %368 = vst [vmem:[#allocation2 + $0x20] sm:$0xff] %v9568_v40  ;;  %v3440_v44 = vshll.u32 %v9568_v40, 16  ;;  %369 = vst [vmem:[#allocation2 + $0x28] sm:$0xff] %v9145_v45  ;;  %v3444_v52 = vshrl.u32 %v9568_v40, 16 }
  0x16   : > { %8414 = vmatprep.subr.bf16.mxu0 %v9119_v9  ;;  %v3422_v27 = vor.u32 %v3421_v23, %v3417_v17  ;;  %v3430_v30 = vor.u32 %v3428_v25, %v3426_v24  ;;  %v932_v56 = vrot.slane %v3417_v17, 1  ;;  %v935_v58 = vrot.slane %v3419_v18, 2  ;;  %v9150_v32 = vld [vmem:[%s10902_s2 + $0x88] sm:$0xff]  }
  0x17   : > { %v9580_v43 = vor.u32 %v3436_v37, %v3434_v31  ;;  %v549_v46 = vor.u32 %v548_v38, %v544_v35  ;;  %v3442_v47 = vrot.slane %v3440_v44, 1  ;;  %v4005_v3 = vrot.slane %v9503_v14, 2  ;;  %v9151_v38 = vld [vmem:[%s10902_s2 + $0x488] sm:$0xff]  }
  0x18   : > { %8031 = vmatpush3.bf16.msra.mxu1 %v9118_v8  ;;  %v9537_v29 = vsel %vm542_vm0, %v3422_v27, %v3426_v24  ;;  %v9555_v36 = vsel %vm542_vm0, %v3430_v30, %v3434_v31  ;;  %v9613_v63 = vor.u32 %v935_v58, %v932_v56  ;;  %v941_v4 = vrot.slane %v3428_v25, 1  ;;  %v9155_v56 = vld [vmem:[%s10902_s2 + $0x498] sm:$0xff]   ;;  %v9157_v58 = vld [vmem:[%s10902_s2 + $0x4a0] sm:$0xff]  }
  0x19   : > { %8415 = vmatpush3.bf16.msra.mxu0 %v9119_v9  ;;  %8032 = vmatprep.subr.bf16.mxu1 %v9120_v10  ;;  %v3443_v49 = vsel %vm542_vm0, %v9580_v43, %v3442_v47  ;;  %v554_v50 = vsel %vm542_vm0, %v549_v46, %v3421_v23  ;;  %v3593_v54 = vld [vmem:[#allocation2 + $0x8] sm:$0xfe]  ;;  %v3446_v60 = vor.u32 %v3444_v52, %v3442_v47  ;;  %v944_v7 = vrot.slane %v3424_v19, 2  ;;  %v9142_v9 = vld [vmem:[%s10902_s2 + $0x70] sm:$0xff]   ;;  %v9146_v19 = vld [vmem:[%s10902_s2 + $0x78] sm:$0xff]  }
  0x1a   : > { %8416 = vmatprep.subr.bf16.mxu0 %v9121_v12  ;;  %8422 = vmatprep.mubr.bf16.mxu0 %v9537_v29  ;;  %v3620_v62 = vrot.slane %v3593_v54, 1  ;;  %v4007_v8 = vrot.slane %v9519_v21, 2  ;;  %v950_v11 = vrot.slane %v3436_v37, 1  ;;  %v4009_v18 = vrot.slane %v9568_v40, 2  ;;  %v3770_v27 = vld [vmem:[#allocation2 + $0x8] sm:$0xfe] }
  0x1b   : > { %v3625_v30 = vrot.slane %v9568_v40, 1  ;;  %v9152_v47 = vld [vmem:[%s10902_s2 + $0x90] sm:$0xff]   ;;  %v9154_v54 = vld [vmem:[%s10902_s2 + $0x98] sm:$0xff]  }
  0x1c   : > { %8033 = vmatpush3.bf16.msra.mxu1 %v9120_v10  ;;  %v3398_v59 = vld [vmem:[#allocation2 + $0x28] sm:$0x1]  ;;  %v3622_v6 = vsel %vm747_vm1, %v3620_v62, %v9602_v55  ;;  %v9633_v10 = vor.u32 %v944_v7, %v941_v4  ;;  %v9662_v23 = vsel %vm1133_vm2, %v4007_v8, %v4009_v18  ;;  %v524_v24 = vld [vmem:[#allocation2 + $0x20] sm:$0x1]  ;;  %v9161_v62 = vld [vmem:[%s10902_s2 + $0x4b0] sm:$0xff]   ;;  %v3821_v4 = vrot.slane %v3444_v52, 1 }
  0x1d   : > { %8417 = vmatpush3.bf16.msra.mxu0 %v9121_v12  ;;  %8034 = vmatprep.subr.bf16.mxu1 %v9122_v15  ;;  %v3448_v61 = vshll.u32 %v3398_v59, 16  ;;  %v9144_v12 = vld [vmem:[%s10902_s2 + $0x470] sm:$0xff]   ;;  %v575_v31 = vshll.u32 %v524_v24, 16  ;;  %v3597_v37 = vld [vmem:[#allocation2 + $0x28] sm:$0x1]  ;;  %v9164_v7 = vld [vmem:[%s10902_s2 + $0xc0] sm:$0xff]  }
  0x1e   : > { %8418 = vmatprep.subr.bf16.mxu0 %v9123_v16  ;;  %v9667_v25 = vsel %vm920_vm3, %v9613_v63, %v9633_v10  ;;  %v9158_v59 = vld [vmem:[%s10902_s2 + $0xa8] sm:$0xff]  }
  0x1f   : > { %v3450_v2 = vrot.slane %v3448_v61, 1  ;;  %v9160_v61 = vld [vmem:[%s10902_s2 + $0xb0] sm:$0xff]  }
  0x20   : > { %8035 = vmatpush3.bf16.msra.mxu1 %v9122_v15  ;;  %v9643_v15 = vsel %vm1133_vm2, %v4005_v3, %v4007_v8 }
  0x21   : > { %8419 = vmatpush3.bf16.msra.mxu0 %v9123_v16  ;;  %8036 = vmatprep.subr.bf16.mxu1 %v9124_v20  ;;  %v3451_v5 = vsel %vm542_vm0, %v3446_v60, %v3450_v2  ;;  %v953_v16 = vrot.slane %v3432_v26, 2  ;;  %v9148_v26 = vld [vmem:[%s10902_s2 + $0x80] sm:$0xff]   ;;  %v9159_v60 = vld [vmem:[%s10902_s2 + $0x4a8] sm:$0xff]  }
  0x22   : > { %8420 = vmatprep.subr.bf16.mxu0 %v9125_v22  ;;  %v3774_v2 = vld [vmem:[#allocation2 + $0x28] sm:$0x3] }
  0x23   : > { %v9647_v17 = vor.u32 %v953_v16, %v950_v11  ;;  %v3828_v8 = vshrl.u32 %v3774_v2, 16 }
  0x24   : > { %8037 = vmatpush3.bf16.msra.mxu1 %v9124_v20  ;;  %v9147_v20 = vld [vmem:[%s10902_s2 + $0x478] sm:$0xff]  }
  0x25   : > { %8421 = vmatpush3.bf16.msra.mxu0 %v9125_v22  ;;  %8046 = vmatprep.subr.bf16.mxu1 %v9127_v28  ;;  %v9657_v22 = vrot.slane %v9519_v21, 1 }
  0x26   : > { %8430 = vmatprep.subr.bf16.mxu0 %v9130_v33 }
  0x27   : > { %8039 = vmatmul.mubr.bf16.vlgmr.msra.gmra.mrb[0].mxu1 %v9501_v13  ;;  %v9687_v35 = vsel %vm747_vm1, %v9602_v55, %v9657_v22 }
  0x28   : > { %8047 = vmatpush3.bf16.msra.mxu1 %v9127_v28  ;;  %8423 = vmatmul.mubr.bf16.vlgmr.msra.gmra.mrb[0].mxu0 %v9555_v36  ;;  %v9149_v28 = vld [vmem:[%s10902_s2 + $0x480] sm:$0xff]  }
  0x29   : > { %8431 = vmatpush3.bf16.msra.mxu0 %v9130_v33  ;;  %8048 = vmatprep.subr.bf16.mxu1 %v9132_v34  ;;  %v3793_v33 = vshrl.u32 %v3770_v27, 16 }
  0x2a   : > { %8432 = vmatprep.subr.bf16.mxu0 %v9133_v39  ;;  %8042 = vmatprep.mubr.bf16.mxu1 %v9503_v14  ;;  %v9174_v14 = vld [vmem:[%s10902_s2 + $0xe8] sm:$0xff]  }
  0x2b   : > { %8426 = vmatprep.mubr.bf16.mxu0 %v3443_v49  ;;  %v3795_v45 = vrot.slane %v3793_v33, 1  ;;  %v3977_v33 = vld [vmem:[#allocation2 + $0x8] sm:$0xfc] }
  0x2c   : > { %8049 = vmatpush3.bf16.msra.mxu1 %v9132_v34  ;;  %v3796_v34 = vshll.u32 %v3770_v27, 16 }
  0x2d   : > { %8433 = vmatpush3.bf16.msra.mxu0 %v9133_v39  ;;  %8050 = vmatprep.subr.bf16.mxu1 %v9134_v41  ;;  %v577_v39 = vrot.slane %v575_v31, 1 }
  0x2e   : > { %8434 = vmatprep.subr.bf16.mxu0 %v9135_v42  ;;  %v3798_v46 = vrot.slane %v3796_v34, 2  ;;  %v9169_v34 = vld [vmem:[%s10902_s2 + $0x4d0] sm:$0xff]  }
  0x2f   : > { %8043 = vmatmul.mubr.bf16.gmra.mrb[4].mxu1 %v9519_v21  ;;  %v9675_v21 = vsel %vm920_vm3, %v9633_v10, %v9647_v17 }
  0x30   : > { %8051 = vmatpush3.bf16.msra.mxu1 %v9134_v41  ;;  %8062 = vmatprep.mubr.bf16.mxu1 %v554_v50  ;;  %v720_v41 = vld [vmem:[#allocation2] sm:$0xfe]  ;;  %v749_v50 = vrot.slane %v9501_v13, 1 }
  0x31   : > { %8435 = vmatpush3.bf16.msra.mxu0 %v9135_v42  ;;  %8052 = vmatprep.subr.bf16.mxu1 %v9136_v48  ;;  %v3626_v42 = vsel %vm747_vm1, %v9657_v22, %v3625_v30  ;;  %v748_v49 = vrot.slane %v720_v41, 1  ;;  %v9170_v41 = vld [vmem:[%s10902_s2 + $0xd8] sm:$0xff]  }
  0x32   : > { %8436 = vmatprep.subr.bf16.mxu0 %v9137_v51  ;;  %8427 = vmatmul.mubr.bf16.gmra.mrb[4].mxu0 %v3451_v5  ;;  %v3824_v5 = vrot.slane %v3440_v44, 2  ;;  %v752_v44 = vsel %vm747_vm1, %v749_v50, %v9602_v55  ;;  %v9168_v55 = vld [vmem:[%s10902_s2 + $0xd0] sm:$0xff]  }
  0x33   : > { %8446 = vmatprep.mubr.bf16.mxu0 %v3622_v6  ;;  %v750_v13 = vsel %vm747_vm1, %v748_v49, %v749_v50  ;;  %v898_v6 = vld [vmem:[#allocation2] sm:$0xfe]  ;;  %v9177_v49 = vld [vmem:[%s10902_s2 + $0x4f0] sm:$0xff]  }
  0x34   : > { %8053 = vmatpush3.bf16.msra.mxu1 %v9136_v48  ;;  %v3627_v48 = vrot.slane %v3597_v37, 1  ;;  %v922_v11 = vshrl.u32 %v898_v6, 16  ;;  %v925_v52 = vshll.u32 %v898_v6, 16  ;;  %v3825_v16 = vor.u32 %v3824_v5, %v3821_v4  ;;  %v9180_v5 = vld [vmem:[%s10902_s2 + $0x100] sm:$0xff]  }
  0x35   : > { %8437 = vmatpush3.bf16.msra.mxu0 %v9137_v51  ;;  %8054 = vmatprep.subr.bf16.mxu1 %v9138_v53  ;;  %v578_v51 = vsel %vm542_vm0, %v9580_v43, %v577_v39  ;;  %v4004_v39 = vrot.slane %v3977_v33, 2 }
  0x36   : > { %8438 = vmatprep.subr.bf16.mxu0 %v9139_v57  ;;  %v924_v27 = vrot.slane %v922_v11, 1 }
  0x38   : > { %8055 = vmatpush3.bf16.msra.mxu1 %v9138_v53  ;;  %v3799_v53 = vor.u32 %v3798_v46, %v3795_v45  ;;  %v9172_v46 = vld [vmem:[%s10902_s2 + $0xe0] sm:$0xff]  }
  0x39   : > { %8439 = vmatpush3.bf16.msra.mxu0 %v9139_v57  ;;  %8056 = vmatprep.subr.bf16.mxu1 %v9140_v0  ;;  %v9156_v57 = vld [vmem:[%s10902_s2 + $0xa0] sm:$0xff]  }
  0x3a   : > { %8440 = vmatprep.subr.bf16.mxu0 %v9141_v1  ;;  %v3808_v43 = vsel %vm920_vm3, %v3799_v53, %v9633_v10  ;;  %v9165_v10 = vld [vmem:[%s10902_s2 + $0x4c0] sm:$0xff]  }
  0x3c   : > { %8057 = vmatpush3.bf16.msra.mxu1 %v9140_v0  ;;  %v9162_v0 = vld [vmem:[%s10902_s2 + $0xb8] sm:$0xff]  }
  0x3d   : > { %8441 = vmatpush3.bf16.msra.mxu0 %v9141_v1  ;;  %8058 = vmatprep.subr.bf16.mxu1 %v9142_v9  ;;  %v9163_v1 = vld [vmem:[%s10902_s2 + $0x4b8] sm:$0xff]  }
  0x3e   : > { %8442 = vmatprep.subr.bf16.mxu0 %v9144_v12 }
  0x40   : > { %8059 = vmatpush3.bf16.msra.mxu1 %v9142_v9  ;;  %v3831_v9 = vshll.u32 %v3774_v2, 16 }
  0x41   : > { %8443 = vmatpush3.bf16.msra.mxu0 %v9144_v12  ;;  %8060 = vmatprep.subr.bf16.mxu1 %v9146_v19  ;;  %v9166_v12 = vld [vmem:[%s10902_s2 + $0xc8] sm:$0xff]  }
  0x42   : > { %8444 = vmatprep.subr.bf16.mxu0 %v9147_v20  ;;  %v3833_v24 = vrot.slane %v3831_v9, 2 }
  0x44   : > { %8061 = vmatpush3.bf16.msra.mxu1 %v9146_v19  ;;  %v724_v19 = vld [vmem:[#allocation2 + $0x20] sm:$0x1] }
  0x45   : > { %8445 = vmatpush3.bf16.msra.mxu0 %v9147_v20  ;;  %8070 = vmatprep.subr.bf16.mxu1 %v9148_v26  ;;  %v3830_v20 = vrot.slane %v3828_v8, 1  ;;  %v755_v31 = vrot.slane %v724_v19, 1  ;;  %v9832_v8 = vld [vmem:[#allocation2 + $0x8] sm:$0xff] }
  0x46   : > { %8454 = vmatprep.subr.bf16.mxu0 %v9149_v28 }
  0x47   : > { %8063 = vmatmul.mubr.bf16.vlgmr.msra.gmra.mrb[0].mxu1 %v9537_v29  ;;  %v9153_v29 = vld [vmem:[%s10902_s2 + $0x490] sm:$0xff]  }
  0x48   : > { %8071 = vmatpush3.bf16.msra.mxu1 %v9148_v26  ;;  %8447 = vmatmul.mubr.bf16.vlgmr.msra.gmra.mrb[0].mxu0 %v9687_v35  ;;  %v9167_v26 = vld [vmem:[%s10902_s2 + $0x4c8] sm:$0xff]  }
  0x49   : > { %8455 = vmatpush3.bf16.msra.mxu0 %v9149_v28  ;;  %8072 = vmatprep.subr.bf16.mxu1 %v9150_v32  ;;  %v927_v28 = vrot.slane %v925_v52, 2  ;;  %v1316_v52 = vshrl.u32 %v9832_v8, 16 }
  0x4a   : > { %8456 = vmatprep.subr.bf16.mxu0 %v9151_v38  ;;  %8066 = vmatprep.mubr.bf16.mxu1 %v9555_v36  ;;  %v3628_v36 = vsel %vm747_vm1, %v3625_v30, %v3627_v48  ;;  %v3826_v30 = vsel %vm920_vm3, %v9647_v17, %v3825_v16  ;;  %v902_v48 = vld [vmem:[#allocation2 + $0x20] sm:$0x3] }
  0x4b   : > { %8450 = vmatprep.mubr.bf16.mxu0 %v3626_v42  ;;  %v928_v37 = vor.u32 %v927_v28, %v924_v27  ;;  %v957_v53 = vshrl.u32 %v902_v48, 16  ;;  %v9182_v27 = vld [vmem:[%s10902_s2 + $0x108] sm:$0xff]  }
  0x4c   : > { %8073 = vmatpush3.bf16.msra.mxu1 %v9150_v32  ;;  %v3834_v32 = vor.u32 %v3833_v24, %v3830_v20  ;;  %v1704_v20 = vrot.slane %v1316_v52, 3  ;;  %v9183_v28 = vld [vmem:[%s10902_s2 + $0x508] sm:$0xff]  }
  0x4d   : > { %8457 = vmatpush3.bf16.msra.mxu0 %v9151_v38  ;;  %8074 = vmatprep.subr.bf16.mxu1 %v9152_v47  ;;  %v756_v38 = vsel %vm747_vm1, %v9657_v22, %v755_v31  ;;  %v937_v45 = vsel %vm920_vm3, %v928_v37, %v9613_v63  ;;  %v4006_v22 = vsel %vm1133_vm2, %v4004_v39, %v4005_v3  ;;  %v9175_v63 = vld [vmem:[%s10902_s2 + $0x4e8] sm:$0xff]   ;;  %v9794_v3 = vld [vmem:[#allocation2 + $0x10] sm:$0xff]  ;;  %v959_v11 = vrot.slane %v957_v53, 1  ;;  %v1106_v31 = vld [vmem:[#allocation2] sm:$0xfc] }
  0x4e   : > { %8458 = vmatprep.subr.bf16.mxu0 %v9153_v29  ;;  %v3835_v42 = vsel %vm920_vm3, %v3825_v16, %v3834_v32  ;;  %v4185_v50 = vshrl.u32 %v9794_v3, 16  ;;  %v9184_v39 = vld [vmem:[%s10902_s2 + $0x110] sm:$0xff]  }
  0x4f   : > { %8067 = vmatmul.mubr.bf16.gmra.mrb[4].mxu1 %v578_v51  ;;  %v9803_v51 = vld [vmem:[#allocation2 + $0x18] sm:$0xff] }
  0x50   : > { %8075 = vmatpush3.bf16.msra.mxu1 %v9152_v47  ;;  %8451 = vmatmul.mubr.bf16.gmra.mrb[4].mxu0 %v3628_v36  ;;  %v9173_v47 = vld [vmem:[%s10902_s2 + $0x4e0] sm:$0xff]   ;;  %v4571_v36 = vrot.slane %v4185_v50, 3  ;;  %v4187_v32 = vrot.slane %v4185_v50, 2  ;;  %v9190_v50 = vld [vmem:[%s10902_s2 + $0x128] sm:$0xff]  }
  0x51   : > { %8459 = vmatpush3.bf16.msra.mxu0 %v9153_v29  ;;  %8076 = vmatprep.subr.bf16.mxu1 %v9154_v54  ;;  %v9176_v29 = vld [vmem:[%s10902_s2 + $0xf0] sm:$0xff]  }
  0x52   : > { %8460 = vmatprep.subr.bf16.mxu0 %v9155_v56  ;;  %8086 = vmatprep.mubr.bf16.mxu1 %v750_v13  ;;  %v9178_v13 = vld [vmem:[%s10902_s2 + $0xf8] sm:$0xff]  }
  0x53   : > { %8470 = vmatprep.mubr.bf16.mxu0 %v3808_v43  ;;  %v960_v43 = vshll.u32 %v902_v48, 16  ;;  %v9189_v48 = vld [vmem:[%s10902_s2 + $0x520] sm:$0xff]  }
  0x54   : > { %8077 = vmatpush3.bf16.msra.mxu1 %v9154_v54  ;;  %v4188_v54 = vshll.u32 %v9794_v3, 16 }
  0x55   : > { %8461 = vmatpush3.bf16.msra.mxu0 %v9155_v56  ;;  %8078 = vmatprep.subr.bf16.mxu1 %v9156_v57  ;;  %v9806_v56 = vld [vmem:[#allocation2 + $0x20] sm:$0xff] }
  0x56   : > { %8462 = vmatprep.subr.bf16.mxu0 %v9157_v58  ;;  %v4190_v33 = vrot.slane %v4188_v54, 3 }
  0x58   : > { %8079 = vmatpush3.bf16.msra.mxu1 %v9156_v57  ;;  %v4194_v57 = vshrl.u32 %v9803_v51, 16 }
  0x59   : > { %8463 = vmatpush3.bf16.msra.mxu0 %v9157_v58  ;;  %8080 = vmatprep.subr.bf16.mxu1 %v9158_v59  ;;  %v9179_v58 = vld [vmem:[%s10902_s2 + $0x4f8] sm:$0xff]  }
  0x5a   : > { %8464 = vmatprep.subr.bf16.mxu0 %v9159_v60 }
  0x5c   : > { %8081 = vmatpush3.bf16.msra.mxu1 %v9158_v59  ;;  %v4197_v59 = vshll.u32 %v9803_v51, 16 }
  0x5d   : > { %8465 = vmatpush3.bf16.msra.mxu0 %v9159_v60  ;;  %8082 = vmatprep.subr.bf16.mxu1 %v9160_v61  ;;  %v4574_v60 = vrot.slane %v4188_v54, 4  ;;  %v9191_v54 = vld [vmem:[%s10902_s2 + $0x528] sm:$0xff]  }
  0x5e   : > { %8466 = vmatprep.subr.bf16.mxu0 %v9161_v62  ;;  %v4583_v4 = vrot.slane %v4197_v59, 4 }
  0x5f   : > { %v9820_v2 = vor.u32 %v4574_v60, %v4571_v36  ;;  %v9192_v36 = vld [vmem:[%s10902_s2 + $0x130] sm:$0xff]   ;;  %v4196_v60 = vrot.slane %v4194_v57, 2 }
  0x60   : > { %8083 = vmatpush3.bf16.msra.mxu1 %v9160_v61  ;;  %v4203_v61 = vshrl.u32 %v9806_v56, 16 }
  0x61   : > { %8467 = vmatpush3.bf16.msra.mxu0 %v9161_v62  ;;  %8084 = vmatprep.subr.bf16.mxu1 %v9162_v0  ;;  %v4580_v62 = vrot.slane %v4194_v57, 3 }
  0x62   : > { %8468 = vmatprep.subr.bf16.mxu0 %v9163_v1  ;;  %v4589_v6 = vrot.slane %v4203_v61, 3 }
  0x63   : > { %v9834_v9 = vor.u32 %v4583_v4, %v4580_v62  ;;  %v4199_v62 = vrot.slane %v4197_v59, 3  ;;  %v1137_v4 = vrot.slane %v9794_v3, 2 }
  0x64   : > { %8085 = vmatpush3.bf16.msra.mxu1 %v9162_v0  ;;  %v4154_v0 = vld [vmem:[#allocation2 + $0x8] sm:$0xfc] }
  0x65   : > { %8469 = vmatpush3.bf16.msra.mxu0 %v9163_v1  ;;  %8094 = vmatprep.subr.bf16.mxu1 %v9164_v7  ;;  %v4206_v1 = vshll.u32 %v9806_v56, 16  ;;  %v4177_v19 = vshrl.u32 %v4154_v0, 16  ;;  %v4180_v24 = vshll.u32 %v4154_v0, 16  ;;  %v4158_v0 = vld [vmem:[#allocation2 + $0x28] sm:$0x7]  ;;  %v9941_v59 = vor.u32 %v4199_v62, %v4196_v60  ;;  %v9208_v60 = vld [vmem:[%s10902_s2 + $0x170] sm:$0xff]  }
  0x66   : > { %8478 = vmatprep.subr.bf16.mxu0 %v9165_v10  ;;  %v9209_v62 = vld [vmem:[%s10902_s2 + $0x570] sm:$0xff]  }
  0x67   : > { %8087 = vmatmul.mubr.bf16.vlgmr.msra.gmra.mrb[0].mxu1 %v752_v44  ;;  %v962_v44 = vrot.slane %v960_v43, 2  ;;  %v4179_v37 = vrot.slane %v4177_v19, 2  ;;  %v9194_v43 = vld [vmem:[%s10902_s2 + $0x138] sm:$0xff]   ;;  %v4208_v57 = vrot.slane %v4206_v1, 3  ;;  %v1139_v19 = vrot.slane %v9803_v51, 2 }
  0x68   : > { %8095 = vmatpush3.bf16.msra.mxu1 %v9164_v7  ;;  %8471 = vmatmul.mubr.bf16.vlgmr.msra.gmra.mrb[0].mxu0 %v9675_v21  ;;  %v9181_v7 = vld [vmem:[%s10902_s2 + $0x500] sm:$0xff]  }
  0x69   : > { %8479 = vmatpush3.bf16.msra.mxu0 %v9165_v10  ;;  %8096 = vmatprep.subr.bf16.mxu1 %v9166_v12  ;;  %v4592_v10 = vrot.slane %v4206_v1, 4  ;;  %v9198_v1 = vld [vmem:[%s10902_s2 + $0x148] sm:$0xff]  }
  0x6a   : > { %8480 = vmatprep.subr.bf16.mxu0 %v9167_v26  ;;  %8090 = vmatprep.mubr.bf16.mxu1 %v9687_v35  ;;  %v9171_v35 = vld [vmem:[%s10902_s2 + $0x4d8] sm:$0xff]  }
  0x6b   : > { %8474 = vmatprep.mubr.bf16.mxu0 %v3826_v30  ;;  %v9840_v16 = vor.u32 %v4592_v10, %v4589_v6  ;;  %v1284_v6 = vld [vmem:[#allocation2] sm:$0xfc]  ;;  %v4212_v10 = vshrl.u32 %v4158_v0, 16 }
  0x6c   : > { %8097 = vmatpush3.bf16.msra.mxu1 %v9166_v12  ;;  %v1319_v12 = vshll.u32 %v9832_v8, 16 }
  0x6d   : > { %8481 = vmatpush3.bf16.msra.mxu0 %v9167_v26  ;;  %8098 = vmatprep.subr.bf16.mxu1 %v9168_v55 }
  0x6e   : > { %8482 = vmatprep.subr.bf16.mxu0 %v9169_v34  ;;  %v1707_v26 = vrot.slane %v1319_v12, 4 }
  0x6f   : > { %8091 = vmatmul.mubr.bf16.gmra.mrb[4].mxu1 %v756_v38  ;;  %v4182_v38 = vrot.slane %v4180_v24, 3  ;;  %v1311_v24 = vshll.u32 %v1284_v6, 16 }
  0x70   : > { %8099 = vmatpush3.bf16.msra.mxu1 %v9168_v55  ;;  %8475 = vmatmul.mubr.bf16.gmra.mrb[4].mxu0 %v3835_v42  ;;  %v3981_v55 = vld [vmem:[#allocation2 + $0x28] sm:$0x3]  ;;  %v9852_v30 = vor.u32 %v1707_v26, %v1704_v20  ;;  %v1135_v42 = vrot.slane %v9832_v8, 2  ;;  %v1308_v20 = vshrl.u32 %v1284_v6, 16 }
  0x71   : > { %8483 = vmatpush3.bf16.msra.mxu0 %v9169_v34  ;;  %8100 = vmatprep.subr.bf16.mxu1 %v9170_v41  ;;  %v963_v34 = vor.u32 %v962_v44, %v959_v11  ;;  %v4215_v11 = vshll.u32 %v4158_v0, 16  ;;  %v4777_v44 = vrot.slane %v9806_v56, 4  ;;  %v1288_v0 = vld [vmem:[#allocation2 + $0x20] sm:$0x7] }
  0x72   : > { %8484 = vmatprep.subr.bf16.mxu0 %v9171_v35  ;;  %8110 = vmatprep.mubr.bf16.mxu1 %v937_v45  ;;  %v9873_v45 = vsel %vm1692_vm4, %v9834_v9, %v9840_v16  ;;  %v9912_v53 = vsel %vm1692_vm4, %v9852_v30, %v9820_v2  ;;  %v1343_v6 = vshrl.u32 %v1288_v0, 16 }
  0x73   : > { %8494 = vmatprep.mubr.bf16.mxu0 %v4006_v22  ;;  %v4183_v22 = vor.u32 %v4182_v38, %v4179_v37  ;;  %v1318_v37 = vrot.slane %v1316_v52, 2  ;;  %v1321_v38 = vrot.slane %v1319_v12, 3  ;;  %v4361_v12 = vld [vmem:[#allocation2 + $0x8] sm:$0xf8] }
  0x74   : > { %8101 = vmatpush3.bf16.msra.mxu1 %v9170_v41  ;;  %v4011_v41 = vrot.slane %v3981_v55, 2 }
  0x75   : > { %8485 = vmatpush3.bf16.msra.mxu0 %v9171_v35  ;;  %8102 = vmatprep.subr.bf16.mxu1 %v9172_v46  ;;  %v9868_v35 = vsel %vm1692_vm4, %v9820_v2, %v9834_v9 }
  0x76   : > { %8486 = vmatprep.subr.bf16.mxu0 %v9173_v47 }
  0x78   : > { %8103 = vmatpush3.bf16.msra.mxu1 %v9172_v46  ;;  %v9880_v46 = vor.u32 %v4190_v33, %v4187_v32  ;;  %v4214_v33 = vrot.slane %v4212_v10, 2  ;;  %v9212_v10 = vld [vmem:[%s10902_s2 + $0x180] sm:$0xff]  }
  0x79   : > { %8487 = vmatpush3.bf16.msra.mxu0 %v9173_v47  ;;  %8104 = vmatprep.subr.bf16.mxu1 %v9174_v14  ;;  %v4012_v47 = vsel %vm1133_vm2, %v4009_v18, %v4011_v41  ;;  %v4773_v18 = vrot.slane %v9794_v3, 4  ;;  %v1310_v41 = vrot.slane %v1308_v20, 2 }
  0x7a   : > { %8488 = vmatprep.subr.bf16.mxu0 %v9175_v63  ;;  %v4192_v40 = vsel %vm1306_vm5, %v4183_v22, %v9880_v46  ;;  %v9965_v32 = vsel %vm1306_vm5, %v9880_v46, %v9941_v59 }
  0x7c   : > { %8105 = vmatpush3.bf16.msra.mxu1 %v9174_v14  ;;  %v9187_v14 = vld [vmem:[%s10902_s2 + $0x518] sm:$0xff]  }
  0x7d   : > { %8489 = vmatpush3.bf16.msra.mxu0 %v9175_v63  ;;  %8106 = vmatprep.subr.bf16.mxu1 %v9176_v29  ;;  %v9188_v63 = vld [vmem:[%s10902_s2 + $0x120] sm:$0xff]  }
  0x7e   : > { %8490 = vmatprep.subr.bf16.mxu0 %v9177_v49 }
  0x80   : > { %8107 = vmatpush3.bf16.msra.mxu1 %v9176_v29  ;;  %v4775_v29 = vrot.slane %v9803_v51, 4 }
  0x81   : > { %8491 = vmatpush3.bf16.msra.mxu0 %v9177_v49  ;;  %8108 = vmatprep.subr.bf16.mxu1 %v9178_v13 }
  0x82   : > { %8492 = vmatprep.subr.bf16.mxu0 %v9179_v58  ;;  %v9904_v49 = vsel %vm1905_vm6, %v4773_v18, %v4775_v29  ;;  %v9954_v26 = vsel %vm1905_vm6, %v4775_v29, %v4777_v44  ;;  %v9203_v29 = vld [vmem:[%s10902_s2 + $0x558] sm:$0xff]  }
  0x84   : > { %8109 = vmatpush3.bf16.msra.mxu1 %v9178_v13  ;;  %v9193_v13 = vld [vmem:[%s10902_s2 + $0x530] sm:$0xff]  }
  0x85   : > { %8493 = vmatpush3.bf16.msra.mxu0 %v9179_v58  ;;  %8118 = vmatprep.subr.bf16.mxu1 %v9180_v5  ;;  %v9195_v58 = vld [vmem:[%s10902_s2 + $0x538] sm:$0xff]  }
  0x86   : > { %8502 = vmatprep.subr.bf16.mxu0 %v9181_v7 }
  0x87   : > { %8111 = vmatmul.mubr.bf16.vlgmr.msra.gmra.mrb[0].mxu1 %v9667_v25  ;;  %v9185_v25 = vld [vmem:[%s10902_s2 + $0x510] sm:$0xff]  }
  0x88   : > { %8119 = vmatpush3.bf16.msra.mxu1 %v9180_v5  ;;  %8495 = vmatmul.mubr.bf16.vlgmr.msra.gmra.mrb[0].mxu0 %v9643_v15  ;;  %v1134_v15 = vrot.slane %v1106_v31, 2  ;;  %v4205_v5 = vrot.slane %v4203_v61, 2  ;;  %v9197_v61 = vld [vmem:[%s10902_s2 + $0x540] sm:$0xff]  }
  0x89   : > { %8503 = vmatpush3.bf16.msra.mxu0 %v9181_v7  ;;  %8120 = vmatprep.subr.bf16.mxu1 %v9182_v27  ;;  %v9196_v7 = vld [vmem:[%s10902_s2 + $0x140] sm:$0xff]  }
  0x8a   : > { %8504 = vmatprep.subr.bf16.mxu0 %v9183_v28  ;;  %8114 = vmatprep.mubr.bf16.mxu1 %v9675_v21  ;;  %v9186_v21 = vld [vmem:[%s10902_s2 + $0x118] sm:$0xff]   ;;  %v4209_v55 = vor.u32 %v4208_v57, %v4205_v5  ;;  %v1110_v31 = vld [vmem:[#allocation2 + $0x20] sm:$0x3]  ;;  %v4538_v57 = vld [vmem:[#allocation2 + $0x8] sm:$0xf8] }
  0x8b   : > { %8498 = vmatprep.mubr.bf16.mxu0 %v9662_v23  ;;  %v964_v23 = vsel %vm920_vm3, %v9647_v17, %v963_v34  ;;  %v1136_v17 = vsel %vm1133_vm2, %v1134_v15, %v1135_v42  ;;  %v4217_v34 = vrot.slane %v4215_v11, 3  ;;  %v9200_v15 = vld [vmem:[%s10902_s2 + $0x150] sm:$0xff]   ;;  %v9211_v5 = vld [vmem:[%s10902_s2 + $0x578] sm:$0xff]   ;;  %v10023_v11 = vrot.slane %v9803_v51, 3 }
  0x8c   : > { %8121 = vmatpush3.bf16.msra.mxu1 %v9182_v27  ;;  %v1138_v27 = vsel %vm1133_vm2, %v1135_v42, %v1137_v4  ;;  %v4210_v42 = vsel %vm1306_vm5, %v9941_v59, %v4209_v55 }
  0x8d   : > { %8505 = vmatpush3.bf16.msra.mxu0 %v9183_v28  ;;  %8122 = vmatprep.subr.bf16.mxu1 %v9184_v39  ;;  %v9199_v28 = vld [vmem:[%s10902_s2 + $0x548] sm:$0xff]   ;;  %v4218_v52 = vor.u32 %v4217_v34, %v4214_v33  ;;  %v1492_v33 = vld [vmem:[#allocation2] sm:$0xf8]  ;;  %v1521_v34 = vrot.slane %v9832_v8, 3 }
  0x8e   : > { %8506 = vmatprep.subr.bf16.mxu0 %v9185_v25 }
  0x8f   : > { %8115 = vmatmul.mubr.bf16.gmra.mrb[4].mxu1 %v964_v23  ;;  %v9201_v23 = vld [vmem:[%s10902_s2 + $0x550] sm:$0xff]  }
  0x90   : > { %8123 = vmatpush3.bf16.msra.mxu1 %v9184_v39  ;;  %8499 = vmatmul.mubr.bf16.gmra.mrb[4].mxu0 %v4012_v47  ;;  %v1140_v39 = vsel %vm1133_vm2, %v1137_v4, %v1139_v19  ;;  %v1322_v47 = vor.u32 %v1321_v38, %v1318_v37  ;;  %v9210_v4 = vld [vmem:[%s10902_s2 + $0x178] sm:$0xff]  }
  0x91   : > { %8507 = vmatpush3.bf16.msra.mxu0 %v9185_v25  ;;  %8124 = vmatprep.subr.bf16.mxu1 %v9186_v21  ;;  %v1313_v25 = vrot.slane %v1311_v24, 3  ;;  %v4393_v24 = vrot.slane %v9806_v56, 3  ;;  %v9253_v56 = vld [vmem:[%s10902_s2 + $0x620] sm:$0xff]  }
  0x92   : > { %8508 = vmatprep.subr.bf16.mxu0 %v9187_v14  ;;  %8134 = vmatprep.mubr.bf16.mxu1 %v1136_v17  ;;  %v9983_v17 = vrot.slane %v9794_v3, 3  ;;  %v1332_v20 = vsel %vm1306_vm5, %v1322_v47, %v9880_v46  ;;  %v4365_v46 = vld [vmem:[#allocation2 + $0x28] sm:$0x7] }
  0x93   : > { %8518 = vmatprep.mubr.bf16.mxu0 %v4192_v40  ;;  %v1314_v22 = vor.u32 %v1313_v25, %v1310_v41  ;;  %v9202_v40 = vld [vmem:[%s10902_s2 + $0x158] sm:$0xff]   ;;  %v9216_v25 = vld [vmem:[%s10902_s2 + $0x190] sm:$0xff]   ;;  %v9238_v3 = vld [vmem:[%s10902_s2 + $0x1e8] sm:$0xff]  }
  0x94   : > { %8125 = vmatpush3.bf16.msra.mxu1 %v9186_v21  ;;  %v1141_v21 = vrot.slane %v1110_v31, 2  ;;  %v10034_v51 = vsel %vm1519_vm7, %v9983_v17, %v10023_v11  ;;  %v9215_v31 = vld [vmem:[%s10902_s2 + $0x588] sm:$0xff]  }
  0x95   : > { %8509 = vmatpush3.bf16.msra.mxu0 %v9187_v14  ;;  %8126 = vmatprep.subr.bf16.mxu1 %v9188_v63 }
  0x96   : > { %8510 = vmatprep.subr.bf16.mxu0 %v9189_v48  ;;  %v1142_v14 = vsel %vm1133_vm2, %v1139_v19, %v1141_v21  ;;  %v4561_v19 = vshrl.u32 %v4538_v57, 16  ;;  %v1520_v21 = vrot.slane %v1492_v33, 3 }
  0x98   : > { %8127 = vmatpush3.bf16.msra.mxu1 %v9188_v63  ;;  %v4388_v63 = vrot.slane %v4361_v12, 3  ;;  %v4563_v37 = vrot.slane %v4561_v19, 3 }
  0x99   : > { %8511 = vmatpush3.bf16.msra.mxu0 %v9189_v48  ;;  %8128 = vmatprep.subr.bf16.mxu1 %v9190_v50  ;;  %v4219_v48 = vsel %vm1306_vm5, %v4209_v55, %v4218_v52  ;;  %v9214_v55 = vld [vmem:[%s10902_s2 + $0x188] sm:$0xff]  }
  0x9a   : > { %8512 = vmatprep.subr.bf16.mxu0 %v9191_v54 }
  0x9c   : > { %8129 = vmatpush3.bf16.msra.mxu1 %v9190_v50  ;;  %v1323_v50 = vsel %vm1306_vm5, %v1314_v22, %v1322_v47  ;;  %v9219_v22 = vld [vmem:[%s10902_s2 + $0x598] sm:$0xff]  }
  0x9d   : > { %8513 = vmatpush3.bf16.msra.mxu0 %v9191_v54  ;;  %8130 = vmatprep.subr.bf16.mxu1 %v9192_v36  ;;  %v4390_v54 = vsel %vm1519_vm7, %v4388_v63, %v9983_v17  ;;  %v9221_v63 = vld [vmem:[%s10902_s2 + $0x5a0] sm:$0xff]  }
  0x9e   : > { %8514 = vmatprep.subr.bf16.mxu0 %v9193_v13 }
  0xa0   : > { %8131 = vmatpush3.bf16.msra.mxu1 %v9192_v36  ;;  %v9204_v36 = vld [vmem:[%s10902_s2 + $0x160] sm:$0xff]  }
  0xa1   : > { %8515 = vmatpush3.bf16.msra.mxu0 %v9193_v13  ;;  %8132 = vmatprep.subr.bf16.mxu1 %v9194_v43  ;;  %v9205_v13 = vld [vmem:[%s10902_s2 + $0x560] sm:$0xff]  }
  0xa2   : > { %8516 = vmatprep.subr.bf16.mxu0 %v9195_v58 }
  0xa4   : > { %8133 = vmatpush3.bf16.msra.mxu1 %v9194_v43  ;;  %v9206_v43 = vld [vmem:[%s10902_s2 + $0x168] sm:$0xff]  }
  0xa5   : > { %8517 = vmatpush3.bf16.msra.mxu0 %v9195_v58  ;;  %8142 = vmatprep.subr.bf16.mxu1 %v9196_v7  ;;  %v9207_v58 = vld [vmem:[%s10902_s2 + $0x568] sm:$0xff]  }
  0xa6   : > { %8526 = vmatprep.subr.bf16.mxu0 %v9197_v61 }
  0xa7   : > { %8135 = vmatmul.mubr.bf16.vlgmr.msra.gmra.mrb[0].mxu1 %v1138_v27  ;;  %v1345_v27 = vrot.slane %v1343_v6, 2 }
  0xa8   : > { %8143 = vmatpush3.bf16.msra.mxu1 %v9196_v7  ;;  %8519 = vmatmul.mubr.bf16.vlgmr.msra.gmra.mrb[0].mxu0 %v9965_v32  ;;  %v1346_v7 = vshll.u32 %v1288_v0, 16 }
  0xa9   : > { %8527 = vmatpush3.bf16.msra.mxu0 %v9197_v61  ;;  %8144 = vmatprep.subr.bf16.mxu1 %v9198_v1  ;;  %v9213_v61 = vld [vmem:[%s10902_s2 + $0x580] sm:$0xff]  }
  0xaa   : > { %8528 = vmatprep.subr.bf16.mxu0 %v9199_v28  ;;  %8138 = vmatprep.mubr.bf16.mxu1 %v1140_v39  ;;  %v4394_v39 = vsel %vm1519_vm7, %v10023_v11, %v4393_v24 }
  0xab   : > { %8522 = vmatprep.mubr.bf16.mxu0 %v4210_v42  ;;  %v4395_v42 = vrot.slane %v4365_v46, 3 }
  0xac   : > { %8145 = vmatpush3.bf16.msra.mxu1 %v9198_v1  ;;  %v4564_v1 = vshll.u32 %v4538_v57, 16  ;;  %v10097_v57 = vld [vmem:[#allocation2 + $0x10] sm:$0xff] }
  0xad   : > { %8529 = vmatpush3.bf16.msra.mxu0 %v9199_v28  ;;  %8146 = vmatprep.subr.bf16.mxu1 %v9200_v15  ;;  %v1348_v28 = vrot.slane %v1346_v7, 3  ;;  %v4396_v47 = vsel %vm1519_vm7, %v4393_v24, %v4395_v42  ;;  %v4745_v24 = vld [vmem:[#allocation2 + $0x8] sm:$0xf0]  ;;  %v9234_v42 = vld [vmem:[%s10902_s2 + $0x1d8] sm:$0xff]  }
  0xae   : > { %8530 = vmatprep.subr.bf16.mxu0 %v9201_v23  ;;  %v4566_v38 = vrot.slane %v4564_v1, 4 }
  0xaf   : > { %8139 = vmatmul.mubr.bf16.gmra.mrb[4].mxu1 %v1142_v14  ;;  %v1349_v41 = vor.u32 %v1348_v28, %v1345_v27  ;;  %v9220_v14 = vld [vmem:[%s10902_s2 + $0x1a0] sm:$0xff]   ;;  %v10106_v27 = vld [vmem:[#allocation2 + $0x8] sm:$0xff] }
  0xb0   : > { %8147 = vmatpush3.bf16.msra.mxu1 %v9200_v15  ;;  %8523 = vmatmul.mubr.bf16.gmra.mrb[4].mxu0 %v4219_v48  ;;  %v9217_v15 = vld [vmem:[%s10902_s2 + $0x590] sm:$0xff]   ;;  %v4567_v12 = vor.u32 %v4566_v38, %v4563_v37  ;;  %v9231_v28 = vld [vmem:[%s10902_s2 + $0x5c8] sm:$0xff]   ;;  %v2293_v8 = vrot.slane %v10106_v27, 5 }
  0xb1   : > { %8531 = vmatpush3.bf16.msra.mxu0 %v9201_v23  ;;  %8148 = vmatprep.subr.bf16.mxu1 %v9202_v40  ;;  %v1350_v52 = vsel %vm1306_vm5, %v9941_v59, %v1349_v41  ;;  %v9218_v23 = vld [vmem:[%s10902_s2 + $0x198] sm:$0xff]   ;;  %v9224_v48 = vld [vmem:[%s10902_s2 + $0x1b0] sm:$0xff]   ;;  %v4772_v41 = vrot.slane %v4745_v24, 4 }
  0xb2   : > { %8532 = vmatprep.subr.bf16.mxu0 %v9203_v29  ;;  %8158 = vmatprep.mubr.bf16.mxu1 %v1323_v50  ;;  %v4576_v59 = vsel %vm1692_vm4, %v4567_v12, %v9820_v2  ;;  %v9222_v2 = vld [vmem:[%s10902_s2 + $0x1a8] sm:$0xff]   ;;  %v9232_v37 = vld [vmem:[%s10902_s2 + $0x1d0] sm:$0xff]  }
  0xb3   : > { %8542 = vmatprep.mubr.bf16.mxu0 %v4390_v54  ;;  %v4542_v50 = vld [vmem:[#allocation2 + $0x28] sm:$0xf]  ;;  %v1670_v54 = vld [vmem:[#allocation2] sm:$0xf8]  ;;  %v9233_v38 = vld [vmem:[%s10902_s2 + $0x5d0] sm:$0xff]  }
  0xb4   : > { %8149 = vmatpush3.bf16.msra.mxu1 %v9202_v40  ;;  %v9223_v40 = vld [vmem:[%s10902_s2 + $0x5a8] sm:$0xff]   ;;  %v1697_v0 = vshll.u32 %v1670_v54, 16  ;;  %v9241_v12 = vld [vmem:[%s10902_s2 + $0x5f0] sm:$0xff]  }
  0xb5   : > { %8533 = vmatpush3.bf16.msra.mxu0 %v9203_v29  ;;  %8150 = vmatprep.subr.bf16.mxu1 %v9204_v36  ;;  %v9225_v29 = vld [vmem:[%s10902_s2 + $0x5b0] sm:$0xff]  }
  0xb6   : > { %8534 = vmatprep.subr.bf16.mxu0 %v9205_v13 }
  0xb8   : > { %8151 = vmatpush3.bf16.msra.mxu1 %v9204_v36  ;;  %v9226_v36 = vld [vmem:[%s10902_s2 + $0x1b8] sm:$0xff]  }
  0xb9   : > { %8535 = vmatpush3.bf16.msra.mxu0 %v9205_v13  ;;  %8152 = vmatprep.subr.bf16.mxu1 %v9206_v43  ;;  %v9227_v13 = vld [vmem:[%s10902_s2 + $0x5b8] sm:$0xff]  }
  0xba   : > { %8536 = vmatprep.subr.bf16.mxu0 %v9207_v58 }
  0xbc   : > { %8153 = vmatpush3.bf16.msra.mxu1 %v9206_v43  ;;  %v1496_v43 = vld [vmem:[#allocation2 + $0x20] sm:$0x7] }
  0xbd   : > { %8537 = vmatpush3.bf16.msra.mxu0 %v9207_v58  ;;  %8154 = vmatprep.subr.bf16.mxu1 %v9208_v60  ;;  %v4596_v58 = vshrl.u32 %v4542_v50, 16  ;;  %v1527_v6 = vrot.slane %v1496_v43, 3 }
  0xbe   : > { %8538 = vmatprep.subr.bf16.mxu0 %v9209_v62 }
  0xbf   : > { %v4598_v7 = vrot.slane %v4596_v58, 3 }
  0xc0   : > { %8155 = vmatpush3.bf16.msra.mxu1 %v9208_v60  ;;  %v4599_v60 = vshll.u32 %v4542_v50, 16  ;;  %v9245_v50 = vld [vmem:[%s10902_s2 + $0x600] sm:$0xff]  }
  0xc1   : > { %8539 = vmatpush3.bf16.msra.mxu0 %v9209_v62  ;;  %8156 = vmatprep.subr.bf16.mxu1 %v9210_v4  ;;  %v1694_v62 = vshrl.u32 %v1670_v54, 16  ;;  %v2088_v54 = vshrl.u32 %v10106_v27, 16 }
  0xc2   : > { %8540 = vmatprep.subr.bf16.mxu0 %v9211_v5  ;;  %v4601_v19 = vrot.slane %v4599_v60, 4 }
  0xc3   : > { %v1696_v1 = vrot.slane %v1694_v62, 3  ;;  %v2476_v62 = vrot.slane %v2088_v54, 5 }
  0xc4   : > { %8157 = vmatpush3.bf16.msra.mxu1 %v9210_v4  ;;  %v9228_v4 = vld [vmem:[%s10902_s2 + $0x1c0] sm:$0xff]  }
  0xc5   : > { %8541 = vmatpush3.bf16.msra.mxu0 %v9211_v5  ;;  %8166 = vmatprep.subr.bf16.mxu1 %v9212_v10  ;;  %v9229_v5 = vld [vmem:[%s10902_s2 + $0x5c0] sm:$0xff]  }
  0xc6   : > { %8550 = vmatprep.subr.bf16.mxu0 %v9213_v61 }
  0xc7   : > { %8159 = vmatmul.mubr.bf16.vlgmr.msra.gmra.mrb[0].mxu1 %v1332_v20  ;;  %v1699_v20 = vrot.slane %v1697_v0, 4 }
  0xc8   : > { %8167 = vmatpush3.bf16.msra.mxu1 %v9212_v10  ;;  %8543 = vmatmul.mubr.bf16.vlgmr.msra.gmra.mrb[0].mxu0 %v10034_v51  ;;  %v9230_v10 = vld [vmem:[%s10902_s2 + $0x1c8] sm:$0xff]  }
  0xc9   : > { %8551 = vmatpush3.bf16.msra.mxu0 %v9213_v61  ;;  %8168 = vmatprep.subr.bf16.mxu1 %v9214_v55  ;;  %v1524_v61 = vsel %vm1519_vm7, %v1521_v34, %v9983_v17  ;;  %v5335_v17 = vrot.slane %v10097_v57, 6 }
  0xca   : > { %8552 = vmatprep.subr.bf16.mxu0 %v9215_v31  ;;  %8162 = vmatprep.mubr.bf16.mxu1 %v9965_v32  ;;  %v1522_v32 = vsel %vm1519_vm7, %v1520_v21, %v1521_v34  ;;  %v9235_v21 = vld [vmem:[%s10902_s2 + $0x5d8] sm:$0xff]  }
  0xcb   : > { %8546 = vmatprep.mubr.bf16.mxu0 %v4394_v39  ;;  %v4602_v39 = vor.u32 %v4601_v19, %v4598_v7  ;;  %v9246_v19 = vld [vmem:[%s10902_s2 + $0x208] sm:$0xff]  }
  0xcc   : > { %8169 = vmatpush3.bf16.msra.mxu1 %v9214_v55  ;;  %v10112_v55 = vrot.slane %v10097_v57, 5 }
  0xcd   : > { %8553 = vmatpush3.bf16.msra.mxu0 %v9215_v31  ;;  %8170 = vmatprep.subr.bf16.mxu1 %v9216_v25  ;;  %v10114_v31 = vld [vmem:[#allocation2 + $0x18] sm:$0xff] }
  0xce   : > { %8554 = vmatprep.subr.bf16.mxu0 %v9217_v15  ;;  %v5337_v46 = vrot.slane %v10114_v31, 6  ;;  %v10123_v33 = vsel %vm2291_vm8, %v2293_v8, %v10112_v55  ;;  %v10203_v60 = vshrl.u32 %v10114_v31, 16  ;;  %v10210_v7 = vshll.u32 %v10114_v31, 16 }
  0xcf   : > { %8163 = vmatmul.mubr.bf16.gmra.mrb[4].mxu1 %v1350_v52  ;;  %v9236_v52 = vld [vmem:[%s10902_s2 + $0x1e0] sm:$0xff]  }
  0xd0   : > { %8171 = vmatpush3.bf16.msra.mxu1 %v9216_v25  ;;  %8547 = vmatmul.mubr.bf16.gmra.mrb[4].mxu0 %v4396_v47  ;;  %v10129_v34 = vsel %vm5333_vm9, %v5335_v17, %v5337_v46  ;;  %v1700_v25 = vor.u32 %v1699_v20, %v1696_v1  ;;  %v9242_v47 = vld [vmem:[%s10902_s2 + $0x1f8] sm:$0xff]   ;;  %v4922_v1 = vld [vmem:[#allocation2 + $0x8] sm:$0xe0] }
  0xd1   : > { %8555 = vmatpush3.bf16.msra.mxu0 %v9217_v15  ;;  %8172 = vmatprep.subr.bf16.mxu1 %v9218_v23  ;;  %v1528_v15 = vsel %vm1519_vm7, %v10023_v11, %v1527_v6  ;;  %v4774_v11 = vsel %vm1905_vm6, %v4772_v41, %v4773_v18  ;;  %v9240_v18 = vld [vmem:[%s10902_s2 + $0x1f0] sm:$0xff]   ;;  %v1878_v6 = vld [vmem:[#allocation2] sm:$0xf0] }
  0xd2   : > { %8556 = vmatprep.subr.bf16.mxu0 %v9219_v22  ;;  %8182 = vmatprep.mubr.bf16.mxu1 %v1522_v32  ;;  %v10178_v32 = vshrl.u32 %v10097_v57, 16 }
  0xd3   : > { %8566 = vmatprep.mubr.bf16.mxu0 %v4576_v59  ;;  %v10181_v59 = vshll.u32 %v10097_v57, 16 }
  0xd4   : > { %8173 = vmatpush3.bf16.msra.mxu1 %v9218_v23  ;;  %v1674_v23 = vld [vmem:[#allocation2 + $0x20] sm:$0xf] }
  0xd5   : > { %8557 = vmatpush3.bf16.msra.mxu0 %v9219_v22  ;;  %8174 = vmatprep.subr.bf16.mxu1 %v9220_v14  ;;  %v10172_v22 = vld [vmem:[#allocation2 + $0x20] sm:$0xff]  ;;  %v5135_v43 = vrot.slane %v10181_v59, 6 }
  0xd6   : > { %8558 = vmatprep.subr.bf16.mxu0 %v9221_v63 }
  0xd8   : > { %8175 = vmatpush3.bf16.msra.mxu1 %v9220_v14  ;;  %v5339_v14 = vrot.slane %v10172_v22, 6 }
  0xd9   : > { %8559 = vmatpush3.bf16.msra.mxu0 %v9221_v63  ;;  %8176 = vmatprep.subr.bf16.mxu1 %v9222_v2  ;;  %v9243_v63 = vld [vmem:[%s10902_s2 + $0x5f8] sm:$0xff]  }
  0xda   : > { %8560 = vmatprep.subr.bf16.mxu0 %v9223_v40 }
  0xdc   : > { %8177 = vmatpush3.bf16.msra.mxu1 %v9222_v2  ;;  %v1729_v2 = vshrl.u32 %v1674_v23, 16 }
  0xdd   : > { %8561 = vmatpush3.bf16.msra.mxu0 %v9223_v40  ;;  %8178 = vmatprep.subr.bf16.mxu1 %v9224_v48  ;;  %v10190_v40 = vsel %vm5333_vm9, %v5337_v46, %v5339_v14  ;;  %v9247_v46 = vld [vmem:[%s10902_s2 + $0x608] sm:$0xff]  }
  0xde   : > { %8562 = vmatprep.subr.bf16.mxu0 %v9225_v29  ;;  %v1731_v58 = vrot.slane %v1729_v2, 3 }
  0xe0   : > { %8179 = vmatpush3.bf16.msra.mxu1 %v9224_v48  ;;  %v1732_v48 = vshll.u32 %v1674_v23, 16  ;;  %v5151_v23 = vshll.u32 %v10172_v22, 16 }
  0xe1   : > { %8563 = vmatpush3.bf16.msra.mxu0 %v9225_v29  ;;  %8180 = vmatprep.subr.bf16.mxu1 %v9226_v36  ;;  %v9244_v29 = vld [vmem:[%s10902_s2 + $0x200] sm:$0xff]  }
  0xe2   : > { %8564 = vmatprep.subr.bf16.mxu0 %v9227_v13 }
  0xe4   : > { %8181 = vmatpush3.bf16.msra.mxu1 %v9226_v36  ;;  %v2091_v36 = vshll.u32 %v10106_v27, 16 }
  0xe5   : > { %8565 = vmatpush3.bf16.msra.mxu0 %v9227_v13  ;;  %8190 = vmatprep.subr.bf16.mxu1 %v9228_v4  ;;  %v5132_v13 = vrot.slane %v10178_v32, 5 }
  0xe6   : > { %8574 = vmatprep.subr.bf16.mxu0 %v9229_v5  ;;  %v2479_v0 = vrot.slane %v2091_v36, 6 }
  0xe7   : > { %8183 = vmatmul.mubr.bf16.vlgmr.msra.gmra.mrb[0].mxu1 %v1524_v61  ;;  %v5520_v61 = vrot.slane %v10181_v59, 7  ;;  %v10217_v20 = vor.u32 %v5135_v43, %v5132_v13  ;;  %v5099_v13 = vld [vmem:[#allocation2 + $0x8] sm:$0xe0] }
  0xe8   : > { %8191 = vmatpush3.bf16.msra.mxu1 %v9228_v4  ;;  %8567 = vmatmul.mubr.bf16.vlgmr.msra.gmra.mrb[0].mxu0 %v9868_v35  ;;  %v1734_v4 = vrot.slane %v1732_v48, 4  ;;  %v10219_v24 = vor.u32 %v2479_v0, %v2476_v62  ;;  %v5538_v48 = vrot.slane %v5151_v23, 7  ;;  %v1909_v62 = vrot.slane %v10097_v57, 4  ;;  %v9286_v57 = vld [vmem:[%s10902_s2 + $0x2a8] sm:$0xff]  }
  0xe9   : > { %8575 = vmatpush3.bf16.msra.mxu0 %v9229_v5  ;;  %8192 = vmatprep.subr.bf16.mxu1 %v9230_v10  ;;  %v4749_v5 = vld [vmem:[#allocation2 + $0x28] sm:$0xf]  ;;  %v10302_v0 = vrot.slane %v10114_v31, 5 }
  0xea   : > { %8576 = vmatprep.subr.bf16.mxu0 %v9231_v28  ;;  %8186 = vmatprep.mubr.bf16.mxu1 %v10034_v51  ;;  %v4603_v51 = vsel %vm1692_vm4, %v9840_v16, %v4602_v39  ;;  %v9237_v16 = vld [vmem:[%s10902_s2 + $0x5e0] sm:$0xff]   ;;  %v9248_v39 = vld [vmem:[%s10902_s2 + $0x210] sm:$0xff]   ;;  %v10235_v41 = vsel %vm2464_vm10, %v10219_v24, %v10217_v20 }
  0xeb   : > { %8570 = vmatprep.mubr.bf16.mxu0 %v9873_v45  ;;  %v1709_v45 = vsel %vm1692_vm4, %v1700_v25, %v9852_v30  ;;  %v9239_v30 = vld [vmem:[%s10902_s2 + $0x5e8] sm:$0xff]   ;;  %v9249_v25 = vld [vmem:[%s10902_s2 + $0x610] sm:$0xff]  }
  0xec   : > { %8193 = vmatpush3.bf16.msra.mxu1 %v9230_v10  ;;  %v5517_v10 = vrot.slane %v10178_v32, 6 }
  0xed   : > { %8577 = vmatpush3.bf16.msra.mxu0 %v9231_v28  ;;  %8194 = vmatprep.subr.bf16.mxu1 %v9232_v37  ;;  %v5526_v28 = vrot.slane %v10203_v60, 6 }
  0xee   : > { %8578 = vmatprep.subr.bf16.mxu0 %v9233_v38 }
  0xef   : > { %8187 = vmatmul.mubr.bf16.gmra.mrb[4].mxu1 %v1528_v15  ;;  %v1735_v15 = vor.u32 %v1734_v4, %v1731_v58  ;;  %v9260_v4 = vld [vmem:[%s10902_s2 + $0x240] sm:$0xff]  }
  0xf0   : > { %8195 = vmatpush3.bf16.msra.mxu1 %v9232_v37  ;;  %8571 = vmatmul.mubr.bf16.gmra.mrb[4].mxu0 %v4603_v51  ;;  %v10225_v37 = vor.u32 %v5520_v61, %v5517_v10  ;;  %v1907_v51 = vrot.slane %v10106_v27, 4  ;;  %v9261_v61 = vld [vmem:[%s10902_s2 + $0x640] sm:$0xff]   ;;  %v9287_v27 = vld [vmem:[%s10902_s2 + $0x6a8] sm:$0xff]  }
  0xf1   : > { %8579 = vmatpush3.bf16.msra.mxu0 %v9233_v38  ;;  %8196 = vmatprep.subr.bf16.mxu1 %v9234_v42  ;;  %v5529_v38 = vrot.slane %v10210_v7, 7 }
  0xf2   : > { %8580 = vmatprep.subr.bf16.mxu0 %v9235_v21  ;;  %8206 = vmatprep.mubr.bf16.mxu1 %v1709_v45  ;;  %v4949_v45 = vrot.slane %v4922_v1, 5  ;;  %v5125_v1 = vshll.u32 %v5099_v13, 16 }
  0xf3   : > { %8590 = vmatprep.mubr.bf16.mxu0 %v4774_v11 }
  0xf4   : > { %8197 = vmatpush3.bf16.msra.mxu1 %v9234_v42  ;;  %v5530_v42 = vor.u32 %v5529_v38, %v5526_v28  ;;  %v1911_v28 = vrot.slane %v10114_v31, 4  ;;  %v10317_v38 = vsel %vm2291_vm8, %v10112_v55, %v10302_v0  ;;  %v4954_v31 = vrot.slane %v10172_v22, 5 }
  0xf5   : > { %8581 = vmatpush3.bf16.msra.mxu0 %v9235_v21  ;;  %8198 = vmatprep.subr.bf16.mxu1 %v9236_v52  ;;  %v1906_v21 = vrot.slane %v1878_v6, 4 }
  0xf6   : > { %8582 = vmatprep.subr.bf16.mxu0 %v9237_v16  ;;  %v10245_v11 = vsel %vm2672_vm11, %v10225_v37, %v5530_v42 }
  0xf8   : > { %8199 = vmatpush3.bf16.msra.mxu1 %v9236_v52  ;;  %v9250_v52 = vld [vmem:[%s10902_s2 + $0x218] sm:$0xff]  }
  0xf9   : > { %8583 = vmatpush3.bf16.msra.mxu0 %v9237_v16  ;;  %8200 = vmatprep.subr.bf16.mxu1 %v9238_v3 }
  0xfa   : > { %8584 = vmatprep.subr.bf16.mxu0 %v9239_v30 }
  0xfc   : > { %8201 = vmatpush3.bf16.msra.mxu1 %v9238_v3  ;;  %v9252_v3 = vld [vmem:[%s10902_s2 + $0x220] sm:$0xff]  }
  0xfd   : > { %8585 = vmatpush3.bf16.msra.mxu0 %v9239_v30  ;;  %8202 = vmatprep.subr.bf16.mxu1 %v9240_v18  ;;  %v9255_v30 = vld [vmem:[%s10902_s2 + $0x628] sm:$0xff]  }
  0xfe   : > { %8586 = vmatprep.subr.bf16.mxu0 %v9241_v12 }
 0x100   : > { %8203 = vmatpush3.bf16.msra.mxu1 %v9240_v18  ;;  %v9256_v18 = vld [vmem:[%s10902_s2 + $0x230] sm:$0xff]  }
 0x101   : > { %8587 = vmatpush3.bf16.msra.mxu0 %v9241_v12  ;;  %8204 = vmatprep.subr.bf16.mxu1 %v9242_v47  ;;  %v5148_v12 = vshrl.u32 %v10172_v22, 16  ;;  %v9300_v22 = vld [vmem:[%s10902_s2 + $0x2e0] sm:$0xff]  }
 0x102   : > { %8588 = vmatprep.subr.bf16.mxu0 %v9243_v63 }
 0x103   : > { %v5535_v2 = vrot.slane %v5148_v12, 6 }
 0x104   : > { %8205 = vmatpush3.bf16.msra.mxu1 %v9242_v47  ;;  %v9257_v47 = vld [vmem:[%s10902_s2 + $0x630] sm:$0xff]  }
 0x105   : > { %8589 = vmatpush3.bf16.msra.mxu0 %v9243_v63  ;;  %8214 = vmatprep.subr.bf16.mxu1 %v9244_v29  ;;  %v9258_v63 = vld [vmem:[%s10902_s2 + $0x238] sm:$0xff]   ;;  %v10294_v43 = vor.u32 %v5538_v48, %v5535_v2  ;;  %v9268_v2 = vld [vmem:[%s10902_s2 + $0x260] sm:$0xff]  }
 0x106   : > { %8598 = vmatprep.subr.bf16.mxu0 %v9245_v50  ;;  %v9269_v48 = vld [vmem:[%s10902_s2 + $0x660] sm:$0xff]  }
 0x107   : > { %8207 = vmatmul.mubr.bf16.vlgmr.msra.gmra.mrb[0].mxu1 %v9912_v53  ;;  %v4779_v53 = vrot.slane %v4749_v5, 4  ;;  %v10298_v58 = vsel %vm2672_vm11, %v5530_v42, %v10294_v43  ;;  %v1882_v5 = vld [vmem:[#allocation2 + $0x20] sm:$0xf]  ;;  %v4926_v42 = vld [vmem:[#allocation2 + $0x28] sm:$0x1f] }
 0x108   : > { %8215 = vmatpush3.bf16.msra.mxu1 %v9244_v29  ;;  %8591 = vmatmul.mubr.bf16.vlgmr.msra.gmra.mrb[0].mxu0 %v9904_v49  ;;  %v1736_v49 = vsel %vm1692_vm4, %v9834_v9, %v1735_v15  ;;  %v1908_v9 = vsel %vm1905_vm6, %v1906_v21, %v1907_v51  ;;  %v9259_v29 = vld [vmem:[%s10902_s2 + $0x638] sm:$0xff]   ;;  %v1913_v15 = vrot.slane %v1882_v5, 4  ;;  %v2102_v5 = vrot.slane %v10181_v59, 5 }
 0x109   : > { %8599 = vmatpush3.bf16.msra.mxu0 %v9245_v50  ;;  %8216 = vmatprep.subr.bf16.mxu1 %v9246_v19  ;;  %v4780_v16 = vsel %vm1905_vm6, %v4777_v44, %v4779_v53  ;;  %v9254_v44 = vld [vmem:[%s10902_s2 + $0x228] sm:$0xff]   ;;  %v2056_v50 = vld [vmem:[#allocation2] sm:$0xf0]  ;;  %v2108_v59 = vrot.slane %v10203_v60, 4 }
 0x10a   : > { %8600 = vmatprep.subr.bf16.mxu0 %v9247_v46  ;;  %8210 = vmatprep.mubr.bf16.mxu1 %v9868_v35  ;;  %v9251_v35 = vld [vmem:[%s10902_s2 + $0x618] sm:$0xff]   ;;  %v2080_v6 = vshrl.u32 %v2056_v50, 16  ;;  %v2083_v10 = vshll.u32 %v2056_v50, 16  ;;  %v9271_v50 = vld [vmem:[%s10902_s2 + $0x668] sm:$0xff]  }
 0x10b   : > { %8594 = vmatprep.mubr.bf16.mxu0 %v9954_v26  ;;  %v4951_v26 = vsel %vm2291_vm8, %v4949_v45, %v10112_v55  ;;  %v2090_v55 = vrot.slane %v2088_v54, 4  ;;  %v9264_v54 = vld [vmem:[%s10902_s2 + $0x250] sm:$0xff]  }
 0x10c   : > { %8217 = vmatpush3.bf16.msra.mxu1 %v9246_v19  ;;  %v5122_v19 = vshrl.u32 %v5099_v13, 16  ;;  %v2082_v53 = vrot.slane %v2080_v6, 4  ;;  %v2085_v21 = vrot.slane %v2083_v10, 5  ;;  %v9272_v13 = vld [vmem:[%s10902_s2 + $0x270] sm:$0xff]   ;;  %v9274_v6 = vld [vmem:[%s10902_s2 + $0x278] sm:$0xff]   ;;  %v5141_v10 = vrot.slane %v10203_v60, 5 }
 0x10d   : > { %8601 = vmatpush3.bf16.msra.mxu0 %v9247_v46  ;;  %8218 = vmatprep.subr.bf16.mxu1 %v9248_v39  ;;  %v1910_v46 = vsel %vm1905_vm6, %v1907_v51, %v1909_v62  ;;  %v2093_v51 = vrot.slane %v2091_v36, 5  ;;  %v9265_v36 = vld [vmem:[%s10902_s2 + $0x650] sm:$0xff]  }
 0x10e   : > { %8602 = vmatprep.subr.bf16.mxu0 %v9249_v25  ;;  %v5124_v45 = vrot.slane %v5122_v19, 5  ;;  %v2060_v19 = vld [vmem:[#allocation2 + $0x20] sm:$0x1f] }
 0x10f   : > { %8211 = vmatmul.mubr.bf16.gmra.mrb[4].mxu1 %v1736_v49  ;;  %v5127_v49 = vrot.slane %v5125_v1, 6  ;;  %v9275_v1 = vld [vmem:[%s10902_s2 + $0x678] sm:$0xff]  }
 0x110   : > { %8219 = vmatpush3.bf16.msra.mxu1 %v9248_v39  ;;  %8595 = vmatmul.mubr.bf16.gmra.mrb[4].mxu0 %v4780_v16  ;;  %v9262_v39 = vld [vmem:[%s10902_s2 + $0x248] sm:$0xff]   ;;  %v4956_v16 = vrot.slane %v4926_v42, 5  ;;  %v9276_v42 = vld [vmem:[%s10902_s2 + $0x280] sm:$0xff]  }
 0x111   : > { %8603 = vmatpush3.bf16.msra.mxu0 %v9249_v25  ;;  %8220 = vmatprep.subr.bf16.mxu1 %v9250_v52  ;;  %v9263_v25 = vld [vmem:[%s10902_s2 + $0x648] sm:$0xff]  }
 0x112   : > { %8604 = vmatprep.subr.bf16.mxu0 %v9251_v35  ;;  %8230 = vmatprep.mubr.bf16.mxu1 %v1908_v9  ;;  %v2086_v9 = vor.u32 %v2085_v21, %v2082_v53 }
 0x113   : > { %8614 = vmatprep.mubr.bf16.mxu0 %v4951_v26  ;;  %v10340_v26 = vor.u32 %v2093_v51, %v2090_v55 }
 0x114   : > { %8221 = vmatpush3.bf16.msra.mxu1 %v9250_v52  ;;  %v1912_v52 = vsel %vm1905_vm6, %v1909_v62, %v1911_v28  ;;  %v9273_v62 = vld [vmem:[%s10902_s2 + $0x670] sm:$0xff]  }
 0x115   : > { %8605 = vmatpush3.bf16.msra.mxu0 %v9251_v35  ;;  %8222 = vmatprep.subr.bf16.mxu1 %v9252_v3  ;;  %v4955_v35 = vsel %vm2291_vm8, %v10302_v0, %v4954_v31 }
 0x116   : > { %8606 = vmatprep.subr.bf16.mxu0 %v9253_v56 }
 0x118   : > { %8223 = vmatpush3.bf16.msra.mxu1 %v9252_v3  ;;  %v1914_v3 = vsel %vm1905_vm6, %v1911_v28, %v1913_v15  ;;  %v2118_v15 = vshll.u32 %v2060_v19, 16 }
 0x119   : > { %8607 = vmatpush3.bf16.msra.mxu0 %v9253_v56  ;;  %8224 = vmatprep.subr.bf16.mxu1 %v9254_v44  ;;  %v5128_v56 = vor.u32 %v5127_v49, %v5124_v45 }
 0x11a   : > { %8608 = vmatprep.subr.bf16.mxu0 %v9255_v30  ;;  %v2120_v45 = vrot.slane %v2118_v15, 5  ;;  %v5310_v15 = vld [vmem:[#allocation2 + $0x28] sm:$0x3f] }
 0x11c   : > { %8225 = vmatpush3.bf16.msra.mxu1 %v9254_v44  ;;  %v9266_v44 = vld [vmem:[%s10902_s2 + $0x258] sm:$0xff]  }
 0x11d   : > { %8609 = vmatpush3.bf16.msra.mxu0 %v9255_v30  ;;  %8226 = vmatprep.subr.bf16.mxu1 %v9256_v18  ;;  %v4957_v30 = vsel %vm2291_vm8, %v4954_v31, %v4956_v16  ;;  %v2115_v31 = vshrl.u32 %v2060_v19, 16  ;;  %v5484_v19 = vld [vmem:[#allocation2 + $0x8] sm:$0xc0] }
 0x11e   : > { %8610 = vmatprep.subr.bf16.mxu0 %v9257_v47 }
 0x11f   : > { %v2117_v51 = vrot.slane %v2115_v31, 4  ;;  %v9295_v31 = vld [vmem:[%s10902_s2 + $0x6c8] sm:$0xff]  }
 0x120   : > { %8227 = vmatpush3.bf16.msra.mxu1 %v9256_v18  ;;  %v9267_v18 = vld [vmem:[%s10902_s2 + $0x658] sm:$0xff]  }
 0x121   : > { %8611 = vmatpush3.bf16.msra.mxu0 %v9257_v47  ;;  %8228 = vmatprep.subr.bf16.mxu1 %v9258_v63  ;;  %v2095_v47 = vsel %vm2078_vm12, %v2086_v9, %v10340_v26  ;;  %v2121_v9 = vor.u32 %v2120_v45, %v2117_v51 }
 0x122   : > { %8612 = vmatprep.subr.bf16.mxu0 %v9259_v29 }
 0x124   : > { %8229 = vmatpush3.bf16.msra.mxu1 %v9258_v63  ;;  %v5137_v63 = vsel %vm2464_vm10, %v5128_v56, %v10217_v20 }
 0x125   : > { %8613 = vmatpush3.bf16.msra.mxu0 %v9259_v29  ;;  %8238 = vmatprep.subr.bf16.mxu1 %v9260_v4  ;;  %v9270_v29 = vld [vmem:[%s10902_s2 + $0x268] sm:$0xff]  }
 0x126   : > { %8622 = vmatprep.subr.bf16.mxu0 %v9261_v61 }
 0x127   : > { %8231 = vmatmul.mubr.bf16.vlgmr.msra.gmra.mrb[0].mxu1 %v1910_v46  ;;  %v2111_v46 = vrot.slane %v10210_v7, 5 }
 0x128   : > { %8239 = vmatpush3.bf16.msra.mxu1 %v9260_v4  ;;  %8615 = vmatmul.mubr.bf16.vlgmr.msra.gmra.mrb[0].mxu0 %v10317_v38  ;;  %v2099_v4 = vrot.slane %v10178_v32, 4  ;;  %v5103_v32 = vld [vmem:[#allocation2 + $0x28] sm:$0x3f] }
 0x129   : > { %8623 = vmatpush3.bf16.msra.mxu0 %v9261_v61  ;;  %8240 = vmatprep.subr.bf16.mxu1 %v9262_v39  ;;  %v5144_v61 = vrot.slane %v10210_v7, 6  ;;  %v5157_v60 = vshrl.u32 %v5103_v32, 16  ;;  %v5160_v21 = vshll.u32 %v5103_v32, 16  ;;  %v9277_v7 = vld [vmem:[%s10902_s2 + $0x680] sm:$0xff]  }
 0x12a   : > { %8624 = vmatprep.subr.bf16.mxu0 %v9263_v25  ;;  %8234 = vmatprep.mubr.bf16.mxu1 %v1912_v52  ;;  %v2103_v28 = vor.u32 %v2102_v5, %v2099_v4  ;;  %v9278_v52 = vld [vmem:[%s10902_s2 + $0x288] sm:$0xff]   ;;  %v9285_v4 = vld [vmem:[%s10902_s2 + $0x6a0] sm:$0xff]   ;;  %v9290_v5 = vld [vmem:[%s10902_s2 + $0x2b8] sm:$0xff]  }
 0x12b   : > { %8618 = vmatprep.mubr.bf16.mxu0 %v4955_v35  ;;  %v10391_v53 = vor.u32 %v5144_v61, %v5141_v10  ;;  %v5159_v35 = vrot.slane %v5157_v60, 5  ;;  %v2442_v10 = vld [vmem:[#allocation2] sm:$0xe0] }
 0x12c   : > { %8241 = vmatpush3.bf16.msra.mxu1 %v9262_v39  ;;  %v5150_v39 = vrot.slane %v5148_v12, 5  ;;  %v2112_v12 = vor.u32 %v2111_v46, %v2108_v59  ;;  %v9292_v61 = vld [vmem:[%s10902_s2 + $0x2c0] sm:$0xff]   ;;  %v2466_v32 = vshrl.u32 %v2442_v10, 16  ;;  %v5507_v59 = vshrl.u32 %v5484_v19, 16 }
 0x12d   : > { %8625 = vmatpush3.bf16.msra.mxu0 %v9263_v25  ;;  %8242 = vmatprep.subr.bf16.mxu1 %v9264_v54  ;;  %v5153_v25 = vrot.slane %v5151_v23, 6  ;;  %v2104_v23 = vsel %vm2078_vm12, %v10340_v26, %v2103_v28  ;;  %v10401_v49 = vsel %vm2464_vm10, %v10217_v20, %v10391_v53  ;;  %v2264_v26 = vld [vmem:[#allocation2] sm:$0xe0]  ;;  %v5510_v46 = vshll.u32 %v5484_v19, 16 }
 0x12e   : > { %8626 = vmatprep.subr.bf16.mxu0 %v9265_v36  ;;  %v2113_v16 = vsel %vm2078_vm12, %v2103_v28, %v2112_v12  ;;  %v2469_v28 = vshll.u32 %v2442_v10, 16 }
 0x12f   : > { %8235 = vmatmul.mubr.bf16.gmra.mrb[4].mxu1 %v1914_v3  ;;  %v5154_v55 = vor.u32 %v5153_v25, %v5150_v39  ;;  %v9280_v3 = vld [vmem:[%s10902_s2 + $0x290] sm:$0xff]   ;;  %v9294_v39 = vld [vmem:[%s10902_s2 + $0x2c8] sm:$0xff]   ;;  %v2268_v25 = vld [vmem:[#allocation2 + $0x20] sm:$0x1f] }
 0x130   : > { %8243 = vmatpush3.bf16.msra.mxu1 %v9264_v54  ;;  %8619 = vmatmul.mubr.bf16.gmra.mrb[4].mxu0 %v4957_v30  ;;  %v5162_v54 = vrot.slane %v5160_v21, 6  ;;  %v9281_v30 = vld [vmem:[%s10902_s2 + $0x690] sm:$0xff]   ;;  %v2471_v60 = vrot.slane %v2469_v28, 6  ;;  %v2299_v21 = vrot.slane %v2268_v25, 5 }
 0x131   : > { %8627 = vmatpush3.bf16.msra.mxu0 %v9265_v36  ;;  %8244 = vmatprep.subr.bf16.mxu1 %v9266_v44  ;;  %v9279_v36 = vld [vmem:[%s10902_s2 + $0x688] sm:$0xff]   ;;  %v5155_v20 = vsel %vm2464_vm10, %v10391_v53, %v5154_v55 }
 0x132   : > { %8628 = vmatprep.subr.bf16.mxu0 %v9267_v18  ;;  %8254 = vmatprep.mubr.bf16.mxu1 %v2095_v47  ;;  %v5163_v56 = vor.u32 %v5162_v54, %v5159_v35  ;;  %v2122_v47 = vsel %vm2078_vm12, %v2112_v12, %v2121_v9  ;;  %v5512_v12 = vrot.slane %v5510_v46, 7  ;;  %v2300_v51 = vsel %vm2291_vm8, %v10302_v0, %v2299_v21  ;;  %v9304_v54 = vld [vmem:[%s10902_s2 + $0x2f0] sm:$0xff]   ;;  %v9307_v9 = vld [vmem:[%s10902_s2 + $0x6f8] sm:$0xff]   ;;  %v9317_v21 = vld [vmem:[%s10902_s2 + $0x720] sm:$0xff]  }
 0x133   : > { %8638 = vmatprep.mubr.bf16.mxu0 %v5137_v63 }
 0x134   : > { %8245 = vmatpush3.bf16.msra.mxu1 %v9266_v44  ;;  %v5306_v44 = vld [vmem:[#allocation2 + $0x8] sm:$0xc0] }
 0x135   : > { %8629 = vmatpush3.bf16.msra.mxu0 %v9267_v18  ;;  %8246 = vmatprep.subr.bf16.mxu1 %v9268_v2  ;;  %v2292_v18 = vrot.slane %v2264_v26, 5  ;;  %v5334_v63 = vrot.slane %v5306_v44, 6  ;;  %v5488_v26 = vld [vmem:[#allocation2 + $0x28] sm:$0x7f]  ;;  %v2650_v44 = vld [vmem:[#allocation2] sm:$0xc0] }
 0x136   : > { %8630 = vmatprep.subr.bf16.mxu0 %v9269_v48 }
 0x138   : > { %8247 = vmatpush3.bf16.msra.mxu1 %v9268_v2  ;;  %v9282_v2 = vld [vmem:[%s10902_s2 + $0x298] sm:$0xff]  }
 0x139   : > { %8631 = vmatpush3.bf16.msra.mxu0 %v9269_v48  ;;  %8248 = vmatprep.subr.bf16.mxu1 %v9270_v29  ;;  %v5164_v48 = vsel %vm2464_vm10, %v5154_v55, %v5163_v56  ;;  %v5341_v55 = vrot.slane %v5310_v15, 6 }
 0x13a   : > { %8632 = vmatprep.subr.bf16.mxu0 %v9271_v50 }
 0x13b   : > { %v5342_v35 = vsel %vm5333_vm9, %v5339_v14, %v5341_v55  ;;  %v9301_v14 = vld [vmem:[%s10902_s2 + $0x6e0] sm:$0xff]  }
 0x13c   : > { %8249 = vmatpush3.bf16.msra.mxu1 %v9270_v29  ;;  %v9283_v29 = vld [vmem:[%s10902_s2 + $0x698] sm:$0xff]  }
 0x13d   : > { %8633 = vmatpush3.bf16.msra.mxu0 %v9271_v50  ;;  %8250 = vmatprep.subr.bf16.mxu1 %v9272_v13  ;;  %v2294_v50 = vsel %vm2291_vm8, %v2292_v18, %v2293_v8  ;;  %v9288_v8 = vld [vmem:[%s10902_s2 + $0x2b0] sm:$0xff]   ;;  %v9308_v18 = vld [vmem:[%s10902_s2 + $0x300] sm:$0xff]  }
 0x13e   : > { %8634 = vmatprep.subr.bf16.mxu0 %v9273_v62 }
 0x140   : > { %8251 = vmatpush3.bf16.msra.mxu1 %v9272_v13  ;;  %v5336_v13 = vsel %vm5333_vm9, %v5334_v63, %v5335_v17  ;;  %v9289_v17 = vld [vmem:[%s10902_s2 + $0x6b0] sm:$0xff]   ;;  %v5545_v63 = vshll.u32 %v5488_v26, 16 }
 0x141   : > { %8635 = vmatpush3.bf16.msra.mxu0 %v9273_v62  ;;  %8252 = vmatprep.subr.bf16.mxu1 %v9274_v6  ;;  %v9284_v62 = vld [vmem:[%s10902_s2 + $0x2a0] sm:$0xff]  }
 0x142   : > { %8636 = vmatprep.subr.bf16.mxu0 %v9275_v1 }
 0x144   : > { %8253 = vmatpush3.bf16.msra.mxu1 %v9274_v6  ;;  %v9291_v6 = vld [vmem:[%s10902_s2 + $0x6b8] sm:$0xff]  }
 0x145   : > { %8637 = vmatpush3.bf16.msra.mxu0 %v9275_v1  ;;  %8262 = vmatprep.subr.bf16.mxu1 %v9276_v42  ;;  %v9293_v1 = vld [vmem:[%s10902_s2 + $0x6c0] sm:$0xff]  }
 0x146   : > { %8646 = vmatprep.subr.bf16.mxu0 %v9277_v7 }
 0x147   : > { %8255 = vmatmul.mubr.bf16.vlgmr.msra.gmra.mrb[0].mxu1 %v2104_v23  ;;  %v9296_v23 = vld [vmem:[%s10902_s2 + $0x2d0] sm:$0xff]  }
 0x148   : > { %8263 = vmatpush3.bf16.msra.mxu1 %v9276_v42  ;;  %8639 = vmatmul.mubr.bf16.vlgmr.msra.gmra.mrb[0].mxu0 %v10401_v49  ;;  %v2468_v42 = vrot.slane %v2466_v32, 5  ;;  %v9312_v32 = vld [vmem:[%s10902_s2 + $0x310] sm:$0xff]  }
 0x149   : > { %8647 = vmatpush3.bf16.msra.mxu0 %v9277_v7  ;;  %8264 = vmatprep.subr.bf16.mxu1 %v9278_v52  ;;  %v5509_v7 = vrot.slane %v5507_v59, 6  ;;  %v9313_v59 = vld [vmem:[%s10902_s2 + $0x710] sm:$0xff]  }
 0x14a   : > { %8648 = vmatprep.subr.bf16.mxu0 %v9279_v36  ;;  %8258 = vmatprep.mubr.bf16.mxu1 %v2113_v16  ;;  %v9306_v16 = vld [vmem:[%s10902_s2 + $0x2f8] sm:$0xff]  }
 0x14b   : > { %8642 = vmatprep.mubr.bf16.mxu0 %v5155_v20  ;;  %v5513_v45 = vor.u32 %v5512_v12, %v5509_v7  ;;  %v2446_v20 = vld [vmem:[#allocation2 + $0x20] sm:$0x3f]  ;;  %v9318_v7 = vld [vmem:[%s10902_s2 + $0x328] sm:$0xff]  }
 0x14c   : > { %8265 = vmatpush3.bf16.msra.mxu1 %v9278_v52  ;;  %v9298_v52 = vld [vmem:[%s10902_s2 + $0x2d8] sm:$0xff]   ;;  %v2504_v56 = vshll.u32 %v2446_v20, 16  ;;  %v9319_v12 = vld [vmem:[%s10902_s2 + $0x728] sm:$0xff]  }
 0x14d   : > { %8649 = vmatpush3.bf16.msra.mxu0 %v9279_v36  ;;  %8266 = vmatprep.subr.bf16.mxu1 %v9280_v3  ;;  %v9305_v36 = vld [vmem:[%s10902_s2 + $0x6f0] sm:$0xff]  }
 0x14e   : > { %8650 = vmatprep.subr.bf16.mxu0 %v9281_v30 }
 0x14f   : > { %8259 = vmatmul.mubr.bf16.gmra.mrb[4].mxu1 %v2122_v47  ;;  %v5542_v47 = vshrl.u32 %v5488_v26, 16  ;;  %v9325_v26 = vld [vmem:[%s10902_s2 + $0x740] sm:$0xff]  }
 0x150   : > { %8267 = vmatpush3.bf16.msra.mxu1 %v9280_v3  ;;  %8643 = vmatmul.mubr.bf16.gmra.mrb[4].mxu0 %v5164_v48  ;;  %v2501_v3 = vshrl.u32 %v2446_v20, 16  ;;  %v9309_v48 = vld [vmem:[%s10902_s2 + $0x700] sm:$0xff]  }
 0x151   : > { %8651 = vmatpush3.bf16.msra.mxu0 %v9281_v30  ;;  %8268 = vmatprep.subr.bf16.mxu1 %v9282_v2  ;;  %v10518_v30 = vld [vmem:[#allocation2 + $0x8] sm:$0xff] }
 0x152   : > { %8652 = vmatprep.subr.bf16.mxu0 %v9283_v29  ;;  %8278 = vmatprep.mubr.bf16.mxu1 %v2294_v50  ;;  %v2677_v50 = vshll.u32 %v2650_v44, 16 }
 0x153   : > { %8662 = vmatprep.mubr.bf16.mxu0 %v5336_v13  ;;  %v2682_v13 = vshrl.u32 %v10518_v30, 16 }
 0x154   : > { %8269 = vmatpush3.bf16.msra.mxu1 %v9282_v2  ;;  %v9374_v2 = vld [vmem:[%s9560_s26 + $0x10] sm:$0xff]   ;;  %v2679_v10 = vrot.slane %v2677_v50, 7  ;;  %v5695_v50 = vld [vmem:[#allocation2 + $0x28] sm:$0x7f] }
 0x155   : > { %8653 = vmatpush3.bf16.msra.mxu0 %v9283_v29  ;;  %8270 = vmatprep.subr.bf16.mxu1 %v9284_v62  ;;  %v2674_v29 = vshrl.u32 %v2650_v44, 16  ;;  %370 = vst [vmem:[#allocation2 + $0x30] sm:$0xff] %v9374_v2  ;;  %v9326_v2 = vld [vmem:[%s10902_s2 + $0x348] sm:$0xff]  }
 0x156   : > { %8654 = vmatprep.subr.bf16.mxu0 %v9285_v4 }
 0x158   : > { %8271 = vmatpush3.bf16.msra.mxu1 %v9284_v62  ;;  %v2685_v62 = vshll.u32 %v10518_v30, 16 }
 0x159   : > { %8655 = vmatpush3.bf16.msra.mxu0 %v9285_v4  ;;  %8272 = vmatprep.subr.bf16.mxu1 %v9286_v57  ;;  %v2503_v4 = vrot.slane %v2501_v3, 5 }
 0x15a   : > { %8656 = vmatprep.subr.bf16.mxu0 %v9287_v27  ;;  %v2687_v19 = vrot.slane %v2685_v62, 7 }
 0x15c   : > { %8273 = vmatpush3.bf16.msra.mxu1 %v9286_v57  ;;  %v2506_v57 = vrot.slane %v2504_v56, 6 }
 0x15d   : > { %8657 = vmatpush3.bf16.msra.mxu0 %v9287_v27  ;;  %8274 = vmatprep.subr.bf16.mxu1 %v9288_v8  ;;  %v9310_v27 = vld [vmem:[%s10902_s2 + $0x308] sm:$0xff]  }
 0x15e   : > { %8658 = vmatprep.subr.bf16.mxu0 %v9289_v17 }
 0x160   : > { %8275 = vmatpush3.bf16.msra.mxu1 %v9288_v8  ;;  %v5544_v8 = vrot.slane %v5542_v47, 6 }
 0x161   : > { %8659 = vmatpush3.bf16.msra.mxu0 %v9289_v17  ;;  %8276 = vmatprep.subr.bf16.mxu1 %v9290_v5  ;;  %v5547_v17 = vrot.slane %v5545_v63, 7 }
 0x162   : > { %8660 = vmatprep.subr.bf16.mxu0 %v9291_v6 }
 0x163   : > { %v5548_v28 = vor.u32 %v5547_v17, %v5544_v8  ;;  %v2858_v8 = vld [vmem:[#allocation2] sm:$0x80] }
 0x164   : > { %8277 = vmatpush3.bf16.msra.mxu1 %v9290_v5  ;;  %v9311_v5 = vld [vmem:[%s10902_s2 + $0x708] sm:$0xff]  }
 0x165   : > { %8661 = vmatpush3.bf16.msra.mxu0 %v9291_v6  ;;  %8286 = vmatprep.subr.bf16.mxu1 %v9292_v61  ;;  %v2676_v6 = vrot.slane %v2674_v29, 6  ;;  %v9327_v29 = vld [vmem:[%s10902_s2 + $0x748] sm:$0xff]  }
 0x166   : > { %8670 = vmatprep.subr.bf16.mxu0 %v9293_v1 }
 0x167   : > { %8279 = vmatmul.mubr.bf16.vlgmr.msra.gmra.mrb[0].mxu1 %v10123_v33  ;;  %v9297_v33 = vld [vmem:[%s10902_s2 + $0x6d0] sm:$0xff]   ;;  %v2680_v46 = vor.u32 %v2679_v10, %v2676_v6  ;;  %v5725_v10 = vrot.slane %v5695_v50, 7 }
 0x168   : > { %8287 = vmatpush3.bf16.msra.mxu1 %v9292_v61  ;;  %8663 = vmatmul.mubr.bf16.vlgmr.msra.gmra.mrb[0].mxu0 %v10129_v34  ;;  %v2472_v34 = vor.u32 %v2471_v60, %v2468_v42  ;;  %v2684_v61 = vrot.slane %v2682_v13, 6  ;;  %v9315_v42 = vld [vmem:[%s10902_s2 + $0x718] sm:$0xff]   ;;  %v9328_v6 = vld [vmem:[%s10902_s2 + $0x350] sm:$0xff]  }
 0x169   : > { %8671 = vmatpush3.bf16.msra.mxu0 %v9293_v1  ;;  %8288 = vmatprep.subr.bf16.mxu1 %v9294_v39  ;;  %v2507_v1 = vor.u32 %v2506_v57, %v2503_v4 }
 0x16a   : > { %8672 = vmatprep.subr.bf16.mxu0 %v9295_v31  ;;  %8282 = vmatprep.mubr.bf16.mxu1 %v10317_v38  ;;  %v2481_v0 = vsel %vm2464_vm10, %v2472_v34, %v10219_v24  ;;  %v5522_v38 = vsel %vm2672_vm11, %v5513_v45, %v10225_v37  ;;  %v9302_v24 = vld [vmem:[%s10902_s2 + $0x2e8] sm:$0xff]   ;;  %v9321_v34 = vld [vmem:[%s10902_s2 + $0x730] sm:$0xff]  }
 0x16b   : > { %8666 = vmatprep.mubr.bf16.mxu0 %v10190_v40  ;;  %v9299_v40 = vld [vmem:[%s10902_s2 + $0x6d8] sm:$0xff]   ;;  %v9303_v37 = vld [vmem:[%s10902_s2 + $0x6e8] sm:$0xff]   ;;  %v2508_v25 = vsel %vm2464_vm10, %v10391_v53, %v2507_v1  ;;  %v2887_v1 = vrot.slane %v10518_v30, 7 }
 0x16c   : > { %8289 = vmatpush3.bf16.msra.mxu1 %v9294_v39  ;;  %v10551_v39 = vld [vmem:[#allocation2 + $0x10] sm:$0xff] }
 0x16d   : > { %8673 = vmatpush3.bf16.msra.mxu0 %v9295_v31  ;;  %8290 = vmatprep.subr.bf16.mxu1 %v9296_v23  ;;  %v10556_v15 = vrot.slane %v10551_v39, 7  ;;  %v10586_v55 = vshll.u32 %v10551_v39, 16 }
 0x16e   : > { %8674 = vmatprep.subr.bf16.mxu0 %v9297_v33 }
 0x16f   : > { %8283 = vmatmul.mubr.bf16.gmra.mrb[4].mxu1 %v2300_v51  ;;  %v10594_v51 = vld [vmem:[#allocation2 + $0x18] sm:$0xff] }
 0x170   : > { %8291 = vmatpush3.bf16.msra.mxu1 %v9296_v23  ;;  %8667 = vmatmul.mubr.bf16.gmra.mrb[4].mxu0 %v5342_v35  ;;  %v10583_v23 = vshrl.u32 %v10551_v39, 16  ;;  %v10597_v45 = vshrl.u32 %v10594_v51, 16  ;;  %v10616_v20 = vrot.slane %v10594_v51, 7 }
 0x171   : > { %8675 = vmatpush3.bf16.msra.mxu0 %v9297_v33  ;;  %8292 = vmatprep.subr.bf16.mxu1 %v9298_v52  ;;  %v9320_v33 = vld [vmem:[%s10902_s2 + $0x330] sm:$0xff]  }
 0x172   : > { %8676 = vmatprep.subr.bf16.mxu0 %v9299_v40  ;;  %8302 = vmatprep.mubr.bf16.mxu1 %v2481_v0  ;;  %v2693_v35 = vrot.slane %v10583_v23, 6  ;;  %v9322_v0 = vld [vmem:[%s10902_s2 + $0x338] sm:$0xff]   ;;  %v10629_v63 = vsel %vm2885_vm13, %v10556_v15, %v10616_v20 }
 0x173   : > { %8686 = vmatprep.mubr.bf16.mxu0 %v5522_v38  ;;  %v2654_v38 = vld [vmem:[#allocation2 + $0x20] sm:$0x7f] }
 0x174   : > { %8293 = vmatpush3.bf16.msra.mxu1 %v9298_v52  ;;  %v10600_v52 = vshll.u32 %v10594_v51, 16 }
 0x175   : > { %8677 = vmatpush3.bf16.msra.mxu0 %v9299_v40  ;;  %8294 = vmatprep.subr.bf16.mxu1 %v9300_v22  ;;  %v2696_v40 = vrot.slane %v10586_v55, 7 }
 0x176   : > { %8678 = vmatprep.subr.bf16.mxu0 %v9301_v14 }
 0x178   : > { %8295 = vmatpush3.bf16.msra.mxu1 %v9300_v22  ;;  %v9323_v22 = vld [vmem:[%s10902_s2 + $0x738] sm:$0xff]  }
 0x179   : > { %8679 = vmatpush3.bf16.msra.mxu0 %v9301_v14  ;;  %8296 = vmatprep.subr.bf16.mxu1 %v9302_v24  ;;  %v2702_v14 = vrot.slane %v10597_v45, 6 }
 0x17a   : > { %8680 = vmatprep.subr.bf16.mxu0 %v9303_v37 }
 0x17c   : > { %8297 = vmatpush3.bf16.msra.mxu1 %v9302_v24  ;;  %v2705_v24 = vrot.slane %v10600_v52, 7 }
 0x17d   : > { %8681 = vmatpush3.bf16.msra.mxu0 %v9303_v37  ;;  %8298 = vmatprep.subr.bf16.mxu1 %v9304_v54  ;;  %v2697_v37 = vor.u32 %v2696_v40, %v2693_v35 }
 0x17e   : > { %8682 = vmatprep.subr.bf16.mxu0 %v9305_v36  ;;  %v2706_v3 = vor.u32 %v2705_v24, %v2702_v14  ;;  %v9341_v14 = vld [vmem:[%s10902_s2 + $0x780] sm:$0xff]   ;;  %v2890_v24 = vsel %vm2885_vm13, %v2887_v1, %v10556_v15 }
 0x180   : > { %8299 = vmatpush3.bf16.msra.mxu1 %v9304_v54  ;;  %v2709_v54 = vshrl.u32 %v2654_v38, 16  ;;  %v2707_v4 = vsel %vm2672_vm11, %v2697_v37, %v2706_v3 }
 0x181   : > { %8683 = vmatpush3.bf16.msra.mxu0 %v9305_v36  ;;  %8300 = vmatprep.subr.bf16.mxu1 %v9306_v16  ;;  %v2712_v36 = vshll.u32 %v2654_v38, 16 }
 0x182   : > { %8684 = vmatprep.subr.bf16.mxu0 %v9307_v9 }
 0x183   : > { %v2714_v47 = vrot.slane %v2712_v36, 7 }
 0x184   : > { %8301 = vmatpush3.bf16.msra.mxu1 %v9306_v16  ;;  %v9324_v16 = vld [vmem:[%s10902_s2 + $0x340] sm:$0xff]  }
 0x185   : > { %8685 = vmatpush3.bf16.msra.mxu0 %v9307_v9  ;;  %8310 = vmatprep.subr.bf16.mxu1 %v9308_v18  ;;  %v10618_v9 = vld [vmem:[#allocation2 + $0x20] sm:$0xff] }
 0x186   : > { %8694 = vmatprep.subr.bf16.mxu0 %v9309_v48  ;;  %v5723_v44 = vrot.slane %v10618_v9, 7  ;;  %v5914_v40 = vshll.u32 %v10618_v9, 16 }
 0x187   : > { %8303 = vmatmul.mubr.bf16.vlgmr.msra.gmra.mrb[0].mxu1 %v10235_v41  ;;  %v5691_v41 = vld [vmem:[#allocation2 + $0x8] sm:$0x80] }
 0x188   : > { %8311 = vmatpush3.bf16.msra.mxu1 %v9308_v18  ;;  %8687 = vmatmul.mubr.bf16.vlgmr.msra.gmra.mrb[0].mxu0 %v10245_v11  ;;  %v10549_v11 = vor.u32 %v2687_v19, %v2684_v61  ;;  %v5718_v31 = vrot.slane %v5691_v41, 7  ;;  %v2711_v18 = vrot.slane %v2709_v54, 6  ;;  %v5724_v57 = vsel %vm2885_vm13, %v10616_v20, %v5723_v44  ;;  %v9329_v61 = vld [vmem:[%s10902_s2 + $0x750] sm:$0xff]   ;;  %v3036_v54 = vld [vmem:[#allocation2] sm:$0x80] }
 0x189   : > { %8695 = vmatpush3.bf16.msra.mxu0 %v9309_v48  ;;  %8312 = vmatprep.subr.bf16.mxu1 %v9310_v27  ;;  %v5868_v48 = vld [vmem:[#allocation2 + $0x8] sm:$0x80]  ;;  %v2886_v19 = vrot.slane %v2858_v8, 7 }
 0x18a   : > { %8696 = vmatprep.subr.bf16.mxu0 %v9311_v5  ;;  %8306 = vmatprep.mubr.bf16.mxu1 %v10401_v49  ;;  %v9314_v49 = vld [vmem:[%s10902_s2 + $0x318] sm:$0xff]   ;;  %v2689_v53 = vsel %vm2672_vm11, %v2680_v46, %v10549_v11  ;;  %v5720_v60 = vsel %vm2885_vm13, %v5718_v31, %v10556_v15  ;;  %v2698_v56 = vsel %vm2672_vm11, %v10549_v11, %v2697_v37  ;;  %v5891_v17 = vshrl.u32 %v5868_v48, 16  ;;  %v9344_v48 = vld [vmem:[%s10902_s2 + $0x390] sm:$0xff]  }
 0x18b   : > { %8690 = vmatprep.mubr.bf16.mxu0 %v10298_v58  ;;  %v5549_v58 = vsel %vm2672_vm11, %v10294_v43, %v5548_v28  ;;  %v9316_v43 = vld [vmem:[%s10902_s2 + $0x320] sm:$0xff]   ;;  %v5726_v46 = vsel %vm2885_vm13, %v5723_v44, %v5725_v10  ;;  %v9331_v11 = vld [vmem:[%s10902_s2 + $0x758] sm:$0xff]   ;;  %v3060_v44 = vshrl.u32 %v3036_v54, 16  ;;  %v9352_v10 = vld [vmem:[%s10902_s2 + $0x3b0] sm:$0xff]  }
 0x18c   : > { %8313 = vmatpush3.bf16.msra.mxu1 %v9310_v27  ;;  %v2715_v27 = vor.u32 %v2714_v47, %v2711_v18  ;;  %v5893_v28 = vrot.slane %v5891_v17, 7  ;;  %v3066_v18 = vrot.slane %v2682_v13, 7  ;;  %v9345_v13 = vld [vmem:[%s10902_s2 + $0x790] sm:$0xff]   ;;  %v9349_v17 = vld [vmem:[%s10902_s2 + $0x7a0] sm:$0xff]  }
 0x18d   : > { %8697 = vmatpush3.bf16.msra.mxu0 %v9311_v5  ;;  %8314 = vmatprep.subr.bf16.mxu1 %v9312_v32  ;;  %v5897_v5 = vrot.slane %v10583_v23, 7  ;;  %v3062_v50 = vrot.slane %v3060_v44, 7 }
 0x18e   : > { %8698 = vmatprep.subr.bf16.mxu0 %v9313_v59 }
 0x18f   : > { %8307 = vmatmul.mubr.bf16.gmra.mrb[4].mxu1 %v2508_v25  ;;  %v10653_v41 = vor.u32 %v5897_v5, %v10586_v55  ;;  %v2888_v25 = vsel %vm2885_vm13, %v2886_v19, %v2887_v1  ;;  %v9354_v19 = vld [vmem:[%s10902_s2 + $0x3b8] sm:$0xff]  }
 0x190   : > { %8315 = vmatpush3.bf16.msra.mxu1 %v9312_v32  ;;  %8691 = vmatmul.mubr.bf16.gmra.mrb[4].mxu0 %v5549_v58  ;;  %v2716_v32 = vsel %vm2672_vm11, %v2706_v3, %v2715_v27  ;;  %v9333_v58 = vld [vmem:[%s10902_s2 + $0x760] sm:$0xff]   ;;  %v9346_v27 = vld [vmem:[%s10902_s2 + $0x398] sm:$0xff]  }
 0x191   : > { %8699 = vmatpush3.bf16.msra.mxu0 %v9313_v59  ;;  %8316 = vmatprep.subr.bf16.mxu1 %v9314_v49  ;;  %v9330_v59 = vld [vmem:[%s10902_s2 + $0x358] sm:$0xff]   ;;  %v5901_v31 = vsel %vm3058_vm14, %v5893_v28, %v10653_v41  ;;  %v9357_v28 = vld [vmem:[%s10902_s2 + $0x7c0] sm:$0xff]  }
 0x192   : > { %8700 = vmatprep.subr.bf16.mxu0 %v9315_v42  ;;  %8326 = vmatprep.mubr.bf16.mxu1 %v2689_v53  ;;  %v9335_v53 = vld [vmem:[%s10902_s2 + $0x768] sm:$0xff]   ;;  %v9355_v1 = vld [vmem:[%s10902_s2 + $0x7b8] sm:$0xff]  }
 0x193   : > { %8710 = vmatprep.mubr.bf16.mxu0 %v5720_v60  ;;  %v9336_v60 = vld [vmem:[%s10902_s2 + $0x370] sm:$0xff]  }
 0x194   : > { %8317 = vmatpush3.bf16.msra.mxu1 %v9314_v49  ;;  %v9332_v49 = vld [vmem:[%s10902_s2 + $0x360] sm:$0xff]  }
 0x195   : > { %8701 = vmatpush3.bf16.msra.mxu0 %v9315_v42  ;;  %8318 = vmatprep.subr.bf16.mxu1 %v9316_v43  ;;  %v9334_v42 = vld [vmem:[%s10902_s2 + $0x368] sm:$0xff]  }
 0x196   : > { %8702 = vmatprep.subr.bf16.mxu0 %v9317_v21 }
 0x198   : > { %8319 = vmatpush3.bf16.msra.mxu1 %v9316_v43  ;;  %v9337_v43 = vld [vmem:[%s10902_s2 + $0x770] sm:$0xff]  }
 0x199   : > { %8703 = vmatpush3.bf16.msra.mxu0 %v9317_v21  ;;  %8320 = vmatprep.subr.bf16.mxu1 %v9318_v7  ;;  %v5911_v21 = vshrl.u32 %v10618_v9, 16 }
 0x19a   : > { %8704 = vmatprep.subr.bf16.mxu0 %v9319_v12 }
 0x19b   : > { %v5913_v35 = vrot.slane %v5911_v21, 7 }
 0x19c   : > { %8321 = vmatpush3.bf16.msra.mxu1 %v9318_v7  ;;  %v9338_v7 = vld [vmem:[%s10902_s2 + $0x378] sm:$0xff]  }
 0x19d   : > { %8705 = vmatpush3.bf16.msra.mxu0 %v9319_v12  ;;  %8322 = vmatprep.subr.bf16.mxu1 %v9320_v33  ;;  %v5905_v12 = vrot.slane %v10597_v45, 7  ;;  %v5916_v37 = vor.u32 %v5914_v40, %v5913_v35 }
 0x19e   : > { %8706 = vmatprep.subr.bf16.mxu0 %v9321_v34 }
 0x19f   : > { %v5908_v38 = vor.u32 %v5905_v12, %v10600_v52  ;;  %v10726_v47 = vsel %vm3058_vm14, %v5905_v12, %v5916_v37  ;;  %v9370_v12 = vld [vmem:[%s10902_s2 + $0x3f8] sm:$0xff]  }
 0x1a0   : > { %8323 = vmatpush3.bf16.msra.mxu1 %v9320_v33  ;;  %v9339_v33 = vld [vmem:[%s10902_s2 + $0x778] sm:$0xff]  }
 0x1a1   : > { %8707 = vmatpush3.bf16.msra.mxu0 %v9321_v34  ;;  %8324 = vmatprep.subr.bf16.mxu1 %v9322_v0  ;;  %v10691_v34 = vld [vmem:[#allocation2 + $0x28] sm:$0xff]  ;;  %v10711_v36 = vsel %vm3058_vm14, %v5897_v5, %v5908_v38  ;;  %v9372_v38 = vld [vmem:[%s10902_s2 + $0x800] sm:$0xff]  }
 0x1a2   : > { %8708 = vmatprep.subr.bf16.mxu0 %v9323_v22  ;;  %v5922_v15 = vshll.u32 %v10691_v34, 16  ;;  %v9350_v5 = vld [vmem:[%s10902_s2 + $0x3a8] sm:$0xff]   ;;  %v6456_v44 = vrot.slane %v10691_v34, 1 }
 0x1a4   : > { %8325 = vmatpush3.bf16.msra.mxu1 %v9322_v0  ;;  %v9340_v0 = vld [vmem:[%s10902_s2 + $0x380] sm:$0xff]   ;;  %v6273_v37 = vrot.slane %v5922_v15, 1 }
 0x1a5   : > { %8709 = vmatpush3.bf16.msra.mxu0 %v9323_v22  ;;  %8334 = vmatprep.subr.bf16.mxu1 %v9324_v16  ;;  %v5919_v22 = vshrl.u32 %v10691_v34, 16 }
 0x1a6   : > { %8718 = vmatprep.subr.bf16.mxu0 %v9325_v26 }
 0x1a7   : > { %8327 = vmatmul.mubr.bf16.vlgmr.msra.gmra.mrb[0].mxu1 %v2698_v56  ;;  %v5921_v3 = vrot.slane %v5919_v22, 7  ;;  %v9343_v56 = vld [vmem:[%s10902_s2 + $0x788] sm:$0xff]  }
 0x1a8   : > { %8335 = vmatpush3.bf16.msra.mxu1 %v9324_v16  ;;  %8711 = vmatmul.mubr.bf16.vlgmr.msra.gmra.mrb[0].mxu0 %v10629_v63  ;;  %v9342_v16 = vld [vmem:[%s10902_s2 + $0x388] sm:$0xff]  }
 0x1a9   : > { %8719 = vmatpush3.bf16.msra.mxu0 %v9325_v26  ;;  %8336 = vmatprep.subr.bf16.mxu1 %v9326_v2  ;;  %v2862_v26 = vld [vmem:[#allocation2 + $0x20] sm:$0x7f] }
 0x1aa   : > { %8720 = vmatprep.subr.bf16.mxu0 %v9327_v29  ;;  %8330 = vmatprep.mubr.bf16.mxu1 %v2707_v4  ;;  %v3069_v4 = vor.u32 %v3066_v18, %v2685_v62 }
 0x1ab   : > { %8714 = vmatprep.mubr.bf16.mxu0 %v5724_v57 }
 0x1ac   : > { %8337 = vmatpush3.bf16.msra.mxu1 %v9326_v2  ;;  %v2893_v2 = vrot.slane %v2862_v26, 7  ;;  %v3070_v62 = vsel %vm3058_vm14, %v3062_v50, %v3069_v4 }
 0x1ad   : > { %8721 = vmatpush3.bf16.msra.mxu0 %v9327_v29  ;;  %8338 = vmatprep.subr.bf16.mxu1 %v9328_v6  ;;  %v5924_v29 = vor.u32 %v5922_v15, %v5921_v3  ;;  %v9375_v3 = vld [vmem:[%s10902_s2 + $0x810] sm:$0xff]   ;;  %v6452_v15 = vrot.slane %v10594_v51, 1 }
 0x1ae   : > { %8722 = vmatprep.subr.bf16.mxu0 %v9329_v61  ;;  %v2894_v57 = vsel %vm2885_vm13, %v10616_v20, %v2893_v2  ;;  %v9348_v20 = vld [vmem:[%s10902_s2 + $0x3a0] sm:$0xff]   ;;  %v9379_v2 = vld [vmem:[%s10902_s2 + $0x830] sm:$0xff]  }
 0x1af   : > { %8331 = vmatmul.mubr.bf16.gmra.mrb[4].mxu1 %v2716_v32  ;;  %v5925_v8 = vsel %vm3058_vm14, %v5913_v35, %v5924_v29  ;;  %v9356_v32 = vld [vmem:[%s10902_s2 + $0x3c0] sm:$0xff]   ;;  %v6428_v29 = vld [vmem:[#allocation2 + $0x30] sm:$0x1] }
 0x1b0   : > { %8339 = vmatpush3.bf16.msra.mxu1 %v9328_v6  ;;  %8715 = vmatmul.mubr.bf16.gmra.mrb[4].mxu0 %v5726_v46  ;;  %v9351_v6 = vld [vmem:[%s10902_s2 + $0x7a8] sm:$0xff]  }
 0x1b1   : > { %8723 = vmatpush3.bf16.msra.mxu0 %v9329_v61  ;;  %8340 = vmatprep.subr.bf16.mxu1 %v9330_v59  ;;  %v9353_v61 = vld [vmem:[%s10902_s2 + $0x7b0] sm:$0xff]   ;;  %v9358_v46 = vld [vmem:[%s10902_s2 + $0x3c8] sm:$0xff]  }
 0x1b2   : > { %8724 = vmatprep.subr.bf16.mxu0 %v9331_v11  ;;  %8350 = vmatprep.mubr.bf16.mxu1 %v2888_v25  ;;  %v6252_v25 = vrot.slane %v10586_v55, 1  ;;  %v6257_v55 = vrot.slane %v10600_v52, 1  ;;  %v9364_v52 = vld [vmem:[%s10902_s2 + $0x3e0] sm:$0xff]  }
 0x1b3   : > { %8734 = vmatprep.mubr.bf16.mxu0 %v5901_v31  ;;  %v9361_v31 = vld [vmem:[%s10902_s2 + $0x7d0] sm:$0xff]  }
 0x1b4   : > { %8341 = vmatpush3.bf16.msra.mxu1 %v9330_v59  ;;  %v3078_v59 = vsel %vm3058_vm14, %v3066_v18, %v10653_v41  ;;  %v9360_v41 = vld [vmem:[%s10902_s2 + $0x3d0] sm:$0xff]   ;;  %v6261_v35 = vor.u32 %v6257_v55, %v10597_v45  ;;  %v9373_v45 = vld [vmem:[%s10902_s2 + $0x808] sm:$0xff]   ;;  %v9376_v18 = vld [vmem:[%s10902_s2 + $0x818] sm:$0xff]  }
 0x1b5   : > { %8725 = vmatpush3.bf16.msra.mxu0 %v9331_v11  ;;  %8342 = vmatprep.subr.bf16.mxu1 %v9332_v49  ;;  %v9359_v11 = vld [vmem:[%s10902_s2 + $0x7c8] sm:$0xff]  }
 0x1b6   : > { %8726 = vmatprep.subr.bf16.mxu0 %v9333_v58 }
 0x1b8   : > { %8343 = vmatpush3.bf16.msra.mxu1 %v9332_v49  ;;  %v6253_v49 = vor.u32 %v6252_v25, %v10583_v23 }
 0x1b9   : > { %8727 = vmatpush3.bf16.msra.mxu0 %v9333_v58  ;;  %8344 = vmatprep.subr.bf16.mxu1 %v9334_v42  ;;  %v9362_v58 = vld [vmem:[%s10902_s2 + $0x3d8] sm:$0xff]  }
 0x1ba   : > { %8728 = vmatprep.subr.bf16.mxu0 %v9335_v53  ;;  %v6258_v23 = vsel %vm542_vm0, %v6253_v49, %v6257_v55  ;;  %v7579_v55 = vld [vmem:[%s10904_s4] ss:$0 sm:$0xff] }
 0x1bc   : > { %8345 = vmatpush3.bf16.msra.mxu1 %v9334_v42  ;;  %v9363_v42 = vld [vmem:[%s10902_s2 + $0x7d8] sm:$0xff]  }
 0x1bd   : > { %8729 = vmatpush3.bf16.msra.mxu0 %v9335_v53  ;;  %8346 = vmatprep.subr.bf16.mxu1 %v9336_v60  ;;  %v9365_v53 = vld [vmem:[%s10902_s2 + $0x7e0] sm:$0xff]  }
 0x1be   : > { %8730 = vmatprep.subr.bf16.mxu0 %v9337_v43 }
 0x1c0   : > { %8347 = vmatpush3.bf16.msra.mxu1 %v9336_v60  ;;  %v9366_v60 = vld [vmem:[%s10902_s2 + $0x3e8] sm:$0xff]  }
 0x1c1   : > { %8731 = vmatpush3.bf16.msra.mxu0 %v9337_v43  ;;  %8348 = vmatprep.subr.bf16.mxu1 %v9338_v7  ;;  %v9367_v43 = vld [vmem:[%s10902_s2 + $0x7e8] sm:$0xff]  }
 0x1c2   : > { %8732 = vmatprep.subr.bf16.mxu0 %v9339_v33 }
 0x1c4   : > { %8349 = vmatpush3.bf16.msra.mxu1 %v9338_v7  ;;  %v9369_v7 = vld [vmem:[%s10902_s2 + $0x7f0] sm:$0xff]  }
 0x1c5   : > { %8733 = vmatpush3.bf16.msra.mxu0 %v9339_v33  ;;  %8358 = vmatprep.subr.bf16.mxu1 %v9340_v0  ;;  %v9371_v33 = vld [vmem:[%s10902_s2 + $0x7f8] sm:$0xff]  }
 0x1c6   : > { %8742 = vmatprep.subr.bf16.mxu0 %v9341_v14 }
 0x1c7   : > { %8351 = vmatmul.mubr.bf16.vlgmr.msra.gmra.mrb[0].mxu1 %v2890_v24 }
 0x1c8   : > { %8359 = vmatpush3.bf16.msra.mxu1 %v9340_v0  ;;  %8735 = vmatmul.mubr.bf16.vlgmr.msra.gmra.mrb[0].mxu0 %v10711_v36  ;;  %v6265_v0 = vrot.slane %v5914_v40, 1 }
 0x1c9   : > { %8743 = vmatpush3.bf16.msra.mxu0 %v9341_v14  ;;  %8360 = vmatprep.subr.bf16.mxu1 %v9342_v16  ;;  %v6229_v14 = vld [vmem:[#allocation2 + $0x30] sm:$0x1] }
 0x1ca   : > { %8744 = vmatprep.subr.bf16.mxu0 %v9343_v56  ;;  %8354 = vmatprep.mubr.bf16.mxu1 %v10629_v63  ;;  %v9347_v63 = vld [vmem:[%s10902_s2 + $0x798] sm:$0xff]   ;;  %v6269_v24 = vor.u32 %v6265_v0, %v5911_v21  ;;  %v6266_v54 = vsel %vm542_vm0, %v6261_v35, %v6265_v0  ;;  %v6279_v40 = vshll.u32 %v6229_v14, 16  ;;  %v6424_v21 = vld [vmem:[#allocation2 + $0x10] sm:$0xfe] }
 0x1cb   : > { %8738 = vmatprep.mubr.bf16.mxu0 %v10726_v47 }
 0x1cc   : > { %8361 = vmatpush3.bf16.msra.mxu1 %v9342_v16  ;;  %v6277_v16 = vor.u32 %v6273_v37, %v5919_v22  ;;  %v6281_v26 = vrot.slane %v6279_v40, 1 }
 0x1cd   : > { %8745 = vmatpush3.bf16.msra.mxu0 %v9343_v56  ;;  %8362 = vmatprep.subr.bf16.mxu1 %v9344_v48  ;;  %v6454_v56 = vrot.slane %v10618_v9, 1 }
 0x1ce   : > { %8746 = vmatprep.subr.bf16.mxu0 %v9345_v13  ;;  %v6282_v22 = vsel %vm542_vm0, %v6277_v16, %v6281_v26 }
 0x1cf   : > { %8355 = vmatmul.mubr.bf16.gmra.mrb[4].mxu1 %v2894_v57  ;;  %v6455_v4 = vsel %vm747_vm1, %v6452_v15, %v6454_v56 }
 0x1d0   : > { %8363 = vmatpush3.bf16.msra.mxu1 %v9344_v48  ;;  %8739 = vmatmul.mubr.bf16.gmra.mrb[4].mxu0 %v5925_v8  ;;  %v9380_v48 = vld [vmem:[%s10902_s2 + $0x838] sm:$0xff]  }
 0x1d1   : > { %8747 = vmatpush3.bf16.msra.mxu0 %v9345_v13  ;;  %8364 = vmatprep.subr.bf16.mxu1 %v9346_v27  ;;  %v6458_v13 = vrot.slane %v6428_v29, 1 }
 0x1d2   : > { %8748 = vmatprep.subr.bf16.mxu0 %v9347_v63  ;;  %8374 = vmatprep.mubr.bf16.mxu1 %v3070_v62 }
 0x1d3   : > { %8758 = vmatprep.mubr.bf16.mxu0 %v10551_v39  ;;  %v6459_v50 = vsel %vm747_vm1, %v6456_v44, %v6458_v13 }
 0x1d4   : > { %8365 = vmatpush3.bf16.msra.mxu1 %v9346_v27 }
 0x1d5   : > { %8749 = vmatpush3.bf16.msra.mxu0 %v9347_v63  ;;  %8366 = vmatprep.subr.bf16.mxu1 %v9348_v20 }
 0x1d6   : > { %8750 = vmatprep.subr.bf16.mxu0 %v9349_v17 }
 0x1d8   : > { %8367 = vmatpush3.bf16.msra.mxu1 %v9348_v20 }
 0x1d9   : > { %8751 = vmatpush3.bf16.msra.mxu0 %v9349_v17  ;;  %8368 = vmatprep.subr.bf16.mxu1 %v9350_v5 }
 0x1da   : > { %8752 = vmatprep.subr.bf16.mxu0 %v9351_v6 }
 0x1dc   : > { %8369 = vmatpush3.bf16.msra.mxu1 %v9350_v5 }
 0x1dd   : > { %8753 = vmatpush3.bf16.msra.mxu0 %v9351_v6  ;;  %8370 = vmatprep.subr.bf16.mxu1 %v9352_v10 }
 0x1de   : > { %8754 = vmatprep.subr.bf16.mxu0 %v9353_v61 }
 0x1e0   : > { %8371 = vmatpush3.bf16.msra.mxu1 %v9352_v10 }
 0x1e1   : > { %8755 = vmatpush3.bf16.msra.mxu0 %v9353_v61  ;;  %8372 = vmatprep.subr.bf16.mxu1 %v9354_v19 }
 0x1e2   : > { %8756 = vmatprep.subr.bf16.mxu0 %v9355_v1 }
 0x1e4   : > { %8373 = vmatpush3.bf16.msra.mxu1 %v9354_v19 }
 0x1e5   : > { %8757 = vmatpush3.bf16.msra.mxu0 %v9355_v1  ;;  %8382 = vmatprep.subr.bf16.mxu1 %v9356_v32 }
 0x1e6   : > { %8766 = vmatprep.subr.bf16.mxu0 %v9357_v28 }
 0x1e7   : > { %8375 = vmatmul.mubr.bf16.vlgmr.msra.gmra.mrb[0].mxu1 %v3078_v59 }
 0x1e8   : > { %8383 = vmatpush3.bf16.msra.mxu1 %v9356_v32  ;;  %8759 = vmatmul.mubr.bf16.vlgmr.msra.gmra.mrb[0].mxu0 %v10594_v51 }
 0x1e9   : > { %8767 = vmatpush3.bf16.msra.mxu0 %v9357_v28  ;;  %8384 = vmatprep.subr.bf16.mxu1 %v9358_v46 }
 0x1ea   : > { %8768 = vmatprep.subr.bf16.mxu0 %v9359_v11  ;;  %8378 = vmatprep.mubr.bf16.mxu1 %v10711_v36  ;;  %v6274_v36 = vsel %vm542_vm0, %v6269_v24, %v6273_v37 }
 0x1eb   : > { %8762 = vmatprep.mubr.bf16.mxu0 %v10618_v9 }
 0x1ec   : > { %8385 = vmatpush3.bf16.msra.mxu1 %v9358_v46  ;;  %v7578_v46 = vld [vmem:[%s10903_s3] ss:$0 sm:$0xff] }
 0x1ed   : > { %8769 = vmatpush3.bf16.msra.mxu0 %v9359_v11  ;;  %8386 = vmatprep.subr.bf16.mxu1 %v9360_v41 }
 0x1ee   : > { %8770 = vmatprep.subr.bf16.mxu0 %v9361_v31 }
 0x1ef   : > { %8379 = vmatmul.mubr.bf16.gmra.mrb[4].mxu1 %v10726_v47 }
 0x1f0   : > { %8387 = vmatpush3.bf16.msra.mxu1 %v9360_v41  ;;  %8763 = vmatmul.mubr.bf16.gmra.mrb[4].mxu0 %v10691_v34  ;;  %v9377_v34 = vld [vmem:[%s10902_s2 + $0x820] sm:$0xff]  }
 0x1f1   : > { %8771 = vmatpush3.bf16.msra.mxu0 %v9361_v31  ;;  %8388 = vmatprep.subr.bf16.mxu1 %v9362_v58 }
 0x1f2   : > { %8772 = vmatprep.subr.bf16.mxu0 %v9363_v42  ;;  %8398 = vmatprep.mubr.bf16.mxu1 %v10518_v30  ;;  %v9368_v30 = vld [vmem:[%s10902_s2 + $0x3f0] sm:$0xff]  }
 0x1f3   : > { %8782 = vmatprep.mubr.bf16.mxu0 %v6258_v23 }
 0x1f4   : > { %8389 = vmatpush3.bf16.msra.mxu1 %v9362_v58 }
 0x1f5   : > { %8773 = vmatpush3.bf16.msra.mxu0 %v9363_v42  ;;  %8390 = vmatprep.subr.bf16.mxu1 %v9364_v52 }
 0x1f6   : > { %8774 = vmatprep.subr.bf16.mxu0 %v9365_v53 }
 0x1f8   : > { %8391 = vmatpush3.bf16.msra.mxu1 %v9364_v52 }
 0x1f9   : > { %8775 = vmatpush3.bf16.msra.mxu0 %v9365_v53  ;;  %8392 = vmatprep.subr.bf16.mxu1 %v9366_v60 }
 0x1fa   : > { %8776 = vmatprep.subr.bf16.mxu0 %v9367_v43 }
 0x1fc   : > { %8393 = vmatpush3.bf16.msra.mxu1 %v9366_v60 }
 0x1fd   : > { %8777 = vmatpush3.bf16.msra.mxu0 %v9367_v43  ;;  %8394 = vmatprep.subr.bf16.mxu1 %v9368_v30 }
 0x1fe   : > { %8778 = vmatprep.subr.bf16.mxu0 %v9369_v7 }
 0x200   : > { %8395 = vmatpush3.bf16.msra.mxu1 %v9368_v30 }
 0x201   : > { %8779 = vmatpush3.bf16.msra.mxu0 %v9369_v7  ;;  %8396 = vmatprep.subr.bf16.mxu1 %v9370_v12 }
 0x202   : > { %8780 = vmatprep.subr.bf16.mxu0 %v9371_v33 }
 0x204   : > { %8397 = vmatpush3.bf16.msra.mxu1 %v9370_v12 }
 0x205   : > { %8781 = vmatpush3.bf16.msra.mxu0 %v9371_v33  ;;  %8814 = vmatprep.subr.bf16.mxu1 %v9372_v38 }
 0x206   : > { %8790 = vmatprep.subr.bf16.mxu0 %v9372_v38 }
 0x207   : > { %8399 = vmatmul.mubr.bf16.vlgmr.msra.gmra.mrb[0].mxu1 %v10551_v39  ;;  %v6451_v39 = vrot.slane %v6424_v21, 1 }
 0x208   : > { %8783 = vmatmul.mubr.bf16.vlgmr.msra.gmra.mrb[0].mxu0 %v6266_v54  ;;  %8822 = vmatpush3.bf16.msra.mxu1 %v9372_v38 }
 0x209   : > { %8791 = vmatpush3.bf16.msra.mxu0 %v9372_v38  ;;  %8815 = vmatprep.subr.bf16.mxu1 %v9373_v45  ;;  %v6453_v47 = vsel %vm747_vm1, %v6451_v39, %v6452_v15 }
 0x20a   : > { %8792 = vmatprep.subr.bf16.mxu0 %v9373_v45  ;;  %8402 = vmatprep.mubr.bf16.mxu1 %v10594_v51  ;;  %v6457_v51 = vsel %vm747_vm1, %v6454_v56, %v6456_v44 }
 0x20b   : > { %8786 = vmatprep.mubr.bf16.mxu0 %v6274_v36 }
 0x20c   : > { %8823 = vmatpush3.bf16.msra.mxu1 %v9373_v45 }
 0x20d   : > { %8793 = vmatpush3.bf16.msra.mxu0 %v9373_v45  ;;  %8816 = vmatprep.subr.bf16.mxu1 %v9375_v3 }
 0x20e   : > { %8794 = vmatprep.subr.bf16.mxu0 %v9375_v3 }
 0x20f   : > { %8403 = vmatmul.mubr.bf16.gmra.mrb[4].mxu1 %v10618_v9  ;;  %v9378_v9 = vld [vmem:[%s10902_s2 + $0x828] sm:$0xff]  }
 0x210   : > { %8787 = vmatmul.mubr.bf16.gmra.mrb[4].mxu0 %v6282_v22  ;;  %8824 = vmatpush3.bf16.msra.mxu1 %v9375_v3 }
 0x211   : > { %8795 = vmatpush3.bf16.msra.mxu0 %v9375_v3  ;;  %8817 = vmatprep.subr.bf16.mxu1 %v9376_v18 }
 0x212   : > { %8796 = vmatprep.subr.bf16.mxu0 %v9376_v18  ;;  %8806 = vmatprep.mubr.bf16.mxu0 %v6453_v47 }
 0x213   : > { %8810 = vmatprep.mubr.bf16.mxu1 %v6457_v51 }
 0x214   : > { %8825 = vmatpush3.bf16.msra.mxu1 %v9376_v18 }
 0x215   : > { %8797 = vmatpush3.bf16.msra.mxu0 %v9376_v18  ;;  %8818 = vmatprep.subr.bf16.mxu1 %v9377_v34 }
 0x216   : > { %8798 = vmatprep.subr.bf16.mxu0 %v9377_v34 }
 0x218   : > { %8826 = vmatpush3.bf16.msra.mxu1 %v9377_v34 }
 0x219   : > { %8799 = vmatpush3.bf16.msra.mxu0 %v9377_v34  ;;  %8819 = vmatprep.subr.bf16.mxu1 %v9378_v9 }
 0x21a   : > { %8800 = vmatprep.subr.bf16.mxu0 %v9378_v9 }
 0x21c   : > { %8827 = vmatpush3.bf16.msra.mxu1 %v9378_v9 }
 0x21d   : > { %8801 = vmatpush3.bf16.msra.mxu0 %v9378_v9  ;;  %8820 = vmatprep.subr.bf16.mxu1 %v9379_v2 }
 0x21e   : > { %8802 = vmatprep.subr.bf16.mxu0 %v9379_v2 }
 0x220   : > { %8828 = vmatpush3.bf16.msra.mxu1 %v9379_v2 }
 0x221   : > { %8803 = vmatpush3.bf16.msra.mxu0 %v9379_v2  ;;  %8821 = vmatprep.subr.bf16.mxu1 %v9380_v48 }
 0x222   : > { %8804 = vmatprep.subr.bf16.mxu0 %v9380_v48 }
 0x224   : > { %8829 = vmatpush3.bf16.msra.mxu1 %v9380_v48 }
 0x225   : > { %8805 = vmatpush3.bf16.msra.mxu0 %v9380_v48 }
 0x227   : > { %8811 = vmatmul.mubr.bf16.vlgmr.msra.gmra.mrb[8].mxu1 %v6459_v50 }
 0x228   : > { %8807 = vmatmul.mubr.bf16.vlgmr.msra.gmra.mrb[0].mxu0 %v6455_v4 }
 0x2da   : > { %v8400_v57 = vpop.f32.mrb[0].mxu1 }
 0x2db   : > { %v3339_v27 = vpop.f32.mrb[1].mxu1 }
 0x2dc   : > { %v8401_v8 = vpop.f32.mrb[2].mxu1 }
 0x2dd   : > { %v3342_v63 = vpop.f32.mrb[3].mxu1 }
 0x2e2   : > { %v8404_v62 = vpop.f32.mrb[4].mxu1 }
 0x2e3   : > { %v8788_v20 = vpop.f32.mrb[4].mxu0  ;;  %v3355_v17 = vpop.f32.mrb[5].mxu1 }
 0x2e4   : > { %v8834_v5 = vadd.f32 %v8788_v20, %v8404_v62  ;;  %v6385_v6 = vpop.f32.mrb[5].mxu0  ;;  %v8405_v10 = vpop.f32.mrb[6].mxu1 }
 0x2e5   : > { %v8836_v61 = vadd.f32 %v6385_v6, %v3355_v17  ;;  %v8789_v19 = vpop.f32.mrb[6].mxu0  ;;  %v3358_v1 = vpop.f32.mrb[7].mxu1 }
 0x2e6   : > { %v8838_v32 = vadd.f32 %v8789_v19, %v8405_v10  ;;  %v6388_v28 = vpop.f32.mrb[7].mxu0 }
 0x2e7   : > { %v8840_v59 = vadd.f32 %v6388_v28, %v3358_v1 }
 0x2fa   : > { %v8812_v11 = vpop.f32.mrb[8].mxu1 }
 0x2fb   : > { %v8808_v25 = vpop.f32.mrb[0].mxu0  ;;  %v8835_v41 = vadd.f32 %v8834_v5, %v8812_v11  ;;  %v6562_v31 = vpop.f32.mrb[9].mxu1 }
 0x2fc   : > { %v8830_v49 = vadd.f32 %v8808_v25, %v8400_v57  ;;  %v6546_v58 = vpop.f32.mrb[1].mxu0  ;;  %v8837_v42 = vadd.f32 %v8836_v61, %v6562_v31  ;;  %v8813_v23 = vpop.f32.mrb[10].mxu1 }
 0x2fd   : > { %v6614_v52 = vmul.f32 %v8835_v41, %v7578_v46  ;;  %v8831_v53 = vadd.f32 %v6546_v58, %v3339_v27  ;;  %v8809_v60 = vpop.f32.mrb[2].mxu0  ;;  %v8839_v43 = vadd.f32 %v8838_v32, %v8813_v23  ;;  %v6565_v30 = vpop.f32.mrb[11].mxu1 }
 0x2fe   : > { %v6610_v7 = vmul.f32 %v8830_v49, %v7578_v46  ;;  %v6612_v12 = vmul.f32 %v8837_v42, %v7578_v46  ;;  %v8832_v33 = vadd.f32 %v8809_v60, %v8401_v8  ;;  %v6549_v35 = vpop.f32.mrb[3].mxu0  ;;  %v8841_v0 = vadd.f32 %v8840_v59, %v6565_v30 }
 0x2ff   : > { %v6629_v38 = vadd.f32 %v7579_v55, %v6614_v52  ;;  %v6608_v14 = vmul.f32 %v8831_v53, %v7578_v46  ;;  %v6615_v24 = vmul.f32 %v8839_v43, %v7578_v46  ;;  %v8833_v37 = vadd.f32 %v6549_v35, %v3342_v63 }
 0x300   : > { %v6625_v54 = vadd.f32 %v7579_v55, %v6610_v7  ;;  %v6627_v45 = vadd.f32 %v7579_v55, %v6612_v12  ;;  %v6611_v40 = vmul.f32 %v8832_v33, %v7578_v46  ;;  %v6613_v36 = vmul.f32 %v8841_v0, %v7578_v46 }
 0x301   : > { %v6623_v21 = vadd.f32 %v7579_v55, %v6608_v14  ;;  %v6630_v16 = vadd.f32 %v7579_v55, %v6615_v24  ;;  %v6609_v26 = vmul.f32 %v8833_v37, %v7578_v46  ;;  %v6637_v15 = vmax.f32 %v6629_v38, 0.0 }
 0x302   : > { %v6626_v3 = vadd.f32 %v7579_v55, %v6611_v40  ;;  %v6628_v39 = vadd.f32 %v7579_v55, %v6613_v36  ;;  %v6633_v22 = vmax.f32 %v6625_v54, 0.0  ;;  %v6635_v18 = vmax.f32 %v6627_v45, 0.0 }
 0x303   : > { %v6638_v56 = vmax.f32 %v6630_v16, 0.0  ;;  %v6624_v44 = vadd.f32 %v7579_v55, %v6609_v26  ;;  %v6631_v34 = vmax.f32 %v6623_v21, 0.0 }
 0x304   : > { %v6634_v47 = vmax.f32 %v6626_v3, 0.0  ;;  %v6636_v51 = vmax.f32 %v6628_v39, 0.0 }
 0x305   : > { %v7620_v9 = vpack.c.bf16 %v6638_v56, %v6637_v15  ;;  %v6632_v2 = vmax.f32 %v6624_v44, 0.0 }
 0x306   : > { %v7610_v48 = vpack.c.bf16 %v6634_v47, %v6633_v22  ;;  %v7615_v29 = vpack.c.bf16 %v6636_v51, %v6635_v18 }
 0x307   : > { %7625 = vst [vmem:[%s305_s11 + $0x18] sm:$0xff] %v7620_v9   ;;  %v7605_v13 = vpack.c.bf16 %v6632_v2, %v6631_v34 }
 0x308   : > { %7623 = vst [vmem:[%s305_s11 + $0x8] sm:$0xff] %v7610_v48   ;;  %7624 = vst [vmem:[%s305_s11 + $0x10] sm:$0xff] %v7615_v29  }
 0x309   : > { %7606 = vst [vmem:[%s305_s11] sm:$0xff] %v7605_v13  }
 0x30a PF: > { %s15_s20 = sadd.s32 1, %s9403_s20   ;;  %s10906_s18 = smov %s9399_s19 }
 0x30b   : > { %p12_p5 = scmp.ge.s32.totalorder %s15_s20, 4   ;;  %s10907_s19 = smov %s10909_s21 }
 0x30d   :  { %14 = sbr.rel (!%p12_p5) target bundleno = 2 (0x2), region = 105 }

// kernel: pallas_forward.7
= control target key start
LH: loop header
LB: loop body
LE: loop exit
PB: predicated region body
PF: predicated region fallthrough
CT: control target
= control target key end

     0   :  { %s2108_s18 = smov 0   ;;  %s2110_s19 = smov 0   ;;  %s2473_s0 = inlined_call_operand.vmem [shape: bf16[2,96,128], index: 0, kind: input, shape index: {}, may-alias: {0,1}]   ;;  %s2474_s1 = inlined_call_operand.vmem [shape: bf16[2,96,128], index: 1, kind: input, shape index: {}, may-alias: {0,1}]   ;;  %s2475_s2 = inlined_call_operand.vmem [shape: bf16[6,128,128], index: 2, kind: input, shape index: {}]   ;;  %s2476_s3 = inlined_call_operand.vmem [shape: f32[1,128], index: 3, kind: input, shape index: {}]   ;;  %s2477_s4 = inlined_call_operand.vmem [shape: f32[1,128], index: 4, kind: input, shape index: {}]   ;;  %s2478_s5 = inlined_call_operand.vmem [shape: bf16[2,48,128], index: 5, kind: output, shape index: {}]  }
   0x1   :  { %s2112_s20 = smov 0  }
   0x2 LB: > { %s27_s21 = sadd.s32 1, %s2070_s19  ;;  %p1511_p0 = scmp.ge.s32.totalorder %s2074_s20, 1  ;;  %s2074_s20 = sphi %s2112_s20, %s15_s20   ;;  %s2070_s19 = sphi %s2110_s19, %s2480_s19   ;;  %s2066_s18 = sphi %s2108_s18, %s2479_s18  }
   0x3   : > { %p29_p1 = scmp.ge.s32.totalorder %s27_s21, 2  ;;  %p229_p2 = scmp.lt.s32.totalorder %s2074_s20, 3 }
   0x5   : > { %s2482_s21 = smov (%p29_p1, %s27_s21), 0  ;;  %p230_p3 = pnand %p1511_p0, %p229_p2 }
   0x6   : > { %v2000_v0 = vld [vmem:[%s2475_s2] sm:$0xff] (!%p230_p3)   ;;  %v2076_v1 = vmov (!%p230_p3), 0.0   ;;  %v2002_v3 = vld [vmem:[%s2475_s2 + $0x8] sm:$0xff] (!%p230_p3)   ;;  %vm2077_vm0 = vmmov (!%p230_p3), 0   ;;  %p276_p4 = scmp.lt.s32.totalorder (!%p230_p3), %s2066_s18, 1  ;;  %v2004_v5 = vld [vmem:[%s2475_s2 + $0x10] sm:$0xff] (!%p230_p3)  }
   0x7   : > { %233 = sbr.rel (%p230_p3) target bundleno = 345 (0x159), region = 40  ;;  %1748 = vmatprep.subr.bf16.mxu1 (!%p230_p3), %v2076_v1  ;;  %1832 = vmatprep.subr.bf16.mxu0 (!%p230_p3), %v2076_v1  ;;  %v2001_v2 = vld [vmem:[%s2475_s2 + $0xc0] sm:$0xff] (!%p230_p3)   ;;  %v2003_v4 = vld [vmem:[%s2475_s2 + $0xc8] sm:$0xff] (!%p230_p3)   ;;  %v2005_v6 = vld [vmem:[%s2475_s2 + $0xd0] sm:$0xff] (!%p230_p3)   ;;  %vm836_vm1 = vsmask.f32 (!%p230_p3), 6400 }
   0x8   : > { %1749 = vmatpush3.bf16.msra.mxu1 (!%p230_p3), %v2000_v0  ;;  %1764 = vmatprep.mubr.msk.bf16.mxu1 (!%p230_p3), %vm2077_vm0, %v2076_v1  ;;  %v2006_v7 = vld [vmem:[%s2475_s2 + $0x18] sm:$0xff] (!%p230_p3)   ;;  %v2008_v9 = vld [vmem:[%s2475_s2 + $0x20] sm:$0xff] (!%p230_p3)   ;;  %v2010_v12 = vld [vmem:[%s2475_s2 + $0x28] sm:$0xff] (!%p230_p3)   ;;  %vm681_vm2 = vcmask (!%p230_p3), 1046528   ;;  %vm1178_vm3 = vsmask.f32 (!%p230_p3), 5376 }
   0x9   : > { %1833 = vmatpush3.bf16.msra.mxu0 (!%p230_p3), %v2001_v2  ;;  %1750 = vmatprep.subr.bf16.mxu1 (!%p230_p3), %v2076_v1  ;;  %v2007_v8 = vld [vmem:[%s2475_s2 + $0xd8] sm:$0xff] (!%p230_p3)   ;;  %v2009_v10 = vld [vmem:[%s2475_s2 + $0xe0] sm:$0xff] (!%p230_p3)   ;;  %v2011_v14 = vld [vmem:[%s2475_s2 + $0xe8] sm:$0xff] (!%p230_p3)   ;;  %vm501_vm4 = vsmask.f32 (!%p230_p3), 7424  ;;  %vm1023_vm5 = vcmask (!%p230_p3), 1045504  }
   0xa   : > { %1834 = vmatprep.subr.bf16.mxu0 (!%p230_p3), %v2076_v1  ;;  %1848 = vmatprep.mubr.msk.bf16.mxu0 (!%p230_p3), %vm2077_vm0, %v2076_v1  ;;  %v2012_v17 = vld [vmem:[%s2475_s2 + $0x30] sm:$0xff] (!%p230_p3)   ;;  %v2014_v19 = vld [vmem:[%s2475_s2 + $0x38] sm:$0xff] (!%p230_p3)   ;;  %v2017_v30 = vld [vmem:[%s2475_s2 + $0x40] sm:$0xff] (!%p230_p3)  }
   0xb   : > { %v2013_v18 = vld [vmem:[%s2475_s2 + $0xf0] sm:$0xff] (!%p230_p3)   ;;  %v2015_v22 = vld [vmem:[%s2475_s2 + $0xf8] sm:$0xff] (!%p230_p3)   ;;  %v2019_v32 = vld [vmem:[%s2475_s2 + $0x100] sm:$0xff] (!%p230_p3)  }
   0xc   : > { %1751 = vmatpush3.bf16.msra.mxu1 (!%p230_p3), %v2002_v3  ;;  %v2020_v39 = vld [vmem:[%s2475_s2 + $0x48] sm:$0xff] (!%p230_p3)   ;;  %v2022_v42 = vld [vmem:[%s2475_s2 + $0x50] sm:$0xff] (!%p230_p3)   ;;  %v2024_v46 = vld [vmem:[%s2475_s2 + $0x58] sm:$0xff] (!%p230_p3)  }
   0xd   : > { %1835 = vmatpush3.bf16.msra.mxu0 (!%p230_p3), %v2003_v4  ;;  %1752 = vmatprep.subr.bf16.mxu1 (!%p230_p3), %v2076_v1  ;;  %v2021_v40 = vld [vmem:[%s2475_s2 + $0x108] sm:$0xff] (!%p230_p3)   ;;  %v2023_v43 = vld [vmem:[%s2475_s2 + $0x110] sm:$0xff] (!%p230_p3)   ;;  %v2025_v47 = vld [vmem:[%s2475_s2 + $0x118] sm:$0xff] (!%p230_p3)  }
   0xe   : > { %s2484_s18 = smov (!%p276_p4, %s2066_s18), 1  ;;  %1836 = vmatprep.subr.bf16.mxu0 %v2076_v1  ;;  %v2026_v52 = vld [vmem:[%s2475_s2 + $0x60] sm:$0xff]   ;;  %v2029_v60 = vld [vmem:[%s2475_s2 + $0x68] sm:$0xff]   ;;  %v2031_v4 = vld [vmem:[%s2475_s2 + $0x70] sm:$0xff]  }
   0xf   : > { %s1970_s9 = smul.u32 48, %s2484_s18  ;;  %v2028_v54 = vld [vmem:[%s2475_s2 + $0x120] sm:$0xff]   ;;  %v2030_v63 = vld [vmem:[%s2475_s2 + $0x128] sm:$0xff]  }
  0x10   : > { %1753 = vmatpush3.bf16.msra.mxu1 %v2004_v5  ;;  %s1972_s25 = smul.u32 24, %s2484_s18 }
  0x11   : > { %1837 = vmatpush3.bf16.msra.mxu0 %v2005_v6  ;;  %1754 = vmatprep.subr.bf16.mxu1 %v2076_v1  ;;  %s2170_s16 = scalar_lea.vmem %s2473_s0, %s1970_s9  ;;  %s1658_s13 = sadd.s32 24, %s1970_s9 }
  0x12   : > { %1838 = vmatprep.subr.bf16.mxu0 %v2076_v1  ;;  %v2181_v11 = vld [vmem:[%s2170_s16] sm:$0xff]   ;;  %v2188_v13 = vld [vmem:[%s2170_s16 + $0x8] sm:$0xff]   ;;  %v2222_v29 = vld [vmem:[%s2170_s16 + $0x10] sm:$0xff]   ;;  %s294_s17 = scalar_lea.vmem %s2474_s1, %s1658_s13  ;;  %s2459_s28 = scalar_lea.vmem %s2478_s5, %s1972_s25 }
  0x13   : > { %332 = vst [vmem:[#allocation2] sm:$0xff] %v2181_v11  ;;  %v2196_v15 = vshrl.u32 %v2188_v13, 16  ;;  %v2199_v16 = vshll.u32 %v2188_v13, 16  ;;  %v2234_v33 = vshrl.u32 %v2222_v29, 16  ;;  %v2237_v34 = vshll.u32 %v2222_v29, 16  ;;  %v2032_v38 = vld [vmem:[%s294_s17] sm:$0xff]  }
  0x14   : > { %1755 = vmatpush3.bf16.msra.mxu1 %v2006_v7  ;;  %343 = vst [vmem:[#allocation2 + $0x18] sm:$0xff] %v2032_v38  ;;  %v683_v58 = vrot.slane %v2188_v13, 1  ;;  %v685_v59 = vrot.slane %v2222_v29, 1  ;;  %v505_v61 = vshll.u32 %v2181_v11, 16  ;;  %v503_v5 = vshrl.u32 %v2181_v11, 16  ;;  %v2033_v7 = vld [vmem:[%s2475_s2 + $0x130] sm:$0xff]  }
  0x15   : > { %1839 = vmatpush3.bf16.msra.mxu0 %v2007_v8  ;;  %1756 = vmatprep.subr.bf16.mxu1 %v2076_v1  ;;  %v848_v20 = vrot.slane %v2196_v15, 1  ;;  %v851_v21 = vrot.slane %v2199_v16, 2  ;;  %v857_v36 = vrot.slane %v2234_v33, 1  ;;  %v860_v37 = vrot.slane %v2237_v34, 2 }
  0x16   : > { %1840 = vmatprep.subr.bf16.mxu0 %v2076_v1  ;;  %v1190_v55 = vrot.slane %v2196_v15, 2  ;;  %v1193_v57 = vrot.slane %v2199_v16, 3  ;;  %v2308_v0 = vsel %vm681_vm2, %v683_v58, %v685_v59  ;;  %v1199_v2 = vrot.slane %v2234_v33, 2 }
  0x17   : > { %v852_v28 = vor.u32 %v851_v21, %v848_v20  ;;  %v861_v41 = vor.u32 %v860_v37, %v857_v36  ;;  %v1202_v3 = vrot.slane %v2237_v34, 3  ;;  %v507_v6 = vrot.slane %v505_v61, 1  ;;  %v2036_v20 = vld [vmem:[%s2475_s2 + $0x80] sm:$0xff]   ;;  %v2042_v36 = vld [vmem:[%s2475_s2 + $0x98] sm:$0xff]  }
  0x18   : > { %1757 = vmatpush3.bf16.msra.mxu1 %v2008_v9  ;;  %v2297_v62 = vor.u32 %v1193_v57, %v1190_v55 }
  0x19   : > { %1841 = vmatpush3.bf16.msra.mxu0 %v2009_v10  ;;  %1758 = vmatprep.subr.bf16.mxu1 %v2076_v1  ;;  %v862_v44 = vsel %vm836_vm1, %v852_v28, %v861_v41  ;;  %v2326_v9 = vor.u32 %v1202_v3, %v1199_v2  ;;  %v2034_v10 = vld [vmem:[%s2475_s2 + $0x78] sm:$0xff]  }
  0x1a   : > { %1842 = vmatprep.subr.bf16.mxu0 %v2076_v1  ;;  %v815_v23 = vld [vmem:[#allocation2] sm:$0xfe] }
  0x1b   : > { %v838_v24 = vshrl.u32 %v815_v23, 16  ;;  %v841_v25 = vshll.u32 %v815_v23, 16  ;;  %v818_v45 = vld [vmem:[#allocation2 + $0x18] sm:$0x3]  ;;  %v998_v8 = vld [vmem:[#allocation2] sm:$0xfc] }
  0x1c   : > { %1759 = vmatpush3.bf16.msra.mxu1 %v2010_v12  ;;  %v864_v48 = vshrl.u32 %v818_v45, 16  ;;  %v867_v49 = vshll.u32 %v818_v45, 16  ;;  %v512_v12 = vrot.slane %v2199_v16, 1  ;;  %v2038_v23 = vld [vmem:[%s2475_s2 + $0x88] sm:$0xff]  }
  0x1d   : > { %1843 = vmatpush3.bf16.msra.mxu0 %v2011_v14  ;;  %1760 = vmatprep.subr.bf16.mxu1 %v2076_v1  ;;  %v840_v26 = vrot.slane %v838_v24, 1  ;;  %v843_v27 = vrot.slane %v841_v25, 2  ;;  %v2335_v14 = vsel %vm1178_vm3, %v2297_v62, %v2326_v9  ;;  %v520_v25 = vrot.slane %v2237_v34, 1  ;;  %v2046_v45 = vld [vmem:[%s2475_s2 + $0xa8] sm:$0xff]  }
  0x1e   : > { %1844 = vmatprep.subr.bf16.mxu0 %v2076_v1  ;;  %v866_v50 = vrot.slane %v864_v48, 1  ;;  %v869_v51 = vrot.slane %v867_v49, 2  ;;  %v516_v24 = vor.u32 %v2196_v15, %v512_v12  ;;  %v2040_v15 = vld [vmem:[%s2475_s2 + $0x90] sm:$0xff]  }
  0x1f   : > { %v844_v31 = vor.u32 %v843_v27, %v840_v26  ;;  %v2039_v26 = vld [vmem:[%s2475_s2 + $0x148] sm:$0xff]   ;;  %v1027_v27 = vrot.slane %v2222_v29, 2  ;;  %v524_v37 = vor.u32 %v2234_v33, %v520_v25  ;;  %v2044_v33 = vld [vmem:[%s2475_s2 + $0xa0] sm:$0xff]   ;;  %v2048_v49 = vld [vmem:[%s2475_s2 + $0xb0] sm:$0xff]  }
  0x20   : > { %1761 = vmatpush3.bf16.msra.mxu1 %v2012_v17  ;;  %v870_v53 = vor.u32 %v869_v51, %v866_v50  ;;  %v2035_v17 = vld [vmem:[%s2475_s2 + $0x138] sm:$0xff]   ;;  %v2049_v50 = vld [vmem:[%s2475_s2 + $0x170] sm:$0xff]   ;;  %v656_v51 = vld [vmem:[#allocation2] sm:$0xfe] }
  0x21   : > { %1845 = vmatpush3.bf16.msra.mxu0 %v2013_v18  ;;  %1762 = vmatprep.subr.bf16.mxu1 %v2076_v1  ;;  %v853_v35 = vsel %vm836_vm1, %v844_v31, %v852_v28  ;;  %v1024_v18 = vrot.slane %v998_v8, 2  ;;  %v483_v28 = vld [vmem:[#allocation2 + $0x18] sm:$0x1]  ;;  %v682_v55 = vrot.slane %v656_v51, 1 }
  0x22   : > { %1846 = vmatprep.subr.bf16.mxu0 %v2076_v1  ;;  %v871_v56 = vsel %vm836_vm1, %v861_v41, %v870_v53  ;;  %v526_v31 = vshll.u32 %v483_v28, 16 }
  0x24   : > { %1763 = vmatpush3.bf16.msra.mxu1 %v2014_v19  ;;  %v1025_v19 = vrot.slane %v2188_v13, 2  ;;  %v528_v38 = vrot.slane %v526_v31, 1 }
  0x25   : > { %1847 = vmatpush3.bf16.msra.mxu0 %v2015_v22  ;;  %1776 = vmatprep.subr.bf16.mxu1 %v2076_v1  ;;  %v2037_v22 = vld [vmem:[%s2475_s2 + $0x140] sm:$0xff]  }
  0x26   : > { %1860 = vmatprep.subr.bf16.mxu0 %v2076_v1  ;;  %v1026_v21 = vsel %vm1023_vm5, %v1024_v18, %v1025_v19  ;;  %v1028_v34 = vsel %vm1023_vm5, %v1025_v19, %v1027_v27  ;;  %v529_v41 = vsel %vm501_vm4, %v524_v37, %v528_v38 }
  0x27   : > { %1765 = vmatmul.mubr.bf16.vlgmr.msra.gmra.mrb[0].mxu1 %v2181_v11  ;;  %v508_v11 = vor.u32 %v507_v6, %v503_v5 }
  0x28   : > { %1777 = vmatpush3.bf16.msra.mxu1 %v2017_v30  ;;  %1849 = vmatmul.mubr.bf16.vlgmr.msra.gmra.mrb[0].mxu0 %v853_v35  ;;  %v521_v30 = vsel %vm501_vm4, %v516_v24, %v520_v25  ;;  %v1001_v35 = vld [vmem:[#allocation2 + $0x18] sm:$0x3] }
  0x29   : > { %1861 = vmatpush3.bf16.msra.mxu0 %v2019_v32  ;;  %1778 = vmatprep.subr.bf16.mxu1 %v2076_v1  ;;  %v513_v16 = vsel %vm501_vm4, %v508_v11, %v512_v12  ;;  %v2041_v32 = vld [vmem:[%s2475_s2 + $0x150] sm:$0xff]  }
  0x2a   : > { %1862 = vmatprep.subr.bf16.mxu0 %v2076_v1  ;;  %1768 = vmatprep.mubr.msk.bf16.mxu1 %vm2077_vm0, %v2076_v1 }
  0x2b   : > { %1852 = vmatprep.mubr.msk.bf16.mxu0 %vm2077_vm0, %v2076_v1 }
  0x2c   : > { %1779 = vmatpush3.bf16.msra.mxu1 %v2020_v39  ;;  %v2043_v39 = vld [vmem:[%s2475_s2 + $0x158] sm:$0xff]  }
  0x2d   : > { %1863 = vmatpush3.bf16.msra.mxu0 %v2021_v40  ;;  %1780 = vmatprep.subr.bf16.mxu1 %v2076_v1  ;;  %v1029_v40 = vrot.slane %v1001_v35, 2 }
  0x2e   : > { %1864 = vmatprep.subr.bf16.mxu0 %v2076_v1 }
  0x2f   : > { %1769 = vmatmul.mubr.bf16.gmra.mrb[4].mxu1 %v2188_v13 }
  0x30   : > { %1781 = vmatpush3.bf16.msra.mxu1 %v2022_v42  ;;  %1853 = vmatmul.mubr.bf16.gmra.mrb[4].mxu0 %v862_v44  ;;  %v2045_v42 = vld [vmem:[%s2475_s2 + $0x160] sm:$0xff]  }
  0x31   : > { %1865 = vmatpush3.bf16.msra.mxu0 %v2023_v43  ;;  %1782 = vmatprep.subr.bf16.mxu1 %v2076_v1  ;;  %v1030_v43 = vsel %vm1023_vm5, %v1027_v27, %v1029_v40  ;;  %v1157_v44 = vld [vmem:[#allocation2] sm:$0xfc] }
  0x32   : > { %1866 = vmatprep.subr.bf16.mxu0 %v2076_v1  ;;  %1772 = vmatprep.mubr.msk.bf16.mxu1 %vm2077_vm0, %v2076_v1  ;;  %v1183_v48 = vshll.u32 %v1157_v44, 16 }
  0x33   : > { %1856 = vmatprep.mubr.msk.bf16.mxu0 %vm2077_vm0, %v2076_v1 }
  0x34   : > { %1783 = vmatpush3.bf16.msra.mxu1 %v2024_v46  ;;  %v2047_v46 = vld [vmem:[%s2475_s2 + $0x168] sm:$0xff]   ;;  %v1185_v53 = vrot.slane %v1183_v48, 3 }
  0x35   : > { %1867 = vmatpush3.bf16.msra.mxu0 %v2025_v47  ;;  %1784 = vmatprep.subr.bf16.mxu1 %v2076_v1  ;;  %v1180_v47 = vshrl.u32 %v1157_v44, 16 }
  0x36   : > { %1868 = vmatprep.subr.bf16.mxu0 %v2076_v1 }
  0x37   : > { %1773 = vmatmul.mubr.bf16.gmra.mrb[8].mxu1 %v2222_v29  ;;  %v1648_v29 = vld [vmem:[%s2477_s4] ss:$0 sm:$0xff] }
  0x38   : > { %1785 = vmatpush3.bf16.msra.mxu1 %v2026_v52  ;;  %1857 = vmatmul.mubr.bf16.gmra.mrb[8].mxu0 %v871_v56  ;;  %v1182_v52 = vrot.slane %v1180_v47, 2  ;;  %v2051_v56 = vld [vmem:[%s2475_s2 + $0x178] sm:$0xff]  }
  0x39   : > { %1869 = vmatpush3.bf16.msra.mxu0 %v2028_v54  ;;  %1786 = vmatprep.subr.bf16.mxu1 %v2076_v1  ;;  %v2050_v54 = vld [vmem:[%s2475_s2 + $0xb8] sm:$0xff]  }
  0x3a   : > { %1870 = vmatprep.subr.bf16.mxu0 %v2076_v1  ;;  %1792 = vmatprep.mubr.msk.bf16.mxu1 %vm2077_vm0, %v2076_v1  ;;  %v1186_v57 = vor.u32 %v1185_v53, %v1182_v52 }
  0x3b   : > { %1876 = vmatprep.mubr.msk.bf16.mxu0 %vm2077_vm0, %v2076_v1 }
  0x3c   : > { %1787 = vmatpush3.bf16.msra.mxu1 %v2029_v60  ;;  %v684_v60 = vsel %vm681_vm2, %v682_v55, %v683_v58  ;;  %v1195_v61 = vsel %vm1178_vm3, %v1186_v57, %v2297_v62 }
  0x3d   : > { %1871 = vmatpush3.bf16.msra.mxu0 %v2030_v63  ;;  %1788 = vmatprep.subr.bf16.mxu1 %v2076_v1  ;;  %v1160_v63 = vld [vmem:[#allocation2 + $0x18] sm:$0x7] }
  0x3e   : > { %1872 = vmatprep.subr.bf16.mxu0 %v2076_v1  ;;  %v1206_v2 = vshrl.u32 %v1160_v63, 16  ;;  %v1209_v3 = vshll.u32 %v1160_v63, 16 }
  0x40   : > { %1789 = vmatpush3.bf16.msra.mxu1 %v2031_v4  ;;  %v659_v4 = vld [vmem:[#allocation2 + $0x18] sm:$0x1]  ;;  %v1208_v5 = vrot.slane %v1206_v2, 2  ;;  %v1211_v13 = vrot.slane %v1209_v3, 3 }
  0x41   : > { %1873 = vmatpush3.bf16.msra.mxu0 %v2033_v7  ;;  %1790 = vmatprep.subr.bf16.mxu1 %v2076_v1  ;;  %v687_v58 = vrot.slane %v659_v4, 1 }
  0x42   : > { %1874 = vmatprep.subr.bf16.mxu0 %v2076_v1  ;;  %v1212_v62 = vor.u32 %v1211_v13, %v1208_v5 }
  0x43   : > { %v688_v6 = vsel %vm681_vm2, %v685_v59, %v687_v58 }
  0x44   : > { %1791 = vmatpush3.bf16.msra.mxu1 %v2034_v10  ;;  %v1213_v7 = vsel %vm1178_vm3, %v2326_v9, %v1212_v62  ;;  %v1647_v10 = vld [vmem:[%s2476_s3] ss:$0 sm:$0xff] }
  0x45   : > { %1875 = vmatpush3.bf16.msra.mxu0 %v2035_v17  ;;  %1804 = vmatprep.subr.bf16.mxu1 %v2076_v1 }
  0x46   : > { %1888 = vmatprep.subr.bf16.mxu0 %v2076_v1 }
  0x47   : > { %1793 = vmatmul.mubr.bf16.vlgmr.msra.gmra.mrb[0].mxu1 %v513_v16 }
  0x48   : > { %1805 = vmatpush3.bf16.msra.mxu1 %v2036_v20  ;;  %1877 = vmatmul.mubr.bf16.vlgmr.msra.gmra.mrb[0].mxu0 %v1026_v21 }
  0x49   : > { %1889 = vmatpush3.bf16.msra.mxu0 %v2037_v22  ;;  %1806 = vmatprep.subr.bf16.mxu1 %v2076_v1 }
  0x4a   : > { %1890 = vmatprep.subr.bf16.mxu0 %v2076_v1  ;;  %1796 = vmatprep.mubr.msk.bf16.mxu1 %vm2077_vm0, %v2076_v1 }
  0x4b   : > { %1880 = vmatprep.mubr.msk.bf16.mxu0 %vm2077_vm0, %v2076_v1 }
  0x4c   : > { %1807 = vmatpush3.bf16.msra.mxu1 %v2038_v23 }
  0x4d   : > { %1891 = vmatpush3.bf16.msra.mxu0 %v2039_v26  ;;  %1808 = vmatprep.subr.bf16.mxu1 %v2076_v1 }
  0x4e   : > { %1892 = vmatprep.subr.bf16.mxu0 %v2076_v1 }
  0x4f   : > { %1797 = vmatmul.mubr.bf16.gmra.mrb[4].mxu1 %v521_v30 }
  0x50   : > { %1809 = vmatpush3.bf16.msra.mxu1 %v2040_v15  ;;  %1881 = vmatmul.mubr.bf16.gmra.mrb[4].mxu0 %v1028_v34 }
  0x51   : > { %1893 = vmatpush3.bf16.msra.mxu0 %v2041_v32  ;;  %1810 = vmatprep.subr.bf16.mxu1 %v2076_v1 }
  0x52   : > { %1894 = vmatprep.subr.bf16.mxu0 %v2076_v1  ;;  %1800 = vmatprep.mubr.msk.bf16.mxu1 %vm2077_vm0, %v2076_v1 }
  0x53   : > { %1884 = vmatprep.mubr.msk.bf16.mxu0 %vm2077_vm0, %v2076_v1 }
  0x54   : > { %1811 = vmatpush3.bf16.msra.mxu1 %v2042_v36 }
  0x55   : > { %1895 = vmatpush3.bf16.msra.mxu0 %v2043_v39  ;;  %1812 = vmatprep.subr.bf16.mxu1 %v2076_v1 }
  0x56   : > { %1896 = vmatprep.subr.bf16.mxu0 %v2076_v1 }
  0x57   : > { %1801 = vmatmul.mubr.bf16.gmra.mrb[8].mxu1 %v529_v41 }
  0x58   : > { %1813 = vmatpush3.bf16.msra.mxu1 %v2044_v33  ;;  %1885 = vmatmul.mubr.bf16.gmra.mrb[8].mxu0 %v1030_v43 }
  0x59   : > { %1897 = vmatpush3.bf16.msra.mxu0 %v2045_v42  ;;  %1814 = vmatprep.subr.bf16.mxu1 %v2076_v1 }
  0x5a   : > { %1898 = vmatprep.subr.bf16.mxu0 %v2076_v1  ;;  %1820 = vmatprep.mubr.msk.bf16.mxu1 %vm2077_vm0, %v2076_v1 }
  0x5b   : > { %1904 = vmatprep.mubr.msk.bf16.mxu0 %vm2077_vm0, %v2076_v1 }
  0x5c   : > { %1815 = vmatpush3.bf16.msra.mxu1 %v2046_v45 }
  0x5d   : > { %1899 = vmatpush3.bf16.msra.mxu0 %v2047_v46  ;;  %1816 = vmatprep.subr.bf16.mxu1 %v2076_v1 }
  0x5e   : > { %1900 = vmatprep.subr.bf16.mxu0 %v2076_v1 }
  0x60   : > { %1817 = vmatpush3.bf16.msra.mxu1 %v2048_v49 }
  0x61   : > { %1901 = vmatpush3.bf16.msra.mxu0 %v2049_v50  ;;  %1818 = vmatprep.subr.bf16.mxu1 %v2076_v1 }
  0x62   : > { %1902 = vmatprep.subr.bf16.mxu0 %v2076_v1 }
  0x64   : > { %1819 = vmatpush3.bf16.msra.mxu1 %v2050_v54 }
  0x65   : > { %1903 = vmatpush3.bf16.msra.mxu0 %v2051_v56 }
  0x67   : > { %1821 = vmatmul.mubr.bf16.vlgmr.msra.gmra.mrb[0].mxu1 %v684_v60 }
  0x68   : > { %1905 = vmatmul.mubr.bf16.vlgmr.msra.gmra.mrb[0].mxu0 %v1195_v61  ;;  %1824 = vmatprep.mubr.msk.bf16.mxu1 %vm2077_vm0, %v2076_v1 }
  0x69   : > { %1908 = vmatprep.mubr.msk.bf16.mxu0 %vm2077_vm0, %v2076_v1 }
  0x6f   : > { %1825 = vmatmul.mubr.bf16.gmra.mrb[4].mxu1 %v2308_v0 }
  0x70   : > { %1909 = vmatmul.mubr.bf16.gmra.mrb[4].mxu0 %v2335_v14  ;;  %1828 = vmatprep.mubr.msk.bf16.mxu1 %vm2077_vm0, %v2076_v1 }
  0x71   : > { %1912 = vmatprep.mubr.msk.bf16.mxu0 %vm2077_vm0, %v2076_v1 }
  0x77   : > { %1829 = vmatmul.mubr.bf16.gmra.mrb[8].mxu1 %v688_v6 }
  0x78   : > { %1913 = vmatmul.mubr.bf16.gmra.mrb[8].mxu0 %v1213_v7 }
 0x13a   : > { %v774_v0 = vpop.f32.mrb[0].mxu1 }
 0x13b   : > { %v1299_v8 = vpop.f32.mrb[0].mxu0  ;;  %v1822_v11 = vpop.f32.mrb[1].mxu1 }
 0x13c   : > { %v1916_v12 = vadd.f32 %v1299_v8, %v774_v0  ;;  %v1906_v1 = vpop.f32.mrb[1].mxu0  ;;  %v777_v14 = vpop.f32.mrb[2].mxu1 }
 0x13d   : > { %v1302_v59 = vpop.f32.mrb[2].mxu0  ;;  %v1823_v17 = vpop.f32.mrb[3].mxu1 }
 0x13e   : > { %v1347_v9 = vmul.f32 %v1916_v12, %v1647_v10  ;;  %v1917_v18 = vadd.f32 %v1302_v59, %v777_v14  ;;  %v1907_v19 = vpop.f32.mrb[3].mxu0 }
 0x140   : > { %v1360_v16 = vadd.f32 %v1648_v29, %v1347_v9  ;;  %v1348_v20 = vmul.f32 %v1917_v18, %v1647_v10 }
 0x142   : > { %v1361_v21 = vadd.f32 %v1648_v29, %v1348_v20  ;;  %v782_v22 = vpop.f32.mrb[4].mxu1  ;;  %v1366_v25 = vmax.f32 %v1360_v16, 0.0 }
 0x143   : > { %v1307_v23 = vpop.f32.mrb[4].mxu0  ;;  %v1826_v24 = vpop.f32.mrb[5].mxu1 }
 0x144   : > { %v1367_v26 = vmax.f32 %v1361_v21, 0.0  ;;  %v1918_v27 = vadd.f32 %v1307_v23, %v782_v22  ;;  %v1910_v28 = vpop.f32.mrb[5].mxu0  ;;  %v785_v15 = vpop.f32.mrb[6].mxu1 }
 0x145   : > { %v1310_v30 = vpop.f32.mrb[6].mxu0  ;;  %v1827_v31 = vpop.f32.mrb[7].mxu1 }
 0x146   : > { %v1668_v32 = vpack.c.bf16 %v1367_v26, %v1366_v25  ;;  %v1349_v34 = vmul.f32 %v1918_v27, %v1647_v10  ;;  %v1919_v35 = vadd.f32 %v1310_v30, %v785_v15  ;;  %v1911_v36 = vpop.f32.mrb[7].mxu0 }
 0x148   : > { %1669 = vst [vmem:[%s2459_s28] sm:$0xff] %v1668_v32   ;;  %v1362_v37 = vadd.f32 %v1648_v29, %v1349_v34  ;;  %v1350_v38 = vmul.f32 %v1919_v35, %v1647_v10 }
 0x14a   : > { %v1363_v39 = vadd.f32 %v1648_v29, %v1350_v38  ;;  %v790_v40 = vpop.f32.mrb[8].mxu1  ;;  %v1368_v42 = vmax.f32 %v1362_v37, 0.0 }
 0x14b   : > { %v1315_v33 = vpop.f32.mrb[8].mxu0  ;;  %v1830_v41 = vpop.f32.mrb[9].mxu1 }
 0x14c   : > { %v1369_v43 = vmax.f32 %v1363_v39, 0.0  ;;  %v1920_v44 = vadd.f32 %v1315_v33, %v790_v40  ;;  %v1914_v45 = vpop.f32.mrb[9].mxu0  ;;  %v793_v46 = vpop.f32.mrb[10].mxu1 }
 0x14d   : > { %v1318_v47 = vpop.f32.mrb[10].mxu0  ;;  %v1831_v48 = vpop.f32.mrb[11].mxu1 }
 0x14e   : > { %v1673_v49 = vpack.c.bf16 %v1369_v43, %v1368_v42  ;;  %v1351_v50 = vmul.f32 %v1920_v44, %v1647_v10  ;;  %v1921_v51 = vadd.f32 %v1318_v47, %v793_v46  ;;  %v1915_v52 = vpop.f32.mrb[11].mxu0 }
 0x150   : > { %1680 = vst [vmem:[%s2459_s28 + $0x8] sm:$0xff] %v1673_v49   ;;  %v1364_v53 = vadd.f32 %v1648_v29, %v1351_v50  ;;  %v1352_v54 = vmul.f32 %v1921_v51, %v1647_v10 }
 0x152   : > { %v1365_v55 = vadd.f32 %v1648_v29, %v1352_v54  ;;  %v1370_v56 = vmax.f32 %v1364_v53, 0.0 }
 0x154   : > { %v1371_v57 = vmax.f32 %v1365_v55, 0.0 }
 0x156   : > { %v1678_v60 = vpack.c.bf16 %v1371_v57, %v1370_v56 }
 0x158   : > { %1681 = vst [vmem:[%s2459_s28 + $0x10] sm:$0xff] %v1678_v60  }
 0x159 PF: > { %s15_s20 = sadd.s32 1, %s2074_s20   ;;  %s2479_s18 = smov %s2070_s19 }
 0x15a   : > { %p12_p5 = scmp.ge.s32.totalorder %s15_s20, 4   ;;  %s2480_s19 = smov %s2482_s21 }
 0x15c   :  { %14 = sbr.rel (!%p12_p5) target bundleno = 2 (0x2), region = 78 }

// kernel: pallas_forward.9
= control target key start
LH: loop header
LB: loop body
LE: loop exit
PB: predicated region body
PF: predicated region fallthrough
CT: control target
= control target key end

     0   :  { %s661_s15 = smov 0   ;;  %s663_s16 = smov 0   ;;  %s731_s0 = inlined_call_operand.vmem [shape: bf16[2,32,128], index: 0, kind: input, shape index: {}]   ;;  %s732_s1 = inlined_call_operand.vmem [shape: bf16[1,128,128], index: 1, kind: input, shape index: {}]   ;;  %s733_s2 = inlined_call_operand.vmem [shape: f32[1,128], index: 2, kind: input, shape index: {}]   ;;  %s734_s3 = inlined_call_operand.vmem [shape: f32[1,128], index: 3, kind: input, shape index: {}]   ;;  %s735_s4 = inlined_call_operand.vmem [shape: bf16[2,32,128], index: 4, kind: output, shape index: {}]  }
   0x1   :  { %s665_s17 = smov 0  }
   0x2 LB: > { %s26_s18 = sadd.s32 1, %s630_s16  ;;  %p508_p0 = scmp.ge.s32.totalorder %s634_s17, 1  ;;  %s634_s17 = sphi %s665_s17, %s14_s17   ;;  %s630_s16 = sphi %s663_s16, %s737_s16   ;;  %s626_s15 = sphi %s661_s15, %s736_s15  }
   0x3   : > { %p28_p1 = scmp.ge.s32.totalorder %s26_s18, 2  ;;  %p183_p2 = scmp.lt.s32.totalorder %s634_s17, 3 }
   0x5   : > { %s739_s18 = smov (%p28_p1, %s26_s18), 0  ;;  %p184_p3 = pnand %p508_p0, %p183_p2 }
   0x6   : > { %v602_v0 = vld [vmem:[%s732_s1] sm:$0xff] (!%p184_p3)   ;;  %p218_p4 = scmp.lt.s32.totalorder (!%p184_p3), %s626_s15, 1  ;;  %v603_v1 = vld [vmem:[%s732_s1 + $0x8] sm:$0xff] (!%p184_p3)   ;;  %v604_v2 = vld [vmem:[%s732_s1 + $0x10] sm:$0xff] (!%p184_p3)  }
   0x7   : > { %187 = sbr.rel (%p184_p3) target bundleno = 261 (0x105), region = 36  ;;  %558 = vmatprep.subr.bf16.mxu0 (!%p184_p3), %v602_v0  ;;  %v605_v3 = vld [vmem:[%s732_s1 + $0x18] sm:$0xff] (!%p184_p3)   ;;  %v606_v5 = vld [vmem:[%s732_s1 + $0x20] sm:$0xff] (!%p184_p3)   ;;  %v607_v6 = vld [vmem:[%s732_s1 + $0x28] sm:$0xff] (!%p184_p3)  }
   0x8   : > { %559 = vmatpush3.bf16.msra.mxu0 (!%p184_p3), %v602_v0  ;;  %v608_v7 = vld [vmem:[%s732_s1 + $0x30] sm:$0xff] (!%p184_p3)   ;;  %v609_v8 = vld [vmem:[%s732_s1 + $0x38] sm:$0xff] (!%p184_p3)   ;;  %v523_v10 = vld [vmem:[%s733_s2] ss:$0 sm:$0xff] (!%p184_p3) }
   0x9   : > { %560 = vmatprep.subr.bf16.mxu0 (!%p184_p3), %v603_v1  ;;  %v524_v14 = vld [vmem:[%s734_s3] ss:$0 sm:$0xff] (!%p184_p3) }
   0xc   : > { %561 = vmatpush3.bf16.msra.mxu0 (!%p184_p3), %v603_v1 }
   0xd   : > { %562 = vmatprep.subr.bf16.mxu0 (!%p184_p3), %v604_v2 }
   0xe   : > { %s741_s15 = smov (!%p218_p4, %s626_s15), 1 }
   0xf   : > { %s531_s25 = sshll.u32 %s741_s15, 4 }
  0x10   : > { %s225_s28 = scalar_lea.vmem %s731_s0, %s531_s25  ;;  %563 = vmatpush3.bf16.msra.mxu0 %v604_v2  ;;  %s235_s23 = scalar_lea.vmem %s735_s4, %s531_s25 }
  0x11   : > { %v610_v4 = vld [vmem:[%s225_s28] sm:$0xff]   ;;  %564 = vmatprep.subr.bf16.mxu0 %v605_v3  ;;  %v611_v9 = vld [vmem:[%s225_s28 + $0x8] sm:$0xff]  }
  0x12   : > { %574 = vmatprep.mubr.bf16.mxu0 %v610_v4 }
  0x14   : > { %565 = vmatpush3.bf16.msra.mxu0 %v605_v3 }
  0x15   : > { %566 = vmatprep.subr.bf16.mxu0 %v606_v5 }
  0x18   : > { %567 = vmatpush3.bf16.msra.mxu0 %v606_v5 }
  0x19   : > { %568 = vmatprep.subr.bf16.mxu0 %v607_v6 }
  0x1c   : > { %569 = vmatpush3.bf16.msra.mxu0 %v607_v6 }
  0x1d   : > { %570 = vmatprep.subr.bf16.mxu0 %v608_v7 }
  0x20   : > { %571 = vmatpush3.bf16.msra.mxu0 %v608_v7 }
  0x21   : > { %572 = vmatprep.subr.bf16.mxu0 %v609_v8 }
  0x24   : > { %573 = vmatpush3.bf16.msra.mxu0 %v609_v8 }
  0x27   : > { %575 = vmatmul.mubr.bf16.vlgmr.msra.gmra.mrb[0].mxu0 %v611_v9 }
  0xfa   : > { %v576_v11 = vpop.f32.mrb[0].mxu0 }
  0xfb   : > { %v384_v12 = vmul.f32 %v576_v11, %v523_v10  ;;  %v352_v13 = vpop.f32.mrb[1].mxu0 }
  0xfc   : > { %v382_v15 = vmul.f32 %v523_v10, %v352_v13  ;;  %v577_v16 = vpop.f32.mrb[2].mxu0 }
  0xfd   : > { %v385_v17 = vmul.f32 %v577_v16, %v523_v10  ;;  %v355_v18 = vpop.f32.mrb[3].mxu0  ;;  %v395_v20 = vadd.f32 %v524_v14, %v384_v12 }
  0xfe   : > { %v383_v19 = vmul.f32 %v523_v10, %v355_v18  ;;  %v393_v22 = vadd.f32 %v524_v14, %v382_v15 }
  0xff   : > { %v396_v21 = vadd.f32 %v524_v14, %v385_v17 }
 0x100   : > { %v394_v23 = vadd.f32 %v524_v14, %v383_v19 }
 0x101   : > { %v545_v24 = vpack.c.bf16 %v396_v21, %v395_v20 }
 0x102   : > { %v540_v25 = vpack.c.bf16 %v394_v23, %v393_v22 }
 0x103   : > { %547 = vst [vmem:[%s235_s23 + $0x8] sm:$0xff] %v545_v24  }
 0x104   : > { %541 = vst [vmem:[%s235_s23] sm:$0xff] %v540_v25  }
 0x105 PF: > { %s14_s17 = sadd.s32 1, %s634_s17   ;;  %s736_s15 = smov %s630_s16 }
 0x106   : > { %p11_p5 = scmp.ge.s32.totalorder %s14_s17, 4   ;;  %s737_s16 = smov %s739_s18 }
 0x108   :  { %13 = sbr.rel (!%p11_p5) target bundleno = 2 (0x2), region = 66 }

</bundles_post_ra>
